<compile_context>
chip_gen: v5e
topology: v5e:2x2
jax: 0.10.0
libtpu: 0.0.40
codegen_flags: <defaults>
</compile_context>

<pallas_src>
import functools
import math

import jax
import jax.numpy as jnp
from jax import lax
from jax.experimental import pallas as pl
from jax.experimental.pallas import tpu as pltpu  # noqa: F401  (TPU backend import)

# ---- small synthetic DistilBERT-like config (real: 768 dim / 12 heads / 6 layers / 3072 ffn) ----
VOCAB = 100
MAX_POS = 64
DIM = 32
N_HEADS = 4
HEAD_DIM = DIM // N_HEADS
HIDDEN = 64
N_LAYERS = 2
NUM_LABELS = 2
LN_EPS = 1e-12
LANE = 128            # lane-dense width for the classifier output slab


def _gelu(x):
    # exact (erf-based) GELU, matching torch.nn.functional.gelu default
    return 0.5 * x * (1.0 + lax.erf(x / jnp.sqrt(2.0).astype(x.dtype)))


def _layernorm(x, g, b):
    mu = jnp.mean(x, axis=-1, keepdims=True)
    var = jnp.mean((x - mu) ** 2, axis=-1, keepdims=True)
    return (x - mu) * lax.rsqrt(var + LN_EPS) * g + b


def _mm(a, b, contract, batch_dims=((), ())):
    """dot_general with f32 accumulation; transposes folded via contracting dims."""
    return lax.dot_general(a, b, (contract, batch_dims),
                           preferred_element_type=jnp.float32)


# --------------------------- fused Pallas kernel ------------------------------

def distilbert_fused_kernel(x_ref, mask_ref,
                            wq_ref, bq_ref, wk_ref, bk_ref, wv_ref, bv_ref,
                            wo_ref, bo_ref, ln1g_ref, ln1b_ref,
                            w1_ref, b1_ref, w2_ref, b2_ref, ln2g_ref, ln2b_ref,
                            embg_ref, embb_ref, clsw_ref, clsb_ref,
                            logits_ref,
                            *, batch, seq):
    """Embedding LayerNorm + all transformer blocks + classifier, fully in VMEM.

    x_ref      : (B*S, D)      summed word+position embeddings
    mask_ref   : (B, 1, S)     1.0 = attend, 0.0 = masked key
    wq/wk/wv   : (L*H, HD, D)  per-head projection weights (pre-split, pre-transposed)
    bq/bk/bv   : (L*H, 1, HD)
    wo         : (L*H, HD, D)  per-head rows of the output projection
    bo/ln*     : (L, 1, D)
    w1         : (L, D, HIDDEN), b1: (L, 1, HIDDEN)
    w2         : (L, HIDDEN, D), b2: (L, 1, D)
    clsw       : (D, 128) zero-padded, clsb: (1, 128) zero-padded
    logits_ref : (B*S, 128) lane-dense output slab
    """
    scale = jnp.float32(1.0 / math.sqrt(HEAD_DIM))
    neg_inf = jnp.float32(-1e30)

    # embeddings LayerNorm (DistilBERT Embeddings.LayerNorm)
    x = _layernorm(x_ref[...], embg_ref[...], embb_ref[...])     # (B*S, D)
    mask = mask_ref[...]                                          # (B, 1, S)

    for l in range(N_LAYERS):            # static unroll: whole stack in one kernel
        attn = jnp.zeros_like(x)         # (B*S, D)
        for h in range(N_HEADS):         # static unroll; leading-axis weight index only
            i = l * N_HEADS + h
            # per-head projections: (B*S, D) x (HD, D)^T folded into the MXU feed
            qh = _mm(x, wq_ref[i], ((1,), (1,))) + bq_ref[i]      # (B*S, HD)
            kh = _mm(x, wk_ref[i], ((1,), (1,))) + bk_ref[i]
            vh = _mm(x, wv_ref[i], ((1,), (1,))) + bv_ref[i]

            qh = qh.reshape(batch, seq, HEAD_DIM)
            kh = kh.reshape(batch, seq, HEAD_DIM)
            vh = vh.reshape(batch, seq, HEAD_DIM)

            # batched scores; K-"transpose" via contracting dims (no XLU transpose)
            scores = _mm(qh, kh, ((2,), (2,)), ((0,), (0,))) * scale       # (B, S, S)
            scores = jnp.where(mask > 0.5, scores, neg_inf)
            scores = scores - jnp.max(scores, axis=-1, keepdims=True)
            p = jnp.exp(scores)
            # normalization on the EUP (approx reciprocal) instead of a VALU divide
            p = p * pl.reciprocal(jnp.sum(p, axis=-1, keepdims=True), approx=True)

            ctx = _mm(p, vh, ((2,), (1,)), ((0,), (0,)))                   # (B, S, HD)
            # fold the per-head concat into the output projection:
            #   concat_h(ctx_h) @ Wo == sum_h ctx_h @ Wo[h*hd:(h+1)*hd, :]
            attn = attn + _mm(ctx.reshape(batch * seq, HEAD_DIM),
                              wo_ref[i], ((1,), (0,)))                     # (B*S, D)

        h1 = _layernorm(x + attn + bo_ref[l], ln1g_ref[l], ln1b_ref[l])    # sa_layer_norm

        ff = _mm(h1, w1_ref[l], ((1,), (0,))) + b1_ref[l]                  # (B*S, HIDDEN)
        ff = _gelu(ff)
        ff = _mm(ff, w2_ref[l], ((1,), (0,))) + b2_ref[l]                  # (B*S, D)
        x = _layernorm(h1 + ff, ln2g_ref[l], ln2b_ref[l])                  # output_layer_norm

    # fused classifier head, lane-dense (·, 128) store (dropout is identity at inference)
    logits_ref[...] = _mm(x, clsw_ref[...], ((1,), (0,))) + clsb_ref[...]


# --------------------------- wrapper ------------------------------------------

def _stack_layer_params(layers):
    """Stack per-layer params; pre-split q/k/v/out weights per head (plain JAX, one-off)."""
    wq_s, bq_s, wk_s, bk_s, wv_s, bv_s, wo_s = [], [], [], [], [], [], []
    bo_s, g1_s, be1_s, w1_s, bf1_s, w2_s, bf2_s, g2_s, be2_s = ([] for _ in range(9))
    for (wq, bq, wk, bk, wv, bv, wo, bo, g1, be1, w1, bf1, w2, bf2, g2, be2) in layers:
        for h in range(N_HEADS):
            lo, hi = h * HEAD_DIM, (h + 1) * HEAD_DIM
            wq_s.append(wq[:, lo:hi].T)   # (HD, D)
            bq_s.append(bq[:, lo:hi])     # (1, HD)
            wk_s.append(wk[:, lo:hi].T)
            bk_s.append(bk[:, lo:hi])
            wv_s.append(wv[:, lo:hi].T)
            bv_s.append(bv[:, lo:hi])
            wo_s.append(wo[lo:hi, :])     # (HD, D)
        bo_s.append(bo); g1_s.append(g1); be1_s.append(be1)
        w1_s.append(w1); bf1_s.append(bf1); w2_s.append(w2); bf2_s.append(bf2)
        g2_s.append(g2); be2_s.append(be2)
    st = lambda xs: jnp.stack(xs, axis=0)
    return (st(wq_s), st(bq_s), st(wk_s), st(bk_s), st(wv_s), st(bv_s),
            st(wo_s), st(bo_s), st(g1_s), st(be1_s),
            st(w1_s), st(bf1_s), st(w2_s), st(bf2_s), st(g2_s), st(be2_s))


def distilbert_classifier_forward(params, input_ids, attention_mask):
    B, S = input_ids.shape
    # Embedding gather (word + absolute position) stays in plain JAX (data-dependent gather);
    # the LayerNorm and everything downstream run inside the fused kernel.
    x = params["word_emb"][input_ids] + params["pos_emb"][jnp.arange(S)][None, :, :]
    x2 = x.reshape(B * S, DIM).astype(jnp.float32)
    mask3 = attention_mask.astype(jnp.float32).reshape(B, 1, S)

    stacked = _stack_layer_params(params["layers"])

    # lane-pad the classifier so the kernel output store is lane-dense (width 128)
    clsw_pad = jnp.zeros((DIM, LANE), jnp.float32).at[:, :NUM_LABELS].set(params["cls_w"])
    clsb_pad = jnp.zeros((1, LANE), jnp.float32).at[:, :NUM_LABELS].set(params["cls_b"])

    kernel = functools.partial(distilbert_fused_kernel, batch=B, seq=S)
    logits_pad = pl.pallas_call(
        kernel,
        out_shape=jax.ShapeDtypeStruct((B * S, LANE), jnp.float32),
    )(x2, mask3, *stacked,
      params["emb_ln_g"].reshape(1, DIM), params["emb_ln_b"].reshape(1, DIM),
      clsw_pad, clsb_pad)

    return logits_pad[:, :NUM_LABELS].reshape(B, S, NUM_LABELS)


# --------------------------- pure-JAX reference -------------------------------

def ref_forward(params, input_ids, attention_mask):
    B, S = input_ids.shape
    x = params["word_emb"][input_ids] + params["pos_emb"][jnp.arange(S)][None]
    x = _layernorm(x, params["emb_ln_g"], params["emb_ln_b"])
    mask = attention_mask.astype(jnp.float32)[:, None, None, :]           # (B,1,1,S)
    for (wq, bq, wk, bk, wv, bv, wo, bo, g1, be1, w1, bf1, w2, bf2, g2, be2) in params["layers"]:
        q, k, v = x @ wq + bq, x @ wk + bk, x @ wv + bv
        sp = lambda t: t.reshape(B, S, N_HEADS, HEAD_DIM).transpose(0, 2, 1, 3)
        qh, kh, vh = sp(q), sp(k), sp(v)
        scores = jnp.einsum('bhqd,bhkd->bhqk', qh, kh) / math.sqrt(HEAD_DIM)
        scores = jnp.where(mask > 0.5, scores, -1e30)
        p = jax.nn.softmax(scores, axis=-1)
        ctx = jnp.einsum('bhqk,bhkd->bhqd', p, vh).transpose(0, 2, 1, 3).reshape(B, S, DIM)
        x = _layernorm(x + ctx @ wo + bo, g1, be1)
        ff = _gelu(x @ w1 + bf1) @ w2 + bf2
        x = _layernorm(x + ff, g2, be2)
    return x @ params["cls_w"] + params["cls_b"]


# --------------------------- deterministic params -----------------------------

def init_params(key):
    keys = jax.random.split(key, 64)
    ki = iter(keys)

    def nrm(shape, scale=0.02):
        return (scale * jax.random.normal(next(ki), shape)).astype(jnp.float32)

    params = {
        "word_emb": nrm((VOCAB, DIM)),
        "pos_emb": nrm((MAX_POS, DIM)),
        "emb_ln_g": jnp.ones((DIM,), jnp.float32),
        "emb_ln_b": jnp.zeros((DIM,), jnp.float32),
        "layers": [],
        # xavier_normal_ for classifier weight: std = sqrt(2 / (fan_in + fan_out))
        "cls_w": nrm((DIM, NUM_LABELS), scale=math.sqrt(2.0 / (DIM + NUM_LABELS))),
        "cls_b": nrm((1, NUM_LABELS)),
    }
    for _ in range(N_LAYERS):
        layer = (
            nrm((DIM, DIM)), nrm((1, DIM)),                        # q_lin
            nrm((DIM, DIM)), nrm((1, DIM)),                        # k_lin
            nrm((DIM, DIM)), nrm((1, DIM)),                        # v_lin
            nrm((DIM, DIM)), nrm((1, DIM)),                        # out_lin
            jnp.ones((1, DIM), jnp.float32), jnp.zeros((1, DIM), jnp.float32),  # sa_layer_norm
            nrm((DIM, HIDDEN)), nrm((1, HIDDEN)),                  # ffn lin1
            nrm((HIDDEN, DIM)), nrm((1, DIM)),                     # ffn lin2
            jnp.ones((1, DIM), jnp.float32), jnp.zeros((1, DIM), jnp.float32),  # output_layer_norm
        )
        params["layers"].append(layer)
    return params


if __name__ == "__main__":
    key = jax.random.PRNGKey(0)
    pkey, ikey = jax.random.split(key)
    params = init_params(pkey)

    B, S = 2, 8
    input_ids = jax.random.randint(ikey, (B, S), 0, VOCAB)
    attention_mask = jnp.array([[1, 1, 1, 1, 1, 1, 1, 1],
                                [1, 1, 1, 1, 1, 0, 0, 0]], dtype=jnp.int32)

    logits = distilbert_classifier_forward(params, input_ids, attention_mask)
    logits = jax.block_until_ready(logits)

    ref = ref_forward(params, input_ids, attention_mask)
    assert logits.shape == (B, S, NUM_LABELS)
    assert jnp.allclose(logits, ref, atol=3e-3, rtol=3e-3), "Pallas output mismatch vs JAX reference"

    print("KERNEL_OK")
</pallas_src>

<mosaic_0001>
module attributes {stable_mosaic.version = 11 : i64} {
  func.func @distilbert_fused_kernel(%arg0: memref<16x32xf32, #tpu.memory_space<vmem>>, %arg1: memref<2x1x8xf32, #tpu.memory_space<vmem>>, %arg2: memref<8x8x32xf32, #tpu.memory_space<vmem>>, %arg3: memref<8x1x8xf32, #tpu.memory_space<vmem>>, %arg4: memref<8x8x32xf32, #tpu.memory_space<vmem>>, %arg5: memref<8x1x8xf32, #tpu.memory_space<vmem>>, %arg6: memref<8x8x32xf32, #tpu.memory_space<vmem>>, %arg7: memref<8x1x8xf32, #tpu.memory_space<vmem>>, %arg8: memref<8x8x32xf32, #tpu.memory_space<vmem>>, %arg9: memref<2x1x32xf32, #tpu.memory_space<vmem>>, %arg10: memref<2x1x32xf32, #tpu.memory_space<vmem>>, %arg11: memref<2x1x32xf32, #tpu.memory_space<vmem>>, %arg12: memref<2x32x64xf32, #tpu.memory_space<vmem>>, %arg13: memref<2x1x64xf32, #tpu.memory_space<vmem>>, %arg14: memref<2x64x32xf32, #tpu.memory_space<vmem>>, %arg15: memref<2x1x32xf32, #tpu.memory_space<vmem>>, %arg16: memref<2x1x32xf32, #tpu.memory_space<vmem>>, %arg17: memref<2x1x32xf32, #tpu.memory_space<vmem>>, %arg18: memref<1x32xf32, #tpu.memory_space<vmem>>, %arg19: memref<1x32xf32, #tpu.memory_space<vmem>>, %arg20: memref<32x128xf32, #tpu.memory_space<vmem>>, %arg21: memref<1x128xf32, #tpu.memory_space<vmem>>, %arg22: memref<16x128xf32, #tpu.memory_space<vmem>>) attributes {dimension_semantics = [], scalar_prefetch = 0 : i64, scratch_operands = 0 : i64, tpu.core_type = #tpu.core_type<tc>} {
    %c0 = arith.constant 0 : index
    %c0_0 = arith.constant 0 : index
    %0 = vector.load %arg0[%c0, %c0_0] : memref<16x32xf32, #tpu.memory_space<vmem>>, vector<16x32xf32>
    %c0_1 = arith.constant 0 : index
    %c0_2 = arith.constant 0 : index
    %1 = vector.load %arg18[%c0_1, %c0_2] : memref<1x32xf32, #tpu.memory_space<vmem>>, vector<1x32xf32>
    %c0_3 = arith.constant 0 : index
    %c0_4 = arith.constant 0 : index
    %2 = vector.load %arg19[%c0_3, %c0_4] : memref<1x32xf32, #tpu.memory_space<vmem>>, vector<1x32xf32>
    %cst = arith.constant dense<0.000000e+00> : vector<16xf32>
    %3 = vector.multi_reduction <add>, %0, %cst [1] : vector<16x32xf32> to vector<16xf32>
    %4 = vector.shape_cast %3 : vector<16xf32> to vector<16x1xf32>
    %cst_5 = arith.constant 3.200000e+01 : f32
    %5 = vector.broadcast %cst_5 : f32 to vector<16x1xf32>
    %6 = arith.divf %4, %5 : vector<16x1xf32>
    %7 = vector.broadcast %6 : vector<16x1xf32> to vector<16x32xf32>
    %8 = arith.subf %0, %7 : vector<16x32xf32>
    %9 = arith.mulf %8, %8 : vector<16x32xf32>
    %cst_6 = arith.constant dense<0.000000e+00> : vector<16xf32>
    %10 = vector.multi_reduction <add>, %9, %cst_6 [1] : vector<16x32xf32> to vector<16xf32>
    %11 = vector.shape_cast %10 : vector<16xf32> to vector<16x1xf32>
    %cst_7 = arith.constant 3.200000e+01 : f32
    %12 = vector.broadcast %cst_7 : f32 to vector<16x1xf32>
    %13 = arith.divf %11, %12 : vector<16x1xf32>
    %14 = vector.broadcast %6 : vector<16x1xf32> to vector<16x32xf32>
    %15 = arith.subf %0, %14 : vector<16x32xf32>
    %cst_8 = arith.constant 9.99999996E-13 : f32
    %16 = vector.broadcast %cst_8 : f32 to vector<16x1xf32>
    %17 = arith.addf %13, %16 : vector<16x1xf32>
    %18 = math.rsqrt %17 : vector<16x1xf32>
    %19 = vector.broadcast %18 : vector<16x1xf32> to vector<16x32xf32>
    %20 = arith.mulf %15, %19 : vector<16x32xf32>
    %21 = vector.broadcast %1 : vector<1x32xf32> to vector<16x32xf32>
    %22 = arith.mulf %20, %21 : vector<16x32xf32>
    %23 = vector.broadcast %2 : vector<1x32xf32> to vector<16x32xf32>
    %24 = arith.addf %22, %23 : vector<16x32xf32>
    %c0_9 = arith.constant 0 : index
    %c0_10 = arith.constant 0 : index
    %c0_11 = arith.constant 0 : index
    %25 = vector.load %arg1[%c0_9, %c0_10, %c0_11] : memref<2x1x8xf32, #tpu.memory_space<vmem>>, vector<2x1x8xf32>
    %cst_12 = arith.constant 0.000000e+00 : f32
    %26 = vector.broadcast %cst_12 : f32 to vector<16x32xf32>
    %c0_13 = arith.constant 0 : index
    %c0_14 = arith.constant 0 : index
    %c0_15 = arith.constant 0 : index
    %27 = vector.load %arg2[%c0_13, %c0_14, %c0_15] : memref<8x8x32xf32, #tpu.memory_space<vmem>>, vector<1x8x32xf32>
    %28 = vector.shape_cast %27 : vector<1x8x32xf32> to vector<8x32xf32>
    %cst_16 = arith.constant dense<0.000000e+00> : vector<16x8xf32>
    %29 = tpu.matmul %24, %28, %cst_16 {dimension_numbers = #tpu.dot_dimension_numbers<[1], [1], [0], [0], [0, 0, 1, 0], [], []>} : vector<16x32xf32>, vector<8x32xf32>, vector<16x8xf32> -> vector<16x8xf32>
    %c0_17 = arith.constant 0 : index
    %c0_18 = arith.constant 0 : index
    %c0_19 = arith.constant 0 : index
    %30 = vector.load %arg3[%c0_17, %c0_18, %c0_19] : memref<8x1x8xf32, #tpu.memory_space<vmem>>, vector<1x1x8xf32>
    %31 = vector.shape_cast %30 : vector<1x1x8xf32> to vector<1x8xf32>
    %32 = vector.broadcast %31 : vector<1x8xf32> to vector<16x8xf32>
    %33 = arith.addf %29, %32 : vector<16x8xf32>
    %c0_20 = arith.constant 0 : index
    %c0_21 = arith.constant 0 : index
    %c0_22 = arith.constant 0 : index
    %34 = vector.load %arg4[%c0_20, %c0_21, %c0_22] : memref<8x8x32xf32, #tpu.memory_space<vmem>>, vector<1x8x32xf32>
    %35 = vector.shape_cast %34 : vector<1x8x32xf32> to vector<8x32xf32>
    %cst_23 = arith.constant dense<0.000000e+00> : vector<16x8xf32>
    %36 = tpu.matmul %24, %35, %cst_23 {dimension_numbers = #tpu.dot_dimension_numbers<[1], [1], [0], [0], [0, 0, 1, 0], [], []>} : vector<16x32xf32>, vector<8x32xf32>, vector<16x8xf32> -> vector<16x8xf32>
    %c0_24 = arith.constant 0 : index
    %c0_25 = arith.constant 0 : index
    %c0_26 = arith.constant 0 : index
    %37 = vector.load %arg5[%c0_24, %c0_25, %c0_26] : memref<8x1x8xf32, #tpu.memory_space<vmem>>, vector<1x1x8xf32>
    %38 = vector.shape_cast %37 : vector<1x1x8xf32> to vector<1x8xf32>
    %39 = vector.broadcast %38 : vector<1x8xf32> to vector<16x8xf32>
    %40 = arith.addf %36, %39 : vector<16x8xf32>
    %c0_27 = arith.constant 0 : index
    %c0_28 = arith.constant 0 : index
    %c0_29 = arith.constant 0 : index
    %41 = vector.load %arg6[%c0_27, %c0_28, %c0_29] : memref<8x8x32xf32, #tpu.memory_space<vmem>>, vector<1x8x32xf32>
    %42 = vector.shape_cast %41 : vector<1x8x32xf32> to vector<8x32xf32>
    %cst_30 = arith.constant dense<0.000000e+00> : vector<16x8xf32>
    %43 = tpu.matmul %24, %42, %cst_30 {dimension_numbers = #tpu.dot_dimension_numbers<[1], [1], [0], [0], [0, 0, 1, 0], [], []>} : vector<16x32xf32>, vector<8x32xf32>, vector<16x8xf32> -> vector<16x8xf32>
    %c0_31 = arith.constant 0 : index
    %c0_32 = arith.constant 0 : index
    %c0_33 = arith.constant 0 : index
    %44 = vector.load %arg7[%c0_31, %c0_32, %c0_33] : memref<8x1x8xf32, #tpu.memory_space<vmem>>, vector<1x1x8xf32>
    %45 = vector.shape_cast %44 : vector<1x1x8xf32> to vector<1x8xf32>
    %46 = vector.broadcast %45 : vector<1x8xf32> to vector<16x8xf32>
    %47 = arith.addf %43, %46 : vector<16x8xf32>
    %48 = vector.shape_cast %33 : vector<16x8xf32> to vector<2x8x8xf32>
    %49 = vector.shape_cast %40 : vector<16x8xf32> to vector<2x8x8xf32>
    %50 = vector.shape_cast %47 : vector<16x8xf32> to vector<2x8x8xf32>
    %cst_34 = arith.constant dense<0.000000e+00> : vector<2x8x8xf32>
    %51 = tpu.matmul %48, %49, %cst_34 {dimension_numbers = #tpu.dot_dimension_numbers<[2], [2], [1], [1], [0, 0, 0, 1, 1, 1], [0], [0]>} : vector<2x8x8xf32>, vector<2x8x8xf32>, vector<2x8x8xf32> -> vector<2x8x8xf32>
    %cst_35 = arith.constant 0.353553385 : f32
    %52 = vector.broadcast %cst_35 : f32 to vector<2x8x8xf32>
    %53 = arith.mulf %51, %52 : vector<2x8x8xf32>
    %cst_36 = arith.constant 5.000000e-01 : f32
    %54 = vector.broadcast %cst_36 : f32 to vector<2x1x8xf32>
    %55 = arith.cmpf ogt, %25, %54 : vector<2x1x8xf32>
    %cst_37 = arith.constant -1.000000e+30 : f32
    %56 = vector.shape_cast %55 : vector<2x1x8xi1> to vector<2x1x8xi1>
    %57 = vector.broadcast %56 : vector<2x1x8xi1> to vector<2x8x8xi1>
    %58 = vector.broadcast %cst_37 : f32 to vector<2x8x8xf32>
    %59 = arith.select %57, %53, %58 : vector<2x8x8xi1>, vector<2x8x8xf32>
    %cst_38 = arith.constant dense<0xFF800000> : vector<2x8xf32>
    %60 = vector.multi_reduction <maximumf>, %59, %cst_38 [2] : vector<2x8x8xf32> to vector<2x8xf32>
    %61 = vector.shape_cast %60 : vector<2x8xf32> to vector<2x8x1xf32>
    %62 = vector.broadcast %61 : vector<2x8x1xf32> to vector<2x8x8xf32>
    %63 = arith.subf %59, %62 : vector<2x8x8xf32>
    %64 = math.exp %63 : vector<2x8x8xf32>
    %cst_39 = arith.constant dense<0.000000e+00> : vector<2x8xf32>
    %65 = vector.multi_reduction <add>, %64, %cst_39 [2] : vector<2x8x8xf32> to vector<2x8xf32>
    %66 = vector.shape_cast %65 : vector<2x8xf32> to vector<2x8x1xf32>
    %67 = tpu.reciprocal %66 {approx = true} : vector<2x8x1xf32> -> vector<2x8x1xf32>
    %68 = vector.broadcast %67 : vector<2x8x1xf32> to vector<2x8x8xf32>
    %69 = arith.mulf %64, %68 : vector<2x8x8xf32>
    %cst_40 = arith.constant dense<0.000000e+00> : vector<2x8x8xf32>
    %70 = tpu.matmul %69, %50, %cst_40 {dimension_numbers = #tpu.dot_dimension_numbers<[2], [1], [1], [2], [0, 0, 0, 1, 1, 2], [0], [0]>} : vector<2x8x8xf32>, vector<2x8x8xf32>, vector<2x8x8xf32> -> vector<2x8x8xf32>
    %71 = vector.shape_cast %70 : vector<2x8x8xf32> to vector<16x8xf32>
    %c0_41 = arith.constant 0 : index
    %c0_42 = arith.constant 0 : index
    %c0_43 = arith.constant 0 : index
    %72 = vector.load %arg8[%c0_41, %c0_42, %c0_43] : memref<8x8x32xf32, #tpu.memory_space<vmem>>, vector<1x8x32xf32>
    %73 = vector.shape_cast %72 : vector<1x8x32xf32> to vector<8x32xf32>
    %cst_44 = arith.constant dense<0.000000e+00> : vector<16x32xf32>
    %74 = tpu.matmul %71, %73, %cst_44 {dimension_numbers = #tpu.dot_dimension_numbers<[1], [0], [0], [1], [0, 0, 1, 1], [], []>} : vector<16x8xf32>, vector<8x32xf32>, vector<16x32xf32> -> vector<16x32xf32>
    %75 = arith.addf %26, %74 : vector<16x32xf32>
    %c1 = arith.constant 1 : index
    %c0_45 = arith.constant 0 : index
    %c0_46 = arith.constant 0 : index
    %76 = vector.load %arg2[%c1, %c0_45, %c0_46] : memref<8x8x32xf32, #tpu.memory_space<vmem>>, vector<1x8x32xf32>
    %77 = vector.shape_cast %76 : vector<1x8x32xf32> to vector<8x32xf32>
    %cst_47 = arith.constant dense<0.000000e+00> : vector<16x8xf32>
    %78 = tpu.matmul %24, %77, %cst_47 {dimension_numbers = #tpu.dot_dimension_numbers<[1], [1], [0], [0], [0, 0, 1, 0], [], []>} : vector<16x32xf32>, vector<8x32xf32>, vector<16x8xf32> -> vector<16x8xf32>
    %c1_48 = arith.constant 1 : index
    %c0_49 = arith.constant 0 : index
    %c0_50 = arith.constant 0 : index
    %79 = vector.load %arg3[%c1_48, %c0_49, %c0_50] : memref<8x1x8xf32, #tpu.memory_space<vmem>>, vector<1x1x8xf32>
    %80 = vector.shape_cast %79 : vector<1x1x8xf32> to vector<1x8xf32>
    %81 = vector.broadcast %80 : vector<1x8xf32> to vector<16x8xf32>
    %82 = arith.addf %78, %81 : vector<16x8xf32>
    %c1_51 = arith.constant 1 : index
    %c0_52 = arith.constant 0 : index
    %c0_53 = arith.constant 0 : index
    %83 = vector.load %arg4[%c1_51, %c0_52, %c0_53] : memref<8x8x32xf32, #tpu.memory_space<vmem>>, vector<1x8x32xf32>
    %84 = vector.shape_cast %83 : vector<1x8x32xf32> to vector<8x32xf32>
    %cst_54 = arith.constant dense<0.000000e+00> : vector<16x8xf32>
    %85 = tpu.matmul %24, %84, %cst_54 {dimension_numbers = #tpu.dot_dimension_numbers<[1], [1], [0], [0], [0, 0, 1, 0], [], []>} : vector<16x32xf32>, vector<8x32xf32>, vector<16x8xf32> -> vector<16x8xf32>
    %c1_55 = arith.constant 1 : index
    %c0_56 = arith.constant 0 : index
    %c0_57 = arith.constant 0 : index
    %86 = vector.load %arg5[%c1_55, %c0_56, %c0_57] : memref<8x1x8xf32, #tpu.memory_space<vmem>>, vector<1x1x8xf32>
    %87 = vector.shape_cast %86 : vector<1x1x8xf32> to vector<1x8xf32>
    %88 = vector.broadcast %87 : vector<1x8xf32> to vector<16x8xf32>
    %89 = arith.addf %85, %88 : vector<16x8xf32>
    %c1_58 = arith.constant 1 : index
    %c0_59 = arith.constant 0 : index
    %c0_60 = arith.constant 0 : index
    %90 = vector.load %arg6[%c1_58, %c0_59, %c0_60] : memref<8x8x32xf32, #tpu.memory_space<vmem>>, vector<1x8x32xf32>
    %91 = vector.shape_cast %90 : vector<1x8x32xf32> to vector<8x32xf32>
    %cst_61 = arith.constant dense<0.000000e+00> : vector<16x8xf32>
    %92 = tpu.matmul %24, %91, %cst_61 {dimension_numbers = #tpu.dot_dimension_numbers<[1], [1], [0], [0], [0, 0, 1, 0], [], []>} : vector<16x32xf32>, vector<8x32xf32>, vector<16x8xf32> -> vector<16x8xf32>
    %c1_62 = arith.constant 1 : index
    %c0_63 = arith.constant 0 : index
    %c0_64 = arith.constant 0 : index
    %93 = vector.load %arg7[%c1_62, %c0_63, %c0_64] : memref<8x1x8xf32, #tpu.memory_space<vmem>>, vector<1x1x8xf32>
    %94 = vector.shape_cast %93 : vector<1x1x8xf32> to vector<1x8xf32>
    %95 = vector.broadcast %94 : vector<1x8xf32> to vector<16x8xf32>
    %96 = arith.addf %92, %95 : vector<16x8xf32>
    %97 = vector.shape_cast %82 : vector<16x8xf32> to vector<2x8x8xf32>
    %98 = vector.shape_cast %89 : vector<16x8xf32> to vector<2x8x8xf32>
    %99 = vector.shape_cast %96 : vector<16x8xf32> to vector<2x8x8xf32>
    %cst_65 = arith.constant dense<0.000000e+00> : vector<2x8x8xf32>
    %100 = tpu.matmul %97, %98, %cst_65 {dimension_numbers = #tpu.dot_dimension_numbers<[2], [2], [1], [1], [0, 0, 0, 1, 1, 1], [0], [0]>} : vector<2x8x8xf32>, vector<2x8x8xf32>, vector<2x8x8xf32> -> vector<2x8x8xf32>
    %cst_66 = arith.constant 0.353553385 : f32
    %101 = vector.broadcast %cst_66 : f32 to vector<2x8x8xf32>
    %102 = arith.mulf %100, %101 : vector<2x8x8xf32>
    %cst_67 = arith.constant 5.000000e-01 : f32
    %103 = vector.broadcast %cst_67 : f32 to vector<2x1x8xf32>
    %104 = arith.cmpf ogt, %25, %103 : vector<2x1x8xf32>
    %cst_68 = arith.constant -1.000000e+30 : f32
    %105 = vector.shape_cast %104 : vector<2x1x8xi1> to vector<2x1x8xi1>
    %106 = vector.broadcast %105 : vector<2x1x8xi1> to vector<2x8x8xi1>
    %107 = vector.broadcast %cst_68 : f32 to vector<2x8x8xf32>
    %108 = arith.select %106, %102, %107 : vector<2x8x8xi1>, vector<2x8x8xf32>
    %cst_69 = arith.constant dense<0xFF800000> : vector<2x8xf32>
    %109 = vector.multi_reduction <maximumf>, %108, %cst_69 [2] : vector<2x8x8xf32> to vector<2x8xf32>
    %110 = vector.shape_cast %109 : vector<2x8xf32> to vector<2x8x1xf32>
    %111 = vector.broadcast %110 : vector<2x8x1xf32> to vector<2x8x8xf32>
    %112 = arith.subf %108, %111 : vector<2x8x8xf32>
    %113 = math.exp %112 : vector<2x8x8xf32>
    %cst_70 = arith.constant dense<0.000000e+00> : vector<2x8xf32>
    %114 = vector.multi_reduction <add>, %113, %cst_70 [2] : vector<2x8x8xf32> to vector<2x8xf32>
    %115 = vector.shape_cast %114 : vector<2x8xf32> to vector<2x8x1xf32>
    %116 = tpu.reciprocal %115 {approx = true} : vector<2x8x1xf32> -> vector<2x8x1xf32>
    %117 = vector.broadcast %116 : vector<2x8x1xf32> to vector<2x8x8xf32>
    %118 = arith.mulf %113, %117 : vector<2x8x8xf32>
    %cst_71 = arith.constant dense<0.000000e+00> : vector<2x8x8xf32>
    %119 = tpu.matmul %118, %99, %cst_71 {dimension_numbers = #tpu.dot_dimension_numbers<[2], [1], [1], [2], [0, 0, 0, 1, 1, 2], [0], [0]>} : vector<2x8x8xf32>, vector<2x8x8xf32>, vector<2x8x8xf32> -> vector<2x8x8xf32>
    %120 = vector.shape_cast %119 : vector<2x8x8xf32> to vector<16x8xf32>
    %c1_72 = arith.constant 1 : index
    %c0_73 = arith.constant 0 : index
    %c0_74 = arith.constant 0 : index
    %121 = vector.load %arg8[%c1_72, %c0_73, %c0_74] : memref<8x8x32xf32, #tpu.memory_space<vmem>>, vector<1x8x32xf32>
    %122 = vector.shape_cast %121 : vector<1x8x32xf32> to vector<8x32xf32>
    %cst_75 = arith.constant dense<0.000000e+00> : vector<16x32xf32>
    %123 = tpu.matmul %120, %122, %cst_75 {dimension_numbers = #tpu.dot_dimension_numbers<[1], [0], [0], [1], [0, 0, 1, 1], [], []>} : vector<16x8xf32>, vector<8x32xf32>, vector<16x32xf32> -> vector<16x32xf32>
    %124 = arith.addf %75, %123 : vector<16x32xf32>
    %c2 = arith.constant 2 : index
    %c0_76 = arith.constant 0 : index
    %c0_77 = arith.constant 0 : index
    %125 = vector.load %arg2[%c2, %c0_76, %c0_77] : memref<8x8x32xf32, #tpu.memory_space<vmem>>, vector<1x8x32xf32>
    %126 = vector.shape_cast %125 : vector<1x8x32xf32> to vector<8x32xf32>
    %cst_78 = arith.constant dense<0.000000e+00> : vector<16x8xf32>
    %127 = tpu.matmul %24, %126, %cst_78 {dimension_numbers = #tpu.dot_dimension_numbers<[1], [1], [0], [0], [0, 0, 1, 0], [], []>} : vector<16x32xf32>, vector<8x32xf32>, vector<16x8xf32> -> vector<16x8xf32>
    %c2_79 = arith.constant 2 : index
    %c0_80 = arith.constant 0 : index
    %c0_81 = arith.constant 0 : index
    %128 = vector.load %arg3[%c2_79, %c0_80, %c0_81] : memref<8x1x8xf32, #tpu.memory_space<vmem>>, vector<1x1x8xf32>
    %129 = vector.shape_cast %128 : vector<1x1x8xf32> to vector<1x8xf32>
    %130 = vector.broadcast %129 : vector<1x8xf32> to vector<16x8xf32>
    %131 = arith.addf %127, %130 : vector<16x8xf32>
    %c2_82 = arith.constant 2 : index
    %c0_83 = arith.constant 0 : index
    %c0_84 = arith.constant 0 : index
    %132 = vector.load %arg4[%c2_82, %c0_83, %c0_84] : memref<8x8x32xf32, #tpu.memory_space<vmem>>, vector<1x8x32xf32>
    %133 = vector.shape_cast %132 : vector<1x8x32xf32> to vector<8x32xf32>
    %cst_85 = arith.constant dense<0.000000e+00> : vector<16x8xf32>
    %134 = tpu.matmul %24, %133, %cst_85 {dimension_numbers = #tpu.dot_dimension_numbers<[1], [1], [0], [0], [0, 0, 1, 0], [], []>} : vector<16x32xf32>, vector<8x32xf32>, vector<16x8xf32> -> vector<16x8xf32>
    %c2_86 = arith.constant 2 : index
    %c0_87 = arith.constant 0 : index
    %c0_88 = arith.constant 0 : index
    %135 = vector.load %arg5[%c2_86, %c0_87, %c0_88] : memref<8x1x8xf32, #tpu.memory_space<vmem>>, vector<1x1x8xf32>
    %136 = vector.shape_cast %135 : vector<1x1x8xf32> to vector<1x8xf32>
    %137 = vector.broadcast %136 : vector<1x8xf32> to vector<16x8xf32>
    %138 = arith.addf %134, %137 : vector<16x8xf32>
    %c2_89 = arith.constant 2 : index
    %c0_90 = arith.constant 0 : index
    %c0_91 = arith.constant 0 : index
    %139 = vector.load %arg6[%c2_89, %c0_90, %c0_91] : memref<8x8x32xf32, #tpu.memory_space<vmem>>, vector<1x8x32xf32>
    %140 = vector.shape_cast %139 : vector<1x8x32xf32> to vector<8x32xf32>
    %cst_92 = arith.constant dense<0.000000e+00> : vector<16x8xf32>
    %141 = tpu.matmul %24, %140, %cst_92 {dimension_numbers = #tpu.dot_dimension_numbers<[1], [1], [0], [0], [0, 0, 1, 0], [], []>} : vector<16x32xf32>, vector<8x32xf32>, vector<16x8xf32> -> vector<16x8xf32>
    %c2_93 = arith.constant 2 : index
    %c0_94 = arith.constant 0 : index
    %c0_95 = arith.constant 0 : index
    %142 = vector.load %arg7[%c2_93, %c0_94, %c0_95] : memref<8x1x8xf32, #tpu.memory_space<vmem>>, vector<1x1x8xf32>
    %143 = vector.shape_cast %142 : vector<1x1x8xf32> to vector<1x8xf32>
    %144 = vector.broadcast %143 : vector<1x8xf32> to vector<16x8xf32>
    %145 = arith.addf %141, %144 : vector<16x8xf32>
    %146 = vector.shape_cast %131 : vector<16x8xf32> to vector<2x8x8xf32>
    %147 = vector.shape_cast %138 : vector<16x8xf32> to vector<2x8x8xf32>
    %148 = vector.shape_cast %145 : vector<16x8xf32> to vector<2x8x8xf32>
    %cst_96 = arith.constant dense<0.000000e+00> : vector<2x8x8xf32>
    %149 = tpu.matmul %146, %147, %cst_96 {dimension_numbers = #tpu.dot_dimension_numbers<[2], [2], [1], [1], [0, 0, 0, 1, 1, 1], [0], [0]>} : vector<2x8x8xf32>, vector<2x8x8xf32>, vector<2x8x8xf32> -> vector<2x8x8xf32>
    %cst_97 = arith.constant 0.353553385 : f32
    %150 = vector.broadcast %cst_97 : f32 to vector<2x8x8xf32>
    %151 = arith.mulf %149, %150 : vector<2x8x8xf32>
    %cst_98 = arith.constant 5.000000e-01 : f32
    %152 = vector.broadcast %cst_98 : f32 to vector<2x1x8xf32>
    %153 = arith.cmpf ogt, %25, %152 : vector<2x1x8xf32>
    %cst_99 = arith.constant -1.000000e+30 : f32
    %154 = vector.shape_cast %153 : vector<2x1x8xi1> to vector<2x1x8xi1>
    %155 = vector.broadcast %154 : vector<2x1x8xi1> to vector<2x8x8xi1>
    %156 = vector.broadcast %cst_99 : f32 to vector<2x8x8xf32>
    %157 = arith.select %155, %151, %156 : vector<2x8x8xi1>, vector<2x8x8xf32>
    %cst_100 = arith.constant dense<0xFF800000> : vector<2x8xf32>
    %158 = vector.multi_reduction <maximumf>, %157, %cst_100 [2] : vector<2x8x8xf32> to vector<2x8xf32>
    %159 = vector.shape_cast %158 : vector<2x8xf32> to vector<2x8x1xf32>
    %160 = vector.broadcast %159 : vector<2x8x1xf32> to vector<2x8x8xf32>
    %161 = arith.subf %157, %160 : vector<2x8x8xf32>
    %162 = math.exp %161 : vector<2x8x8xf32>
    %cst_101 = arith.constant dense<0.000000e+00> : vector<2x8xf32>
    %163 = vector.multi_reduction <add>, %162, %cst_101 [2] : vector<2x8x8xf32> to vector<2x8xf32>
    %164 = vector.shape_cast %163 : vector<2x8xf32> to vector<2x8x1xf32>
    %165 = tpu.reciprocal %164 {approx = true} : vector<2x8x1xf32> -> vector<2x8x1xf32>
    %166 = vector.broadcast %165 : vector<2x8x1xf32> to vector<2x8x8xf32>
    %167 = arith.mulf %162, %166 : vector<2x8x8xf32>
    %cst_102 = arith.constant dense<0.000000e+00> : vector<2x8x8xf32>
    %168 = tpu.matmul %167, %148, %cst_102 {dimension_numbers = #tpu.dot_dimension_numbers<[2], [1], [1], [2], [0, 0, 0, 1, 1, 2], [0], [0]>} : vector<2x8x8xf32>, vector<2x8x8xf32>, vector<2x8x8xf32> -> vector<2x8x8xf32>
    %169 = vector.shape_cast %168 : vector<2x8x8xf32> to vector<16x8xf32>
    %c2_103 = arith.constant 2 : index
    %c0_104 = arith.constant 0 : index
    %c0_105 = arith.constant 0 : index
    %170 = vector.load %arg8[%c2_103, %c0_104, %c0_105] : memref<8x8x32xf32, #tpu.memory_space<vmem>>, vector<1x8x32xf32>
    %171 = vector.shape_cast %170 : vector<1x8x32xf32> to vector<8x32xf32>
    %cst_106 = arith.constant dense<0.000000e+00> : vector<16x32xf32>
    %172 = tpu.matmul %169, %171, %cst_106 {dimension_numbers = #tpu.dot_dimension_numbers<[1], [0], [0], [1], [0, 0, 1, 1], [], []>} : vector<16x8xf32>, vector<8x32xf32>, vector<16x32xf32> -> vector<16x32xf32>
    %173 = arith.addf %124, %172 : vector<16x32xf32>
    %c3 = arith.constant 3 : index
    %c0_107 = arith.constant 0 : index
    %c0_108 = arith.constant 0 : index
    %174 = vector.load %arg2[%c3, %c0_107, %c0_108] : memref<8x8x32xf32, #tpu.memory_space<vmem>>, vector<1x8x32xf32>
    %175 = vector.shape_cast %174 : vector<1x8x32xf32> to vector<8x32xf32>
    %cst_109 = arith.constant dense<0.000000e+00> : vector<16x8xf32>
    %176 = tpu.matmul %24, %175, %cst_109 {dimension_numbers = #tpu.dot_dimension_numbers<[1], [1], [0], [0], [0, 0, 1, 0], [], []>} : vector<16x32xf32>, vector<8x32xf32>, vector<16x8xf32> -> vector<16x8xf32>
    %c3_110 = arith.constant 3 : index
    %c0_111 = arith.constant 0 : index
    %c0_112 = arith.constant 0 : index
    %177 = vector.load %arg3[%c3_110, %c0_111, %c0_112] : memref<8x1x8xf32, #tpu.memory_space<vmem>>, vector<1x1x8xf32>
    %178 = vector.shape_cast %177 : vector<1x1x8xf32> to vector<1x8xf32>
    %179 = vector.broadcast %178 : vector<1x8xf32> to vector<16x8xf32>
    %180 = arith.addf %176, %179 : vector<16x8xf32>
    %c3_113 = arith.constant 3 : index
    %c0_114 = arith.constant 0 : index
    %c0_115 = arith.constant 0 : index
    %181 = vector.load %arg4[%c3_113, %c0_114, %c0_115] : memref<8x8x32xf32, #tpu.memory_space<vmem>>, vector<1x8x32xf32>
    %182 = vector.shape_cast %181 : vector<1x8x32xf32> to vector<8x32xf32>
    %cst_116 = arith.constant dense<0.000000e+00> : vector<16x8xf32>
    %183 = tpu.matmul %24, %182, %cst_116 {dimension_numbers = #tpu.dot_dimension_numbers<[1], [1], [0], [0], [0, 0, 1, 0], [], []>} : vector<16x32xf32>, vector<8x32xf32>, vector<16x8xf32> -> vector<16x8xf32>
    %c3_117 = arith.constant 3 : index
    %c0_118 = arith.constant 0 : index
    %c0_119 = arith.constant 0 : index
    %184 = vector.load %arg5[%c3_117, %c0_118, %c0_119] : memref<8x1x8xf32, #tpu.memory_space<vmem>>, vector<1x1x8xf32>
    %185 = vector.shape_cast %184 : vector<1x1x8xf32> to vector<1x8xf32>
    %186 = vector.broadcast %185 : vector<1x8xf32> to vector<16x8xf32>
    %187 = arith.addf %183, %186 : vector<16x8xf32>
    %c3_120 = arith.constant 3 : index
    %c0_121 = arith.constant 0 : index
    %c0_122 = arith.constant 0 : index
    %188 = vector.load %arg6[%c3_120, %c0_121, %c0_122] : memref<8x8x32xf32, #tpu.memory_space<vmem>>, vector<1x8x32xf32>
    %189 = vector.shape_cast %188 : vector<1x8x32xf32> to vector<8x32xf32>
    %cst_123 = arith.constant dense<0.000000e+00> : vector<16x8xf32>
    %190 = tpu.matmul %24, %189, %cst_123 {dimension_numbers = #tpu.dot_dimension_numbers<[1], [1], [0], [0], [0, 0, 1, 0], [], []>} : vector<16x32xf32>, vector<8x32xf32>, vector<16x8xf32> -> vector<16x8xf32>
    %c3_124 = arith.constant 3 : index
    %c0_125 = arith.constant 0 : index
    %c0_126 = arith.constant 0 : index
    %191 = vector.load %arg7[%c3_124, %c0_125, %c0_126] : memref<8x1x8xf32, #tpu.memory_space<vmem>>, vector<1x1x8xf32>
    %192 = vector.shape_cast %191 : vector<1x1x8xf32> to vector<1x8xf32>
    %193 = vector.broadcast %192 : vector<1x8xf32> to vector<16x8xf32>
    %194 = arith.addf %190, %193 : vector<16x8xf32>
    %195 = vector.shape_cast %180 : vector<16x8xf32> to vector<2x8x8xf32>
    %196 = vector.shape_cast %187 : vector<16x8xf32> to vector<2x8x8xf32>
    %197 = vector.shape_cast %194 : vector<16x8xf32> to vector<2x8x8xf32>
    %cst_127 = arith.constant dense<0.000000e+00> : vector<2x8x8xf32>
    %198 = tpu.matmul %195, %196, %cst_127 {dimension_numbers = #tpu.dot_dimension_numbers<[2], [2], [1], [1], [0, 0, 0, 1, 1, 1], [0], [0]>} : vector<2x8x8xf32>, vector<2x8x8xf32>, vector<2x8x8xf32> -> vector<2x8x8xf32>
    %cst_128 = arith.constant 0.353553385 : f32
    %199 = vector.broadcast %cst_128 : f32 to vector<2x8x8xf32>
    %200 = arith.mulf %198, %199 : vector<2x8x8xf32>
    %cst_129 = arith.constant 5.000000e-01 : f32
    %201 = vector.broadcast %cst_129 : f32 to vector<2x1x8xf32>
    %202 = arith.cmpf ogt, %25, %201 : vector<2x1x8xf32>
    %cst_130 = arith.constant -1.000000e+30 : f32
    %203 = vector.shape_cast %202 : vector<2x1x8xi1> to vector<2x1x8xi1>
    %204 = vector.broadcast %203 : vector<2x1x8xi1> to vector<2x8x8xi1>
    %205 = vector.broadcast %cst_130 : f32 to vector<2x8x8xf32>
    %206 = arith.select %204, %200, %205 : vector<2x8x8xi1>, vector<2x8x8xf32>
    %cst_131 = arith.constant dense<0xFF800000> : vector<2x8xf32>
    %207 = vector.multi_reduction <maximumf>, %206, %cst_131 [2] : vector<2x8x8xf32> to vector<2x8xf32>
    %208 = vector.shape_cast %207 : vector<2x8xf32> to vector<2x8x1xf32>
    %209 = vector.broadcast %208 : vector<2x8x1xf32> to vector<2x8x8xf32>
    %210 = arith.subf %206, %209 : vector<2x8x8xf32>
    %211 = math.exp %210 : vector<2x8x8xf32>
    %cst_132 = arith.constant dense<0.000000e+00> : vector<2x8xf32>
    %212 = vector.multi_reduction <add>, %211, %cst_132 [2] : vector<2x8x8xf32> to vector<2x8xf32>
    %213 = vector.shape_cast %212 : vector<2x8xf32> to vector<2x8x1xf32>
    %214 = tpu.reciprocal %213 {approx = true} : vector<2x8x1xf32> -> vector<2x8x1xf32>
    %215 = vector.broadcast %214 : vector<2x8x1xf32> to vector<2x8x8xf32>
    %216 = arith.mulf %211, %215 : vector<2x8x8xf32>
    %cst_133 = arith.constant dense<0.000000e+00> : vector<2x8x8xf32>
    %217 = tpu.matmul %216, %197, %cst_133 {dimension_numbers = #tpu.dot_dimension_numbers<[2], [1], [1], [2], [0, 0, 0, 1, 1, 2], [0], [0]>} : vector<2x8x8xf32>, vector<2x8x8xf32>, vector<2x8x8xf32> -> vector<2x8x8xf32>
    %218 = vector.shape_cast %217 : vector<2x8x8xf32> to vector<16x8xf32>
    %c3_134 = arith.constant 3 : index
    %c0_135 = arith.constant 0 : index
    %c0_136 = arith.constant 0 : index
    %219 = vector.load %arg8[%c3_134, %c0_135, %c0_136] : memref<8x8x32xf32, #tpu.memory_space<vmem>>, vector<1x8x32xf32>
    %220 = vector.shape_cast %219 : vector<1x8x32xf32> to vector<8x32xf32>
    %cst_137 = arith.constant dense<0.000000e+00> : vector<16x32xf32>
    %221 = tpu.matmul %218, %220, %cst_137 {dimension_numbers = #tpu.dot_dimension_numbers<[1], [0], [0], [1], [0, 0, 1, 1], [], []>} : vector<16x8xf32>, vector<8x32xf32>, vector<16x32xf32> -> vector<16x32xf32>
    %222 = arith.addf %173, %221 : vector<16x32xf32>
    %223 = arith.addf %24, %222 : vector<16x32xf32>
    %c0_138 = arith.constant 0 : index
    %c0_139 = arith.constant 0 : index
    %c0_140 = arith.constant 0 : index
    %224 = vector.load %arg9[%c0_138, %c0_139, %c0_140] : memref<2x1x32xf32, #tpu.memory_space<vmem>>, vector<1x1x32xf32>
    %225 = vector.shape_cast %224 : vector<1x1x32xf32> to vector<1x32xf32>
    %226 = vector.broadcast %225 : vector<1x32xf32> to vector<16x32xf32>
    %227 = arith.addf %223, %226 : vector<16x32xf32>
    %c0_141 = arith.constant 0 : index
    %c0_142 = arith.constant 0 : index
    %c0_143 = arith.constant 0 : index
    %228 = vector.load %arg10[%c0_141, %c0_142, %c0_143] : memref<2x1x32xf32, #tpu.memory_space<vmem>>, vector<1x1x32xf32>
    %229 = vector.shape_cast %228 : vector<1x1x32xf32> to vector<1x32xf32>
    %c0_144 = arith.constant 0 : index
    %c0_145 = arith.constant 0 : index
    %c0_146 = arith.constant 0 : index
    %230 = vector.load %arg11[%c0_144, %c0_145, %c0_146] : memref<2x1x32xf32, #tpu.memory_space<vmem>>, vector<1x1x32xf32>
    %231 = vector.shape_cast %230 : vector<1x1x32xf32> to vector<1x32xf32>
    %cst_147 = arith.constant dense<0.000000e+00> : vector<16xf32>
    %232 = vector.multi_reduction <add>, %227, %cst_147 [1] : vector<16x32xf32> to vector<16xf32>
    %233 = vector.shape_cast %232 : vector<16xf32> to vector<16x1xf32>
    %cst_148 = arith.constant 3.200000e+01 : f32
    %234 = vector.broadcast %cst_148 : f32 to vector<16x1xf32>
    %235 = arith.divf %233, %234 : vector<16x1xf32>
    %236 = vector.broadcast %235 : vector<16x1xf32> to vector<16x32xf32>
    %237 = arith.subf %227, %236 : vector<16x32xf32>
    %238 = arith.mulf %237, %237 : vector<16x32xf32>
    %cst_149 = arith.constant dense<0.000000e+00> : vector<16xf32>
    %239 = vector.multi_reduction <add>, %238, %cst_149 [1] : vector<16x32xf32> to vector<16xf32>
    %240 = vector.shape_cast %239 : vector<16xf32> to vector<16x1xf32>
    %cst_150 = arith.constant 3.200000e+01 : f32
    %241 = vector.broadcast %cst_150 : f32 to vector<16x1xf32>
    %242 = arith.divf %240, %241 : vector<16x1xf32>
    %243 = vector.broadcast %235 : vector<16x1xf32> to vector<16x32xf32>
    %244 = arith.subf %227, %243 : vector<16x32xf32>
    %cst_151 = arith.constant 9.99999996E-13 : f32
    %245 = vector.broadcast %cst_151 : f32 to vector<16x1xf32>
    %246 = arith.addf %242, %245 : vector<16x1xf32>
    %247 = math.rsqrt %246 : vector<16x1xf32>
    %248 = vector.broadcast %247 : vector<16x1xf32> to vector<16x32xf32>
    %249 = arith.mulf %244, %248 : vector<16x32xf32>
    %250 = vector.broadcast %229 : vector<1x32xf32> to vector<16x32xf32>
    %251 = arith.mulf %249, %250 : vector<16x32xf32>
    %252 = vector.broadcast %231 : vector<1x32xf32> to vector<16x32xf32>
    %253 = arith.addf %251, %252 : vector<16x32xf32>
    %c0_152 = arith.constant 0 : index
    %c0_153 = arith.constant 0 : index
    %c0_154 = arith.constant 0 : index
    %254 = vector.load %arg12[%c0_152, %c0_153, %c0_154] : memref<2x32x64xf32, #tpu.memory_space<vmem>>, vector<1x32x64xf32>
    %255 = vector.shape_cast %254 : vector<1x32x64xf32> to vector<32x64xf32>
    %cst_155 = arith.constant dense<0.000000e+00> : vector<16x64xf32>
    %256 = tpu.matmul %253, %255, %cst_155 {dimension_numbers = #tpu.dot_dimension_numbers<[1], [0], [0], [1], [0, 0, 1, 1], [], []>} : vector<16x32xf32>, vector<32x64xf32>, vector<16x64xf32> -> vector<16x64xf32>
    %c0_156 = arith.constant 0 : index
    %c0_157 = arith.constant 0 : index
    %c0_158 = arith.constant 0 : index
    %257 = vector.load %arg13[%c0_156, %c0_157, %c0_158] : memref<2x1x64xf32, #tpu.memory_space<vmem>>, vector<1x1x64xf32>
    %258 = vector.shape_cast %257 : vector<1x1x64xf32> to vector<1x64xf32>
    %259 = vector.broadcast %258 : vector<1x64xf32> to vector<16x64xf32>
    %260 = arith.addf %256, %259 : vector<16x64xf32>
    %cst_159 = arith.constant 5.000000e-01 : f32
    %261 = vector.broadcast %cst_159 : f32 to vector<16x64xf32>
    %262 = arith.mulf %261, %260 : vector<16x64xf32>
    %cst_160 = arith.constant 2.000000e+00 : f32
    %263 = math.sqrt %cst_160 : f32
    %264 = vector.broadcast %263 : f32 to vector<16x64xf32>
    %265 = arith.divf %260, %264 : vector<16x64xf32>
    %266 = math.erf %265 : vector<16x64xf32>
    %cst_161 = arith.constant 1.000000e+00 : f32
    %267 = vector.broadcast %cst_161 : f32 to vector<16x64xf32>
    %268 = arith.addf %267, %266 : vector<16x64xf32>
    %269 = arith.mulf %262, %268 : vector<16x64xf32>
    %c0_162 = arith.constant 0 : index
    %c0_163 = arith.constant 0 : index
    %c0_164 = arith.constant 0 : index
    %270 = vector.load %arg14[%c0_162, %c0_163, %c0_164] : memref<2x64x32xf32, #tpu.memory_space<vmem>>, vector<1x64x32xf32>
    %271 = vector.shape_cast %270 : vector<1x64x32xf32> to vector<64x32xf32>
    %cst_165 = arith.constant dense<0.000000e+00> : vector<16x32xf32>
    %272 = tpu.matmul %269, %271, %cst_165 {dimension_numbers = #tpu.dot_dimension_numbers<[1], [0], [0], [1], [0, 0, 1, 1], [], []>} : vector<16x64xf32>, vector<64x32xf32>, vector<16x32xf32> -> vector<16x32xf32>
    %c0_166 = arith.constant 0 : index
    %c0_167 = arith.constant 0 : index
    %c0_168 = arith.constant 0 : index
    %273 = vector.load %arg15[%c0_166, %c0_167, %c0_168] : memref<2x1x32xf32, #tpu.memory_space<vmem>>, vector<1x1x32xf32>
    %274 = vector.shape_cast %273 : vector<1x1x32xf32> to vector<1x32xf32>
    %275 = vector.broadcast %274 : vector<1x32xf32> to vector<16x32xf32>
    %276 = arith.addf %272, %275 : vector<16x32xf32>
    %277 = arith.addf %253, %276 : vector<16x32xf32>
    %c0_169 = arith.constant 0 : index
    %c0_170 = arith.constant 0 : index
    %c0_171 = arith.constant 0 : index
    %278 = vector.load %arg16[%c0_169, %c0_170, %c0_171] : memref<2x1x32xf32, #tpu.memory_space<vmem>>, vector<1x1x32xf32>
    %279 = vector.shape_cast %278 : vector<1x1x32xf32> to vector<1x32xf32>
    %c0_172 = arith.constant 0 : index
    %c0_173 = arith.constant 0 : index
    %c0_174 = arith.constant 0 : index
    %280 = vector.load %arg17[%c0_172, %c0_173, %c0_174] : memref<2x1x32xf32, #tpu.memory_space<vmem>>, vector<1x1x32xf32>
    %281 = vector.shape_cast %280 : vector<1x1x32xf32> to vector<1x32xf32>
    %cst_175 = arith.constant dense<0.000000e+00> : vector<16xf32>
    %282 = vector.multi_reduction <add>, %277, %cst_175 [1] : vector<16x32xf32> to vector<16xf32>
    %283 = vector.shape_cast %282 : vector<16xf32> to vector<16x1xf32>
    %cst_176 = arith.constant 3.200000e+01 : f32
    %284 = vector.broadcast %cst_176 : f32 to vector<16x1xf32>
    %285 = arith.divf %283, %284 : vector<16x1xf32>
    %286 = vector.broadcast %285 : vector<16x1xf32> to vector<16x32xf32>
    %287 = arith.subf %277, %286 : vector<16x32xf32>
    %288 = arith.mulf %287, %287 : vector<16x32xf32>
    %cst_177 = arith.constant dense<0.000000e+00> : vector<16xf32>
    %289 = vector.multi_reduction <add>, %288, %cst_177 [1] : vector<16x32xf32> to vector<16xf32>
    %290 = vector.shape_cast %289 : vector<16xf32> to vector<16x1xf32>
    %cst_178 = arith.constant 3.200000e+01 : f32
    %291 = vector.broadcast %cst_178 : f32 to vector<16x1xf32>
    %292 = arith.divf %290, %291 : vector<16x1xf32>
    %293 = vector.broadcast %285 : vector<16x1xf32> to vector<16x32xf32>
    %294 = arith.subf %277, %293 : vector<16x32xf32>
    %cst_179 = arith.constant 9.99999996E-13 : f32
    %295 = vector.broadcast %cst_179 : f32 to vector<16x1xf32>
    %296 = arith.addf %292, %295 : vector<16x1xf32>
    %297 = math.rsqrt %296 : vector<16x1xf32>
    %298 = vector.broadcast %297 : vector<16x1xf32> to vector<16x32xf32>
    %299 = arith.mulf %294, %298 : vector<16x32xf32>
    %300 = vector.broadcast %279 : vector<1x32xf32> to vector<16x32xf32>
    %301 = arith.mulf %299, %300 : vector<16x32xf32>
    %302 = vector.broadcast %281 : vector<1x32xf32> to vector<16x32xf32>
    %303 = arith.addf %301, %302 : vector<16x32xf32>
    %cst_180 = arith.constant 0.000000e+00 : f32
    %304 = vector.broadcast %cst_180 : f32 to vector<16x32xf32>
    %c4 = arith.constant 4 : index
    %c0_181 = arith.constant 0 : index
    %c0_182 = arith.constant 0 : index
    %305 = vector.load %arg2[%c4, %c0_181, %c0_182] : memref<8x8x32xf32, #tpu.memory_space<vmem>>, vector<1x8x32xf32>
    %306 = vector.shape_cast %305 : vector<1x8x32xf32> to vector<8x32xf32>
    %cst_183 = arith.constant dense<0.000000e+00> : vector<16x8xf32>
    %307 = tpu.matmul %303, %306, %cst_183 {dimension_numbers = #tpu.dot_dimension_numbers<[1], [1], [0], [0], [0, 0, 1, 0], [], []>} : vector<16x32xf32>, vector<8x32xf32>, vector<16x8xf32> -> vector<16x8xf32>
    %c4_184 = arith.constant 4 : index
    %c0_185 = arith.constant 0 : index
    %c0_186 = arith.constant 0 : index
    %308 = vector.load %arg3[%c4_184, %c0_185, %c0_186] : memref<8x1x8xf32, #tpu.memory_space<vmem>>, vector<1x1x8xf32>
    %309 = vector.shape_cast %308 : vector<1x1x8xf32> to vector<1x8xf32>
    %310 = vector.broadcast %309 : vector<1x8xf32> to vector<16x8xf32>
    %311 = arith.addf %307, %310 : vector<16x8xf32>
    %c4_187 = arith.constant 4 : index
    %c0_188 = arith.constant 0 : index
    %c0_189 = arith.constant 0 : index
    %312 = vector.load %arg4[%c4_187, %c0_188, %c0_189] : memref<8x8x32xf32, #tpu.memory_space<vmem>>, vector<1x8x32xf32>
    %313 = vector.shape_cast %312 : vector<1x8x32xf32> to vector<8x32xf32>
    %cst_190 = arith.constant dense<0.000000e+00> : vector<16x8xf32>
    %314 = tpu.matmul %303, %313, %cst_190 {dimension_numbers = #tpu.dot_dimension_numbers<[1], [1], [0], [0], [0, 0, 1, 0], [], []>} : vector<16x32xf32>, vector<8x32xf32>, vector<16x8xf32> -> vector<16x8xf32>
    %c4_191 = arith.constant 4 : index
    %c0_192 = arith.constant 0 : index
    %c0_193 = arith.constant 0 : index
    %315 = vector.load %arg5[%c4_191, %c0_192, %c0_193] : memref<8x1x8xf32, #tpu.memory_space<vmem>>, vector<1x1x8xf32>
    %316 = vector.shape_cast %315 : vector<1x1x8xf32> to vector<1x8xf32>
    %317 = vector.broadcast %316 : vector<1x8xf32> to vector<16x8xf32>
    %318 = arith.addf %314, %317 : vector<16x8xf32>
    %c4_194 = arith.constant 4 : index
    %c0_195 = arith.constant 0 : index
    %c0_196 = arith.constant 0 : index
    %319 = vector.load %arg6[%c4_194, %c0_195, %c0_196] : memref<8x8x32xf32, #tpu.memory_space<vmem>>, vector<1x8x32xf32>
    %320 = vector.shape_cast %319 : vector<1x8x32xf32> to vector<8x32xf32>
    %cst_197 = arith.constant dense<0.000000e+00> : vector<16x8xf32>
    %321 = tpu.matmul %303, %320, %cst_197 {dimension_numbers = #tpu.dot_dimension_numbers<[1], [1], [0], [0], [0, 0, 1, 0], [], []>} : vector<16x32xf32>, vector<8x32xf32>, vector<16x8xf32> -> vector<16x8xf32>
    %c4_198 = arith.constant 4 : index
    %c0_199 = arith.constant 0 : index
    %c0_200 = arith.constant 0 : index
    %322 = vector.load %arg7[%c4_198, %c0_199, %c0_200] : memref<8x1x8xf32, #tpu.memory_space<vmem>>, vector<1x1x8xf32>
    %323 = vector.shape_cast %322 : vector<1x1x8xf32> to vector<1x8xf32>
    %324 = vector.broadcast %323 : vector<1x8xf32> to vector<16x8xf32>
    %325 = arith.addf %321, %324 : vector<16x8xf32>
    %326 = vector.shape_cast %311 : vector<16x8xf32> to vector<2x8x8xf32>
    %327 = vector.shape_cast %318 : vector<16x8xf32> to vector<2x8x8xf32>
    %328 = vector.shape_cast %325 : vector<16x8xf32> to vector<2x8x8xf32>
    %cst_201 = arith.constant dense<0.000000e+00> : vector<2x8x8xf32>
    %329 = tpu.matmul %326, %327, %cst_201 {dimension_numbers = #tpu.dot_dimension_numbers<[2], [2], [1], [1], [0, 0, 0, 1, 1, 1], [0], [0]>} : vector<2x8x8xf32>, vector<2x8x8xf32>, vector<2x8x8xf32> -> vector<2x8x8xf32>
    %cst_202 = arith.constant 0.353553385 : f32
    %330 = vector.broadcast %cst_202 : f32 to vector<2x8x8xf32>
    %331 = arith.mulf %329, %330 : vector<2x8x8xf32>
    %cst_203 = arith.constant 5.000000e-01 : f32
    %332 = vector.broadcast %cst_203 : f32 to vector<2x1x8xf32>
    %333 = arith.cmpf ogt, %25, %332 : vector<2x1x8xf32>
    %cst_204 = arith.constant -1.000000e+30 : f32
    %334 = vector.shape_cast %333 : vector<2x1x8xi1> to vector<2x1x8xi1>
    %335 = vector.broadcast %334 : vector<2x1x8xi1> to vector<2x8x8xi1>
    %336 = vector.broadcast %cst_204 : f32 to vector<2x8x8xf32>
    %337 = arith.select %335, %331, %336 : vector<2x8x8xi1>, vector<2x8x8xf32>
    %cst_205 = arith.constant dense<0xFF800000> : vector<2x8xf32>
    %338 = vector.multi_reduction <maximumf>, %337, %cst_205 [2] : vector<2x8x8xf32> to vector<2x8xf32>
    %339 = vector.shape_cast %338 : vector<2x8xf32> to vector<2x8x1xf32>
    %340 = vector.broadcast %339 : vector<2x8x1xf32> to vector<2x8x8xf32>
    %341 = arith.subf %337, %340 : vector<2x8x8xf32>
    %342 = math.exp %341 : vector<2x8x8xf32>
    %cst_206 = arith.constant dense<0.000000e+00> : vector<2x8xf32>
    %343 = vector.multi_reduction <add>, %342, %cst_206 [2] : vector<2x8x8xf32> to vector<2x8xf32>
    %344 = vector.shape_cast %343 : vector<2x8xf32> to vector<2x8x1xf32>
    %345 = tpu.reciprocal %344 {approx = true} : vector<2x8x1xf32> -> vector<2x8x1xf32>
    %346 = vector.broadcast %345 : vector<2x8x1xf32> to vector<2x8x8xf32>
    %347 = arith.mulf %342, %346 : vector<2x8x8xf32>
    %cst_207 = arith.constant dense<0.000000e+00> : vector<2x8x8xf32>
    %348 = tpu.matmul %347, %328, %cst_207 {dimension_numbers = #tpu.dot_dimension_numbers<[2], [1], [1], [2], [0, 0, 0, 1, 1, 2], [0], [0]>} : vector<2x8x8xf32>, vector<2x8x8xf32>, vector<2x8x8xf32> -> vector<2x8x8xf32>
    %349 = vector.shape_cast %348 : vector<2x8x8xf32> to vector<16x8xf32>
    %c4_208 = arith.constant 4 : index
    %c0_209 = arith.constant 0 : index
    %c0_210 = arith.constant 0 : index
    %350 = vector.load %arg8[%c4_208, %c0_209, %c0_210] : memref<8x8x32xf32, #tpu.memory_space<vmem>>, vector<1x8x32xf32>
    %351 = vector.shape_cast %350 : vector<1x8x32xf32> to vector<8x32xf32>
    %cst_211 = arith.constant dense<0.000000e+00> : vector<16x32xf32>
    %352 = tpu.matmul %349, %351, %cst_211 {dimension_numbers = #tpu.dot_dimension_numbers<[1], [0], [0], [1], [0, 0, 1, 1], [], []>} : vector<16x8xf32>, vector<8x32xf32>, vector<16x32xf32> -> vector<16x32xf32>
    %353 = arith.addf %304, %352 : vector<16x32xf32>
    %c5 = arith.constant 5 : index
    %c0_212 = arith.constant 0 : index
    %c0_213 = arith.constant 0 : index
    %354 = vector.load %arg2[%c5, %c0_212, %c0_213] : memref<8x8x32xf32, #tpu.memory_space<vmem>>, vector<1x8x32xf32>
    %355 = vector.shape_cast %354 : vector<1x8x32xf32> to vector<8x32xf32>
    %cst_214 = arith.constant dense<0.000000e+00> : vector<16x8xf32>
    %356 = tpu.matmul %303, %355, %cst_214 {dimension_numbers = #tpu.dot_dimension_numbers<[1], [1], [0], [0], [0, 0, 1, 0], [], []>} : vector<16x32xf32>, vector<8x32xf32>, vector<16x8xf32> -> vector<16x8xf32>
    %c5_215 = arith.constant 5 : index
    %c0_216 = arith.constant 0 : index
    %c0_217 = arith.constant 0 : index
    %357 = vector.load %arg3[%c5_215, %c0_216, %c0_217] : memref<8x1x8xf32, #tpu.memory_space<vmem>>, vector<1x1x8xf32>
    %358 = vector.shape_cast %357 : vector<1x1x8xf32> to vector<1x8xf32>
    %359 = vector.broadcast %358 : vector<1x8xf32> to vector<16x8xf32>
    %360 = arith.addf %356, %359 : vector<16x8xf32>
    %c5_218 = arith.constant 5 : index
    %c0_219 = arith.constant 0 : index
    %c0_220 = arith.constant 0 : index
    %361 = vector.load %arg4[%c5_218, %c0_219, %c0_220] : memref<8x8x32xf32, #tpu.memory_space<vmem>>, vector<1x8x32xf32>
    %362 = vector.shape_cast %361 : vector<1x8x32xf32> to vector<8x32xf32>
    %cst_221 = arith.constant dense<0.000000e+00> : vector<16x8xf32>
    %363 = tpu.matmul %303, %362, %cst_221 {dimension_numbers = #tpu.dot_dimension_numbers<[1], [1], [0], [0], [0, 0, 1, 0], [], []>} : vector<16x32xf32>, vector<8x32xf32>, vector<16x8xf32> -> vector<16x8xf32>
    %c5_222 = arith.constant 5 : index
    %c0_223 = arith.constant 0 : index
    %c0_224 = arith.constant 0 : index
    %364 = vector.load %arg5[%c5_222, %c0_223, %c0_224] : memref<8x1x8xf32, #tpu.memory_space<vmem>>, vector<1x1x8xf32>
    %365 = vector.shape_cast %364 : vector<1x1x8xf32> to vector<1x8xf32>
    %366 = vector.broadcast %365 : vector<1x8xf32> to vector<16x8xf32>
    %367 = arith.addf %363, %366 : vector<16x8xf32>
    %c5_225 = arith.constant 5 : index
    %c0_226 = arith.constant 0 : index
    %c0_227 = arith.constant 0 : index
    %368 = vector.load %arg6[%c5_225, %c0_226, %c0_227] : memref<8x8x32xf32, #tpu.memory_space<vmem>>, vector<1x8x32xf32>
    %369 = vector.shape_cast %368 : vector<1x8x32xf32> to vector<8x32xf32>
    %cst_228 = arith.constant dense<0.000000e+00> : vector<16x8xf32>
    %370 = tpu.matmul %303, %369, %cst_228 {dimension_numbers = #tpu.dot_dimension_numbers<[1], [1], [0], [0], [0, 0, 1, 0], [], []>} : vector<16x32xf32>, vector<8x32xf32>, vector<16x8xf32> -> vector<16x8xf32>
    %c5_229 = arith.constant 5 : index
    %c0_230 = arith.constant 0 : index
    %c0_231 = arith.constant 0 : index
    %371 = vector.load %arg7[%c5_229, %c0_230, %c0_231] : memref<8x1x8xf32, #tpu.memory_space<vmem>>, vector<1x1x8xf32>
    %372 = vector.shape_cast %371 : vector<1x1x8xf32> to vector<1x8xf32>
    %373 = vector.broadcast %372 : vector<1x8xf32> to vector<16x8xf32>
    %374 = arith.addf %370, %373 : vector<16x8xf32>
    %375 = vector.shape_cast %360 : vector<16x8xf32> to vector<2x8x8xf32>
    %376 = vector.shape_cast %367 : vector<16x8xf32> to vector<2x8x8xf32>
    %377 = vector.shape_cast %374 : vector<16x8xf32> to vector<2x8x8xf32>
    %cst_232 = arith.constant dense<0.000000e+00> : vector<2x8x8xf32>
    %378 = tpu.matmul %375, %376, %cst_232 {dimension_numbers = #tpu.dot_dimension_numbers<[2], [2], [1], [1], [0, 0, 0, 1, 1, 1], [0], [0]>} : vector<2x8x8xf32>, vector<2x8x8xf32>, vector<2x8x8xf32> -> vector<2x8x8xf32>
    %cst_233 = arith.constant 0.353553385 : f32
    %379 = vector.broadcast %cst_233 : f32 to vector<2x8x8xf32>
    %380 = arith.mulf %378, %379 : vector<2x8x8xf32>
    %cst_234 = arith.constant 5.000000e-01 : f32
    %381 = vector.broadcast %cst_234 : f32 to vector<2x1x8xf32>
    %382 = arith.cmpf ogt, %25, %381 : vector<2x1x8xf32>
    %cst_235 = arith.constant -1.000000e+30 : f32
    %383 = vector.shape_cast %382 : vector<2x1x8xi1> to vector<2x1x8xi1>
    %384 = vector.broadcast %383 : vector<2x1x8xi1> to vector<2x8x8xi1>
    %385 = vector.broadcast %cst_235 : f32 to vector<2x8x8xf32>
    %386 = arith.select %384, %380, %385 : vector<2x8x8xi1>, vector<2x8x8xf32>
    %cst_236 = arith.constant dense<0xFF800000> : vector<2x8xf32>
    %387 = vector.multi_reduction <maximumf>, %386, %cst_236 [2] : vector<2x8x8xf32> to vector<2x8xf32>
    %388 = vector.shape_cast %387 : vector<2x8xf32> to vector<2x8x1xf32>
    %389 = vector.broadcast %388 : vector<2x8x1xf32> to vector<2x8x8xf32>
    %390 = arith.subf %386, %389 : vector<2x8x8xf32>
    %391 = math.exp %390 : vector<2x8x8xf32>
    %cst_237 = arith.constant dense<0.000000e+00> : vector<2x8xf32>
    %392 = vector.multi_reduction <add>, %391, %cst_237 [2] : vector<2x8x8xf32> to vector<2x8xf32>
    %393 = vector.shape_cast %392 : vector<2x8xf32> to vector<2x8x1xf32>
    %394 = tpu.reciprocal %393 {approx = true} : vector<2x8x1xf32> -> vector<2x8x1xf32>
    %395 = vector.broadcast %394 : vector<2x8x1xf32> to vector<2x8x8xf32>
    %396 = arith.mulf %391, %395 : vector<2x8x8xf32>
    %cst_238 = arith.constant dense<0.000000e+00> : vector<2x8x8xf32>
    %397 = tpu.matmul %396, %377, %cst_238 {dimension_numbers = #tpu.dot_dimension_numbers<[2], [1], [1], [2], [0, 0, 0, 1, 1, 2], [0], [0]>} : vector<2x8x8xf32>, vector<2x8x8xf32>, vector<2x8x8xf32> -> vector<2x8x8xf32>
    %398 = vector.shape_cast %397 : vector<2x8x8xf32> to vector<16x8xf32>
    %c5_239 = arith.constant 5 : index
    %c0_240 = arith.constant 0 : index
    %c0_241 = arith.constant 0 : index
    %399 = vector.load %arg8[%c5_239, %c0_240, %c0_241] : memref<8x8x32xf32, #tpu.memory_space<vmem>>, vector<1x8x32xf32>
    %400 = vector.shape_cast %399 : vector<1x8x32xf32> to vector<8x32xf32>
    %cst_242 = arith.constant dense<0.000000e+00> : vector<16x32xf32>
    %401 = tpu.matmul %398, %400, %cst_242 {dimension_numbers = #tpu.dot_dimension_numbers<[1], [0], [0], [1], [0, 0, 1, 1], [], []>} : vector<16x8xf32>, vector<8x32xf32>, vector<16x32xf32> -> vector<16x32xf32>
    %402 = arith.addf %353, %401 : vector<16x32xf32>
    %c6 = arith.constant 6 : index
    %c0_243 = arith.constant 0 : index
    %c0_244 = arith.constant 0 : index
    %403 = vector.load %arg2[%c6, %c0_243, %c0_244] : memref<8x8x32xf32, #tpu.memory_space<vmem>>, vector<1x8x32xf32>
    %404 = vector.shape_cast %403 : vector<1x8x32xf32> to vector<8x32xf32>
    %cst_245 = arith.constant dense<0.000000e+00> : vector<16x8xf32>
    %405 = tpu.matmul %303, %404, %cst_245 {dimension_numbers = #tpu.dot_dimension_numbers<[1], [1], [0], [0], [0, 0, 1, 0], [], []>} : vector<16x32xf32>, vector<8x32xf32>, vector<16x8xf32> -> vector<16x8xf32>
    %c6_246 = arith.constant 6 : index
    %c0_247 = arith.constant 0 : index
    %c0_248 = arith.constant 0 : index
    %406 = vector.load %arg3[%c6_246, %c0_247, %c0_248] : memref<8x1x8xf32, #tpu.memory_space<vmem>>, vector<1x1x8xf32>
    %407 = vector.shape_cast %406 : vector<1x1x8xf32> to vector<1x8xf32>
    %408 = vector.broadcast %407 : vector<1x8xf32> to vector<16x8xf32>
    %409 = arith.addf %405, %408 : vector<16x8xf32>
    %c6_249 = arith.constant 6 : index
    %c0_250 = arith.constant 0 : index
    %c0_251 = arith.constant 0 : index
    %410 = vector.load %arg4[%c6_249, %c0_250, %c0_251] : memref<8x8x32xf32, #tpu.memory_space<vmem>>, vector<1x8x32xf32>
    %411 = vector.shape_cast %410 : vector<1x8x32xf32> to vector<8x32xf32>
    %cst_252 = arith.constant dense<0.000000e+00> : vector<16x8xf32>
    %412 = tpu.matmul %303, %411, %cst_252 {dimension_numbers = #tpu.dot_dimension_numbers<[1], [1], [0], [0], [0, 0, 1, 0], [], []>} : vector<16x32xf32>, vector<8x32xf32>, vector<16x8xf32> -> vector<16x8xf32>
    %c6_253 = arith.constant 6 : index
    %c0_254 = arith.constant 0 : index
    %c0_255 = arith.constant 0 : index
    %413 = vector.load %arg5[%c6_253, %c0_254, %c0_255] : memref<8x1x8xf32, #tpu.memory_space<vmem>>, vector<1x1x8xf32>
    %414 = vector.shape_cast %413 : vector<1x1x8xf32> to vector<1x8xf32>
    %415 = vector.broadcast %414 : vector<1x8xf32> to vector<16x8xf32>
    %416 = arith.addf %412, %415 : vector<16x8xf32>
    %c6_256 = arith.constant 6 : index
    %c0_257 = arith.constant 0 : index
    %c0_258 = arith.constant 0 : index
    %417 = vector.load %arg6[%c6_256, %c0_257, %c0_258] : memref<8x8x32xf32, #tpu.memory_space<vmem>>, vector<1x8x32xf32>
    %418 = vector.shape_cast %417 : vector<1x8x32xf32> to vector<8x32xf32>
    %cst_259 = arith.constant dense<0.000000e+00> : vector<16x8xf32>
    %419 = tpu.matmul %303, %418, %cst_259 {dimension_numbers = #tpu.dot_dimension_numbers<[1], [1], [0], [0], [0, 0, 1, 0], [], []>} : vector<16x32xf32>, vector<8x32xf32>, vector<16x8xf32> -> vector<16x8xf32>
    %c6_260 = arith.constant 6 : index
    %c0_261 = arith.constant 0 : index
    %c0_262 = arith.constant 0 : index
    %420 = vector.load %arg7[%c6_260, %c0_261, %c0_262] : memref<8x1x8xf32, #tpu.memory_space<vmem>>, vector<1x1x8xf32>
    %421 = vector.shape_cast %420 : vector<1x1x8xf32> to vector<1x8xf32>
    %422 = vector.broadcast %421 : vector<1x8xf32> to vector<16x8xf32>
    %423 = arith.addf %419, %422 : vector<16x8xf32>
    %424 = vector.shape_cast %409 : vector<16x8xf32> to vector<2x8x8xf32>
    %425 = vector.shape_cast %416 : vector<16x8xf32> to vector<2x8x8xf32>
    %426 = vector.shape_cast %423 : vector<16x8xf32> to vector<2x8x8xf32>
    %cst_263 = arith.constant dense<0.000000e+00> : vector<2x8x8xf32>
    %427 = tpu.matmul %424, %425, %cst_263 {dimension_numbers = #tpu.dot_dimension_numbers<[2], [2], [1], [1], [0, 0, 0, 1, 1, 1], [0], [0]>} : vector<2x8x8xf32>, vector<2x8x8xf32>, vector<2x8x8xf32> -> vector<2x8x8xf32>
    %cst_264 = arith.constant 0.353553385 : f32
    %428 = vector.broadcast %cst_264 : f32 to vector<2x8x8xf32>
    %429 = arith.mulf %427, %428 : vector<2x8x8xf32>
    %cst_265 = arith.constant 5.000000e-01 : f32
    %430 = vector.broadcast %cst_265 : f32 to vector<2x1x8xf32>
    %431 = arith.cmpf ogt, %25, %430 : vector<2x1x8xf32>
    %cst_266 = arith.constant -1.000000e+30 : f32
    %432 = vector.shape_cast %431 : vector<2x1x8xi1> to vector<2x1x8xi1>
    %433 = vector.broadcast %432 : vector<2x1x8xi1> to vector<2x8x8xi1>
    %434 = vector.broadcast %cst_266 : f32 to vector<2x8x8xf32>
    %435 = arith.select %433, %429, %434 : vector<2x8x8xi1>, vector<2x8x8xf32>
    %cst_267 = arith.constant dense<0xFF800000> : vector<2x8xf32>
    %436 = vector.multi_reduction <maximumf>, %435, %cst_267 [2] : vector<2x8x8xf32> to vector<2x8xf32>
    %437 = vector.shape_cast %436 : vector<2x8xf32> to vector<2x8x1xf32>
    %438 = vector.broadcast %437 : vector<2x8x1xf32> to vector<2x8x8xf32>
    %439 = arith.subf %435, %438 : vector<2x8x8xf32>
    %440 = math.exp %439 : vector<2x8x8xf32>
    %cst_268 = arith.constant dense<0.000000e+00> : vector<2x8xf32>
    %441 = vector.multi_reduction <add>, %440, %cst_268 [2] : vector<2x8x8xf32> to vector<2x8xf32>
    %442 = vector.shape_cast %441 : vector<2x8xf32> to vector<2x8x1xf32>
    %443 = tpu.reciprocal %442 {approx = true} : vector<2x8x1xf32> -> vector<2x8x1xf32>
    %444 = vector.broadcast %443 : vector<2x8x1xf32> to vector<2x8x8xf32>
    %445 = arith.mulf %440, %444 : vector<2x8x8xf32>
    %cst_269 = arith.constant dense<0.000000e+00> : vector<2x8x8xf32>
    %446 = tpu.matmul %445, %426, %cst_269 {dimension_numbers = #tpu.dot_dimension_numbers<[2], [1], [1], [2], [0, 0, 0, 1, 1, 2], [0], [0]>} : vector<2x8x8xf32>, vector<2x8x8xf32>, vector<2x8x8xf32> -> vector<2x8x8xf32>
    %447 = vector.shape_cast %446 : vector<2x8x8xf32> to vector<16x8xf32>
    %c6_270 = arith.constant 6 : index
    %c0_271 = arith.constant 0 : index
    %c0_272 = arith.constant 0 : index
    %448 = vector.load %arg8[%c6_270, %c0_271, %c0_272] : memref<8x8x32xf32, #tpu.memory_space<vmem>>, vector<1x8x32xf32>
    %449 = vector.shape_cast %448 : vector<1x8x32xf32> to vector<8x32xf32>
    %cst_273 = arith.constant dense<0.000000e+00> : vector<16x32xf32>
    %450 = tpu.matmul %447, %449, %cst_273 {dimension_numbers = #tpu.dot_dimension_numbers<[1], [0], [0], [1], [0, 0, 1, 1], [], []>} : vector<16x8xf32>, vector<8x32xf32>, vector<16x32xf32> -> vector<16x32xf32>
    %451 = arith.addf %402, %450 : vector<16x32xf32>
    %c7 = arith.constant 7 : index
    %c0_274 = arith.constant 0 : index
    %c0_275 = arith.constant 0 : index
    %452 = vector.load %arg2[%c7, %c0_274, %c0_275] : memref<8x8x32xf32, #tpu.memory_space<vmem>>, vector<1x8x32xf32>
    %453 = vector.shape_cast %452 : vector<1x8x32xf32> to vector<8x32xf32>
    %cst_276 = arith.constant dense<0.000000e+00> : vector<16x8xf32>
    %454 = tpu.matmul %303, %453, %cst_276 {dimension_numbers = #tpu.dot_dimension_numbers<[1], [1], [0], [0], [0, 0, 1, 0], [], []>} : vector<16x32xf32>, vector<8x32xf32>, vector<16x8xf32> -> vector<16x8xf32>
    %c7_277 = arith.constant 7 : index
    %c0_278 = arith.constant 0 : index
    %c0_279 = arith.constant 0 : index
    %455 = vector.load %arg3[%c7_277, %c0_278, %c0_279] : memref<8x1x8xf32, #tpu.memory_space<vmem>>, vector<1x1x8xf32>
    %456 = vector.shape_cast %455 : vector<1x1x8xf32> to vector<1x8xf32>
    %457 = vector.broadcast %456 : vector<1x8xf32> to vector<16x8xf32>
    %458 = arith.addf %454, %457 : vector<16x8xf32>
    %c7_280 = arith.constant 7 : index
    %c0_281 = arith.constant 0 : index
    %c0_282 = arith.constant 0 : index
    %459 = vector.load %arg4[%c7_280, %c0_281, %c0_282] : memref<8x8x32xf32, #tpu.memory_space<vmem>>, vector<1x8x32xf32>
    %460 = vector.shape_cast %459 : vector<1x8x32xf32> to vector<8x32xf32>
    %cst_283 = arith.constant dense<0.000000e+00> : vector<16x8xf32>
    %461 = tpu.matmul %303, %460, %cst_283 {dimension_numbers = #tpu.dot_dimension_numbers<[1], [1], [0], [0], [0, 0, 1, 0], [], []>} : vector<16x32xf32>, vector<8x32xf32>, vector<16x8xf32> -> vector<16x8xf32>
    %c7_284 = arith.constant 7 : index
    %c0_285 = arith.constant 0 : index
    %c0_286 = arith.constant 0 : index
    %462 = vector.load %arg5[%c7_284, %c0_285, %c0_286] : memref<8x1x8xf32, #tpu.memory_space<vmem>>, vector<1x1x8xf32>
    %463 = vector.shape_cast %462 : vector<1x1x8xf32> to vector<1x8xf32>
    %464 = vector.broadcast %463 : vector<1x8xf32> to vector<16x8xf32>
    %465 = arith.addf %461, %464 : vector<16x8xf32>
    %c7_287 = arith.constant 7 : index
    %c0_288 = arith.constant 0 : index
    %c0_289 = arith.constant 0 : index
    %466 = vector.load %arg6[%c7_287, %c0_288, %c0_289] : memref<8x8x32xf32, #tpu.memory_space<vmem>>, vector<1x8x32xf32>
    %467 = vector.shape_cast %466 : vector<1x8x32xf32> to vector<8x32xf32>
    %cst_290 = arith.constant dense<0.000000e+00> : vector<16x8xf32>
    %468 = tpu.matmul %303, %467, %cst_290 {dimension_numbers = #tpu.dot_dimension_numbers<[1], [1], [0], [0], [0, 0, 1, 0], [], []>} : vector<16x32xf32>, vector<8x32xf32>, vector<16x8xf32> -> vector<16x8xf32>
    %c7_291 = arith.constant 7 : index
    %c0_292 = arith.constant 0 : index
    %c0_293 = arith.constant 0 : index
    %469 = vector.load %arg7[%c7_291, %c0_292, %c0_293] : memref<8x1x8xf32, #tpu.memory_space<vmem>>, vector<1x1x8xf32>
    %470 = vector.shape_cast %469 : vector<1x1x8xf32> to vector<1x8xf32>
    %471 = vector.broadcast %470 : vector<1x8xf32> to vector<16x8xf32>
    %472 = arith.addf %468, %471 : vector<16x8xf32>
    %473 = vector.shape_cast %458 : vector<16x8xf32> to vector<2x8x8xf32>
    %474 = vector.shape_cast %465 : vector<16x8xf32> to vector<2x8x8xf32>
    %475 = vector.shape_cast %472 : vector<16x8xf32> to vector<2x8x8xf32>
    %cst_294 = arith.constant dense<0.000000e+00> : vector<2x8x8xf32>
    %476 = tpu.matmul %473, %474, %cst_294 {dimension_numbers = #tpu.dot_dimension_numbers<[2], [2], [1], [1], [0, 0, 0, 1, 1, 1], [0], [0]>} : vector<2x8x8xf32>, vector<2x8x8xf32>, vector<2x8x8xf32> -> vector<2x8x8xf32>
    %cst_295 = arith.constant 0.353553385 : f32
    %477 = vector.broadcast %cst_295 : f32 to vector<2x8x8xf32>
    %478 = arith.mulf %476, %477 : vector<2x8x8xf32>
    %cst_296 = arith.constant 5.000000e-01 : f32
    %479 = vector.broadcast %cst_296 : f32 to vector<2x1x8xf32>
    %480 = arith.cmpf ogt, %25, %479 : vector<2x1x8xf32>
    %cst_297 = arith.constant -1.000000e+30 : f32
    %481 = vector.shape_cast %480 : vector<2x1x8xi1> to vector<2x1x8xi1>
    %482 = vector.broadcast %481 : vector<2x1x8xi1> to vector<2x8x8xi1>
    %483 = vector.broadcast %cst_297 : f32 to vector<2x8x8xf32>
    %484 = arith.select %482, %478, %483 : vector<2x8x8xi1>, vector<2x8x8xf32>
    %cst_298 = arith.constant dense<0xFF800000> : vector<2x8xf32>
    %485 = vector.multi_reduction <maximumf>, %484, %cst_298 [2] : vector<2x8x8xf32> to vector<2x8xf32>
    %486 = vector.shape_cast %485 : vector<2x8xf32> to vector<2x8x1xf32>
    %487 = vector.broadcast %486 : vector<2x8x1xf32> to vector<2x8x8xf32>
    %488 = arith.subf %484, %487 : vector<2x8x8xf32>
    %489 = math.exp %488 : vector<2x8x8xf32>
    %cst_299 = arith.constant dense<0.000000e+00> : vector<2x8xf32>
    %490 = vector.multi_reduction <add>, %489, %cst_299 [2] : vector<2x8x8xf32> to vector<2x8xf32>
    %491 = vector.shape_cast %490 : vector<2x8xf32> to vector<2x8x1xf32>
    %492 = tpu.reciprocal %491 {approx = true} : vector<2x8x1xf32> -> vector<2x8x1xf32>
    %493 = vector.broadcast %492 : vector<2x8x1xf32> to vector<2x8x8xf32>
    %494 = arith.mulf %489, %493 : vector<2x8x8xf32>
    %cst_300 = arith.constant dense<0.000000e+00> : vector<2x8x8xf32>
    %495 = tpu.matmul %494, %475, %cst_300 {dimension_numbers = #tpu.dot_dimension_numbers<[2], [1], [1], [2], [0, 0, 0, 1, 1, 2], [0], [0]>} : vector<2x8x8xf32>, vector<2x8x8xf32>, vector<2x8x8xf32> -> vector<2x8x8xf32>
    %496 = vector.shape_cast %495 : vector<2x8x8xf32> to vector<16x8xf32>
    %c7_301 = arith.constant 7 : index
    %c0_302 = arith.constant 0 : index
    %c0_303 = arith.constant 0 : index
    %497 = vector.load %arg8[%c7_301, %c0_302, %c0_303] : memref<8x8x32xf32, #tpu.memory_space<vmem>>, vector<1x8x32xf32>
    %498 = vector.shape_cast %497 : vector<1x8x32xf32> to vector<8x32xf32>
    %cst_304 = arith.constant dense<0.000000e+00> : vector<16x32xf32>
    %499 = tpu.matmul %496, %498, %cst_304 {dimension_numbers = #tpu.dot_dimension_numbers<[1], [0], [0], [1], [0, 0, 1, 1], [], []>} : vector<16x8xf32>, vector<8x32xf32>, vector<16x32xf32> -> vector<16x32xf32>
    %500 = arith.addf %451, %499 : vector<16x32xf32>
    %501 = arith.addf %303, %500 : vector<16x32xf32>
    %c1_305 = arith.constant 1 : index
    %c0_306 = arith.constant 0 : index
    %c0_307 = arith.constant 0 : index
    %502 = vector.load %arg9[%c1_305, %c0_306, %c0_307] : memref<2x1x32xf32, #tpu.memory_space<vmem>>, vector<1x1x32xf32>
    %503 = vector.shape_cast %502 : vector<1x1x32xf32> to vector<1x32xf32>
    %504 = vector.broadcast %503 : vector<1x32xf32> to vector<16x32xf32>
    %505 = arith.addf %501, %504 : vector<16x32xf32>
    %c1_308 = arith.constant 1 : index
    %c0_309 = arith.constant 0 : index
    %c0_310 = arith.constant 0 : index
    %506 = vector.load %arg10[%c1_308, %c0_309, %c0_310] : memref<2x1x32xf32, #tpu.memory_space<vmem>>, vector<1x1x32xf32>
    %507 = vector.shape_cast %506 : vector<1x1x32xf32> to vector<1x32xf32>
    %c1_311 = arith.constant 1 : index
    %c0_312 = arith.constant 0 : index
    %c0_313 = arith.constant 0 : index
    %508 = vector.load %arg11[%c1_311, %c0_312, %c0_313] : memref<2x1x32xf32, #tpu.memory_space<vmem>>, vector<1x1x32xf32>
    %509 = vector.shape_cast %508 : vector<1x1x32xf32> to vector<1x32xf32>
    %cst_314 = arith.constant dense<0.000000e+00> : vector<16xf32>
    %510 = vector.multi_reduction <add>, %505, %cst_314 [1] : vector<16x32xf32> to vector<16xf32>
    %511 = vector.shape_cast %510 : vector<16xf32> to vector<16x1xf32>
    %cst_315 = arith.constant 3.200000e+01 : f32
    %512 = vector.broadcast %cst_315 : f32 to vector<16x1xf32>
    %513 = arith.divf %511, %512 : vector<16x1xf32>
    %514 = vector.broadcast %513 : vector<16x1xf32> to vector<16x32xf32>
    %515 = arith.subf %505, %514 : vector<16x32xf32>
    %516 = arith.mulf %515, %515 : vector<16x32xf32>
    %cst_316 = arith.constant dense<0.000000e+00> : vector<16xf32>
    %517 = vector.multi_reduction <add>, %516, %cst_316 [1] : vector<16x32xf32> to vector<16xf32>
    %518 = vector.shape_cast %517 : vector<16xf32> to vector<16x1xf32>
    %cst_317 = arith.constant 3.200000e+01 : f32
    %519 = vector.broadcast %cst_317 : f32 to vector<16x1xf32>
    %520 = arith.divf %518, %519 : vector<16x1xf32>
    %521 = vector.broadcast %513 : vector<16x1xf32> to vector<16x32xf32>
    %522 = arith.subf %505, %521 : vector<16x32xf32>
    %cst_318 = arith.constant 9.99999996E-13 : f32
    %523 = vector.broadcast %cst_318 : f32 to vector<16x1xf32>
    %524 = arith.addf %520, %523 : vector<16x1xf32>
    %525 = math.rsqrt %524 : vector<16x1xf32>
    %526 = vector.broadcast %525 : vector<16x1xf32> to vector<16x32xf32>
    %527 = arith.mulf %522, %526 : vector<16x32xf32>
    %528 = vector.broadcast %507 : vector<1x32xf32> to vector<16x32xf32>
    %529 = arith.mulf %527, %528 : vector<16x32xf32>
    %530 = vector.broadcast %509 : vector<1x32xf32> to vector<16x32xf32>
    %531 = arith.addf %529, %530 : vector<16x32xf32>
    %c1_319 = arith.constant 1 : index
    %c0_320 = arith.constant 0 : index
    %c0_321 = arith.constant 0 : index
    %532 = vector.load %arg12[%c1_319, %c0_320, %c0_321] : memref<2x32x64xf32, #tpu.memory_space<vmem>>, vector<1x32x64xf32>
    %533 = vector.shape_cast %532 : vector<1x32x64xf32> to vector<32x64xf32>
    %cst_322 = arith.constant dense<0.000000e+00> : vector<16x64xf32>
    %534 = tpu.matmul %531, %533, %cst_322 {dimension_numbers = #tpu.dot_dimension_numbers<[1], [0], [0], [1], [0, 0, 1, 1], [], []>} : vector<16x32xf32>, vector<32x64xf32>, vector<16x64xf32> -> vector<16x64xf32>
    %c1_323 = arith.constant 1 : index
    %c0_324 = arith.constant 0 : index
    %c0_325 = arith.constant 0 : index
    %535 = vector.load %arg13[%c1_323, %c0_324, %c0_325] : memref<2x1x64xf32, #tpu.memory_space<vmem>>, vector<1x1x64xf32>
    %536 = vector.shape_cast %535 : vector<1x1x64xf32> to vector<1x64xf32>
    %537 = vector.broadcast %536 : vector<1x64xf32> to vector<16x64xf32>
    %538 = arith.addf %534, %537 : vector<16x64xf32>
    %cst_326 = arith.constant 5.000000e-01 : f32
    %539 = vector.broadcast %cst_326 : f32 to vector<16x64xf32>
    %540 = arith.mulf %539, %538 : vector<16x64xf32>
    %cst_327 = arith.constant 2.000000e+00 : f32
    %541 = math.sqrt %cst_327 : f32
    %542 = vector.broadcast %541 : f32 to vector<16x64xf32>
    %543 = arith.divf %538, %542 : vector<16x64xf32>
    %544 = math.erf %543 : vector<16x64xf32>
    %cst_328 = arith.constant 1.000000e+00 : f32
    %545 = vector.broadcast %cst_328 : f32 to vector<16x64xf32>
    %546 = arith.addf %545, %544 : vector<16x64xf32>
    %547 = arith.mulf %540, %546 : vector<16x64xf32>
    %c1_329 = arith.constant 1 : index
    %c0_330 = arith.constant 0 : index
    %c0_331 = arith.constant 0 : index
    %548 = vector.load %arg14[%c1_329, %c0_330, %c0_331] : memref<2x64x32xf32, #tpu.memory_space<vmem>>, vector<1x64x32xf32>
    %549 = vector.shape_cast %548 : vector<1x64x32xf32> to vector<64x32xf32>
    %cst_332 = arith.constant dense<0.000000e+00> : vector<16x32xf32>
    %550 = tpu.matmul %547, %549, %cst_332 {dimension_numbers = #tpu.dot_dimension_numbers<[1], [0], [0], [1], [0, 0, 1, 1], [], []>} : vector<16x64xf32>, vector<64x32xf32>, vector<16x32xf32> -> vector<16x32xf32>
    %c1_333 = arith.constant 1 : index
    %c0_334 = arith.constant 0 : index
    %c0_335 = arith.constant 0 : index
    %551 = vector.load %arg15[%c1_333, %c0_334, %c0_335] : memref<2x1x32xf32, #tpu.memory_space<vmem>>, vector<1x1x32xf32>
    %552 = vector.shape_cast %551 : vector<1x1x32xf32> to vector<1x32xf32>
    %553 = vector.broadcast %552 : vector<1x32xf32> to vector<16x32xf32>
    %554 = arith.addf %550, %553 : vector<16x32xf32>
    %555 = arith.addf %531, %554 : vector<16x32xf32>
    %c1_336 = arith.constant 1 : index
    %c0_337 = arith.constant 0 : index
    %c0_338 = arith.constant 0 : index
    %556 = vector.load %arg16[%c1_336, %c0_337, %c0_338] : memref<2x1x32xf32, #tpu.memory_space<vmem>>, vector<1x1x32xf32>
    %557 = vector.shape_cast %556 : vector<1x1x32xf32> to vector<1x32xf32>
    %c1_339 = arith.constant 1 : index
    %c0_340 = arith.constant 0 : index
    %c0_341 = arith.constant 0 : index
    %558 = vector.load %arg17[%c1_339, %c0_340, %c0_341] : memref<2x1x32xf32, #tpu.memory_space<vmem>>, vector<1x1x32xf32>
    %559 = vector.shape_cast %558 : vector<1x1x32xf32> to vector<1x32xf32>
    %cst_342 = arith.constant dense<0.000000e+00> : vector<16xf32>
    %560 = vector.multi_reduction <add>, %555, %cst_342 [1] : vector<16x32xf32> to vector<16xf32>
    %561 = vector.shape_cast %560 : vector<16xf32> to vector<16x1xf32>
    %cst_343 = arith.constant 3.200000e+01 : f32
    %562 = vector.broadcast %cst_343 : f32 to vector<16x1xf32>
    %563 = arith.divf %561, %562 : vector<16x1xf32>
    %564 = vector.broadcast %563 : vector<16x1xf32> to vector<16x32xf32>
    %565 = arith.subf %555, %564 : vector<16x32xf32>
    %566 = arith.mulf %565, %565 : vector<16x32xf32>
    %cst_344 = arith.constant dense<0.000000e+00> : vector<16xf32>
    %567 = vector.multi_reduction <add>, %566, %cst_344 [1] : vector<16x32xf32> to vector<16xf32>
    %568 = vector.shape_cast %567 : vector<16xf32> to vector<16x1xf32>
    %cst_345 = arith.constant 3.200000e+01 : f32
    %569 = vector.broadcast %cst_345 : f32 to vector<16x1xf32>
    %570 = arith.divf %568, %569 : vector<16x1xf32>
    %571 = vector.broadcast %563 : vector<16x1xf32> to vector<16x32xf32>
    %572 = arith.subf %555, %571 : vector<16x32xf32>
    %cst_346 = arith.constant 9.99999996E-13 : f32
    %573 = vector.broadcast %cst_346 : f32 to vector<16x1xf32>
    %574 = arith.addf %570, %573 : vector<16x1xf32>
    %575 = math.rsqrt %574 : vector<16x1xf32>
    %576 = vector.broadcast %575 : vector<16x1xf32> to vector<16x32xf32>
    %577 = arith.mulf %572, %576 : vector<16x32xf32>
    %578 = vector.broadcast %557 : vector<1x32xf32> to vector<16x32xf32>
    %579 = arith.mulf %577, %578 : vector<16x32xf32>
    %580 = vector.broadcast %559 : vector<1x32xf32> to vector<16x32xf32>
    %581 = arith.addf %579, %580 : vector<16x32xf32>
    %c0_347 = arith.constant 0 : index
    %c0_348 = arith.constant 0 : index
    %582 = vector.load %arg20[%c0_347, %c0_348] : memref<32x128xf32, #tpu.memory_space<vmem>>, vector<32x128xf32>
    %cst_349 = arith.constant dense<0.000000e+00> : vector<16x128xf32>
    %583 = tpu.matmul %581, %582, %cst_349 {dimension_numbers = #tpu.dot_dimension_numbers<[1], [0], [0], [1], [0, 0, 1, 1], [], []>} : vector<16x32xf32>, vector<32x128xf32>, vector<16x128xf32> -> vector<16x128xf32>
    %c0_350 = arith.constant 0 : index
    %c0_351 = arith.constant 0 : index
    %584 = vector.load %arg21[%c0_350, %c0_351] : memref<1x128xf32, #tpu.memory_space<vmem>>, vector<1x128xf32>
    %585 = vector.broadcast %584 : vector<1x128xf32> to vector<16x128xf32>
    %586 = arith.addf %583, %585 : vector<16x128xf32>
    %c0_352 = arith.constant 0 : index
    %c0_353 = arith.constant 0 : index
    %587 = vector.load %arg22[%c0_352, %c0_353] : memref<16x128xf32, #tpu.memory_space<vmem>>, vector<16x128xf32>
    tpu.vector_store %arg22[%c0_352, %c0_353], %586 {strides = array<i32>} : memref<16x128xf32, #tpu.memory_space<vmem>>, vector<16x128xf32>,
    return
  }
}

</mosaic_0001>

<bundles_post_ra>
// kernel: tpu_custom_call.1
= control target key start
LH: loop header
LB: loop body
LE: loop exit
PB: predicated region body
PF: predicated region fallthrough
CT: control target
= control target key end

     0   :  { %s4295_s0 = inlined_call_operand.hbm [shape: f32[16,32], index: 0, kind: input, shape index: {}]   ;;  %s4296_s1 = inlined_call_operand.hbm [shape: f32[2,1,8], index: 1, kind: input, shape index: {}]   ;;  %s4297_s2 = inlined_call_operand.vmem [shape: f32[8,8,32], index: 2, kind: input, shape index: {}]   ;;  %s4298_s3 = inlined_call_operand.hbm [shape: f32[8,1,8], index: 3, kind: input, shape index: {}]   ;;  %s4299_s4 = inlined_call_operand.vmem [shape: f32[8,8,32], index: 4, kind: input, shape index: {}]   ;;  %s4300_s5 = inlined_call_operand.hbm [shape: f32[8,1,8], index: 5, kind: input, shape index: {}]   ;;  %s4301_s6 = inlined_call_operand.vmem [shape: f32[8,8,32], index: 6, kind: input, shape index: {}]   ;;  %s4302_s7 = inlined_call_operand.hbm [shape: f32[8,1,8], index: 7, kind: input, shape index: {}]   ;;  %s4303_s8 = inlined_call_operand.hbm [shape: f32[8,8,32], index: 8, kind: input, shape index: {}]   ;;  %s4304_s9 = inlined_call_operand.vmem [shape: f32[2,1,32], index: 9, kind: input, shape index: {}]   ;;  %s4305_s10 = inlined_call_operand.vmem [shape: f32[2,1,32], index: 10, kind: input, shape index: {}]   ;;  %s4306_s11 = inlined_call_operand.vmem [shape: f32[2,1,32], index: 11, kind: input, shape index: {}]   ;;  %s4307_s12 = inlined_call_operand.hbm [shape: f32[2,32,64], index: 12, kind: input, shape index: {}]   ;;  %s4308_s13 = inlined_call_operand.vmem [shape: f32[2,1,64], index: 13, kind: input, shape index: {}]   ;;  %s4309_s14 = inlined_call_operand.vmem [shape: f32[2,64,32], index: 14, kind: input, shape index: {}]   ;;  %s4310_s15 = inlined_call_operand.vmem [shape: f32[2,1,32], index: 15, kind: input, shape index: {}]   ;;  %s4311_s16 = inlined_call_operand.vmem [shape: f32[2,1,32], index: 16, kind: input, shape index: {}]   ;;  %s4312_s17 = inlined_call_operand.vmem [shape: f32[2,1,32], index: 17, kind: input, shape index: {}]   ;;  %s4313_s18 = inlined_call_operand.vmem [shape: f32[1,32], index: 18, kind: input, shape index: {}]   ;;  %s4314_s19 = inlined_call_operand.vmem [shape: f32[1,32], index: 19, kind: input, shape index: {}]   ;;  %s4315_s20 = inlined_call_operand.hbm [shape: f32[32,128], index: 20, kind: input, shape index: {}]   ;;  %s4316_s21 = inlined_call_operand.vmem [shape: f32[1,128], index: 21, kind: input, shape index: {}]   ;;  %s4317_s22 = inlined_call_operand.hbm [shape: f32[16,128], index: 22, kind: output, shape index: {}]  }
   0x1   :  { %4323 = sst [smem:[#allocation23_spill]] %s4295_s0 }
   0x2   :  { %4324 = sst [smem:[#allocation24_spill]] %s4296_s1 }
   0x3   :  { %4325 = sst [smem:[#allocation25_spill]] %s4297_s2 }
   0x4   :  { %4326 = sst [smem:[#allocation26_spill]] %s4298_s3 }
   0x5   :  { %4327 = sst [smem:[#allocation27_spill]] %s4299_s4 }
   0x6   :  { %4328 = sst [smem:[#allocation28_spill]] %s4300_s5 }
   0x7   :  { %4329 = sst [smem:[#allocation29_spill]] %s4301_s6 }
   0x8   :  { %4330 = sst [smem:[#allocation30_spill]] %s4317_s22 }
   0x9   :  { %27 = vsyncpa [#allocation3], 0 }
   0xa   :  { %28 = vsyncpa [#allocation6], 0 }
   0xb   :  { %29 = vsyncpa [#allocation9], 0 }
   0xc   :  { %30 = vsyncpa [#allocation12], 0 }
   0xd   :  { %31 = vsyncpa [#allocation15], 0  ;;  %s4331_s29 = sld [smem:[#allocation24_spill]] }
  0x13   :  { %s50_s30 = sshll.u32 %s4331_s29, 4  ;;  %s51_s30 = int_to_ptr.hbm [resolvable:$true] %s50_s30 }
  0x14   :  { %32 = vsyncpa [#allocation4], 0  ;;  %s3542_s4 = smov [#allocation5]   ;;  %s4332_s5 = sld [smem:[#allocation28_spill]] }
  0x15   :  { %s52_s0 = sshll.u32 %s3542_s4, 4  ;;  %s4321_s6 = smov 16   ;;  %s53_s0 = int_to_ptr.vmem [resolvable:$true] %s52_s0 }
  0x16   :  { %s3544_s25 = smov 1   ;;  %s3545_s26 = smov [#allocation8]  }
  0x17   :  { %58 = dma.hbm_to_vmem [thread:$0]  %s51_s30, 32, %s53_s0, [#allocation6], %s4321_s6, %s4321_s6, %s3544_s25  }
  0x18   :  { %s82_s2 = sshll.u32 %s3545_s26, 4  ;;  %s108_s28 = sshll.u32 %s4303_s8, 4  ;;  %s83_s2 = int_to_ptr.vmem [resolvable:$true] %s82_s2  ;;  %s109_s28 = int_to_ptr.hbm [resolvable:$true] %s108_s28 }
  0x19   :  { %s3546_s29 = smov [#allocation11]   ;;  %s3547_s0 = smov 128  }
  0x1a   :  { %s80_s24 = sshll.u32 %s4332_s5, 4  ;;  %s110_s4 = sshll.u32 %s3546_s29, 4  ;;  %s81_s24 = int_to_ptr.hbm [resolvable:$true] %s80_s24  ;;  %s111_s4 = int_to_ptr.vmem [resolvable:$true] %s110_s4 }
  0x1b   :  { %88 = dma.hbm_to_vmem [thread:$0]  %s81_s24, 128, %s83_s2, [#allocation9], %s4321_s6, %s4321_s6, %s3544_s25  }
  0x1c   :  { %s4333_s5 = sld [smem:[#allocation23_spill]]  ;;  %s3548_s22 = smov 8  }
  0x1d   :  { %116 = dma.hbm_to_vmem [thread:$0]  %s109_s28, 1024, %s111_s4, [#allocation12], %s3547_s0, %s3547_s0, %s3548_s22  }
  0x1e   :  { %s3549_s24 = smov [#allocation2]   ;;  %s4334_s8 = sld [smem:[#allocation26_spill]] }
  0x1f   :  { %s39_s26 = sshll.u32 %s3549_s24, 4  ;;  %s95_s1 = sshll.u32 %s4302_s7, 4  ;;  %s40_s26 = int_to_ptr.vmem [resolvable:$true] %s39_s26  ;;  %s96_s1 = int_to_ptr.hbm [resolvable:$true] %s95_s1 }
  0x20   :  { %s4335_s28 = smov 16   ;;  %s3551_s4 = smov [#allocation10]  }
  0x21   :  { %s97_s24 = sshll.u32 %s3551_s4, 4  ;;  %s3552_s29 = smov [#allocation13]   ;;  %s98_s24 = int_to_ptr.vmem [resolvable:$true] %s97_s24 }
  0x22   :  { %s37_s30 = sshll.u32 %s4333_s5, 4  ;;  %s3550_s5 = smov [#allocation7]   ;;  %s38_s30 = int_to_ptr.hbm [resolvable:$true] %s37_s30 }
  0x23   :  { %45 = dma.hbm_to_vmem [thread:$0]  %s38_s30, 256, %s40_s26, [#allocation3], %s3547_s0, %s3547_s0, %s3548_s22  }
  0x24   :  { %s65_s3 = sshll.u32 %s4334_s8, 4  ;;  %s67_s6 = sshll.u32 %s3550_s5, 4  ;;  %s66_s3 = int_to_ptr.hbm [resolvable:$true] %s65_s3  ;;  %s68_s6 = int_to_ptr.vmem [resolvable:$true] %s67_s6 }
  0x25   :  { %73 = dma.hbm_to_vmem [thread:$0]  %s66_s3, 128, %s68_s6, [#allocation6], %s4335_s28, %s4335_s28, %s3544_s25  }
  0x26   :  { %s127_s8 = sshll.u32 %s4307_s12, 4  ;;  %s154_s26 = sshll.u32 %s4315_s20, 4  ;;  %s128_s8 = int_to_ptr.hbm [resolvable:$true] %s127_s8  ;;  %s155_s26 = int_to_ptr.hbm [resolvable:$true] %s154_s26 }
  0x27   :  { %103 = dma.hbm_to_vmem [thread:$0]  %s96_s1, 128, %s98_s24, [#allocation9], %s4335_s28, %s4335_s28, %s3544_s25  }
  0x28   :  { %s129_s23 = sshll.u32 %s3552_s29, 4  ;;  %s3553_s6 = smov [#allocation14]   ;;  %s130_s23 = int_to_ptr.vmem [resolvable:$true] %s129_s23 }
  0x29   :  { %135 = dma.hbm_to_vmem [thread:$0]  %s128_s8, 1024, %s130_s23, [#allocation12], %s3547_s0, %s3547_s0, %s3548_s22  }
  0x2a   :  { %s156_s12 = sshll.u32 %s3553_s6, 4  ;;  %s157_s12 = int_to_ptr.vmem [resolvable:$true] %s156_s12 }
  0x2b   :  { %162 = dma.hbm_to_vmem [thread:$0]  %s155_s26, 512, %s157_s12, [#allocation15], %s3547_s0, %s3547_s0, %s3548_s22  }
  0x2c   :  { %3530 = dma.done.wait [#allocation3], 256  }
  0x2d   :  { %3531 = vsyncadd [#allocation3], 4294967040 }
  0x2e   :  { %3532 = dma.done.wait [#allocation6], 160  }
  0x2f   :  { %3533 = vsyncadd [#allocation6], 4294967136 }
  0x30   :  { %3534 = dma.done.wait [#allocation9], 256  }
  0x31   :  { %3535 = vsyncadd [#allocation9], 4294967040 }
  0x32   :  { %3536 = dma.done.wait [#allocation12], 2048  }
  0x33   :  { %3537 = vsyncadd [#allocation12], 4294965248 }
  0x34   :  { %3538 = dma.done.wait [#allocation15], 512  }
  0x35   :  { %3539 = vsyncadd [#allocation15], 4294966784  ;;  %vm201_vm0 = vcmask 261120   ;;  %v197_v0 = vld [vmem:[#allocation2] sm:$0xff]  ;;  %v198_v1 = vld [vmem:[#allocation2 + $0x8] sm:$0xff]  ;;  %v3554_v4 = vmov 32.0  }
  0x36   :  { %v202_v2 = vsel %vm201_vm0, %v197_v0, 0.0  ;;  %v205_v3 = vsel %vm201_vm0, %v198_v1, 0.0  ;;  %3218 = vrcp.f32 %v3554_v4  ;;  %s4336_s3 = sld [smem:[#allocation25_spill]]  ;;  %v3177_v39 = vld [vmem:[%s4313_s18] ss:$0 sm:$0xff]  ;;  %vm364_vm8 = vcmask 64512  }
  0x37   :  { %203 = vadd.xlane.f32.xlu0 %v202_v2  ;;  %s4337_s28 = sld [smem:[#allocation27_spill]]  ;;  %v3178_v42 = vld [vmem:[%s4314_s19] ss:$0 sm:$0xff]  ;;  %v3180_v53 = vld [vmem:[#allocation8] ss:$0 sm:$0xff]  ;;  %s3557_s23 = smov [#allocation16]  }
  0x38   :  { %s4338_s2 = sld [smem:[#allocation29_spill]]  ;;  %v3179_v54 = vld [vmem:[#allocation7] ss:$0 sm:$0xff]  ;;  %v3181_v59 = vld [vmem:[#allocation10] ss:$0 sm:$0xff]  ;;  %s2955_s6 = sshll.u32 %s3557_s23, 4  ;;  %s2956_s6 = int_to_ptr.vmem [resolvable:$true] %s2955_s6 }
  0x39   :  { %s4343_s12 = sld [smem:[#allocation30_spill]] }
  0x3c   :  { %v3219_v5 = vpop.eup %3218  ;;  %v265_v21 = vld [vmem:[%s4336_s3] sm:$0xff]  ;;  %v2989_v27 = vld [vmem:[%s4336_s3 + $0x8] sm:$0xff] }
  0x3d   :  { %v209_v6 = vmul.f32 32.0, %v3219_v5  ;;  %vm213_vm1 = vweird.f32 %v3219_v5  ;;  %v302_v22 = vld [vmem:[%s4337_s28] sm:$0xff]  ;;  %2974 = vmatpush.xpose.msk.msra.mxu0 %vm201_vm0, %v265_v21  ;;  %v2993_v2 = vld [vmem:[%s4337_s28 + $0x8] sm:$0xff] }
  0x3e   :  { %v333_v23 = vld [vmem:[%s4338_s2] sm:$0xff]  ;;  %2977 = vmatpush.xpose.msk.msra.mxu1 %vm201_vm0, %v302_v22  ;;  %3160 = vmatpush.xpose.msk.msra.mxu3 %vm201_vm0, %v302_v22 }
  0x3f   :  { %206 = vadd.xlane.f32.xlu0 %v205_v3  ;;  %v210_v7 = vsub.f32 1.0, %v209_v6  ;;  %2980 = vmatpush.xpose.msk.msra.mxu2 %vm201_vm0, %v333_v23  ;;  %v3555_v6 = vmov 0   ;;  %v3183_v23 = vld [vmem:[#allocation8 + $0x1] ss:$0 sm:$0xff]  ;;  %s2957_s20 = sshll.u32 %s4343_s12, 4  ;;  %s2958_s20 = int_to_ptr.hbm [resolvable:$true] %s2957_s20 }
  0x41   :  { %v211_v8 = vmul.f32 %v3219_v5, %v210_v7 }
  0x43   :  { %v212_v9 = vadd.f32 %v3219_v5, %v211_v8  ;;  %2990 = vmatpush.xpose.msk.msrb.mxu2 %vm201_vm0, %v2989_v27 }
  0x45   :  { %v3723_v10 = vsel %vm213_vm1, %v3219_v5, %v212_v9  ;;  %v263_v5 = vld [vmem:[#allocation5] sm:$0x1] }
  0x46   :  { %vm419_vm9 = vcmp.gt.f32.partialorder %v263_v5, 0.5 }
  0x47   :  { %v421_v7 = vsel %vm419_vm9, 1, %v3555_v6 }
  0x48   :  { %v423_v8 = vperm.slane %v421_v7, 0 }
  0x4a   :  { %vm3786_vm10 = vcmp.eq.s32.totalorder %v423_v8, 1 }
  0xaa   :  { %v204_v11 = vpop.xlane.xlu0 %203 }
  0xab   :  { %v215_v12 = vmul.f32 %v3723_v10, %v204_v11 }
  0xad   :  { %v217_v13 = vsub.f32 %v197_v0, %v215_v12 }
  0xaf   :  { %v219_v14 = vmul.f32 %v217_v13, %v217_v13 }
  0xb1   :  { %v221_v15 = vsel %vm201_vm0, %v219_v14, 0.0 }
  0xb2   :  { %222 = vadd.xlane.f32.xlu1 %v221_v15  ;;  %v207_v16 = vpop.xlane.xlu0 %206 }
  0xb3   :  { %v216_v17 = vmul.f32 %v3723_v10, %v207_v16 }
  0xb5   :  { %v218_v18 = vsub.f32 %v198_v1, %v216_v17 }
  0xb7   :  { %v220_v19 = vmul.f32 %v218_v18, %v218_v18 }
  0xb9   :  { %v224_v20 = vsel %vm201_vm0, %v220_v19, 0.0 }
  0xba   :  { %225 = vadd.xlane.f32.xlu1 %v224_v20 }
 0x125   :  { %v223_v24 = vpop.xlane.xlu1 %222 }
 0x126   :  { %v227_v25 = vmul.f32 %v223_v24, %v3723_v10 }
 0x128   :  { %v229_v26 = vadd.f32 1e-12, %v227_v25 }
 0x12a   :  { %3220 = vrsqrt.f32 %v229_v26  ;;  %vm237_vm3 = vweird.f32 %v229_v26 }
 0x12d   :  { %v226_v28 = vpop.xlane.xlu1 %225 }
 0x12e   :  { %v228_v29 = vmul.f32 %v226_v28, %v3723_v10 }
 0x130   :  { %v3221_v30 = vpop.eup %3220  ;;  %v230_v31 = vadd.f32 1e-12, %v228_v29 }
 0x131   :  { %v232_v32 = vmul.f32 %v3221_v30, %v229_v26  ;;  %vm238_vm2 = vweird.f32 %v3221_v30 }
 0x132   :  { %3222 = vrsqrt.f32 %v230_v31  ;;  %vm239_vm4 = vmor %vm237_vm3, %vm238_vm2  ;;  %vm247_vm6 = vweird.f32 %v230_v31 }
 0x133   :  { %v233_v33 = vmul.f32 %v3221_v30, %v232_v32 }
 0x135   :  { %v234_v34 = vmul.f32 0.5, %v233_v33 }
 0x137   :  { %v235_v35 = vsub.f32 1.5, %v234_v34 }
 0x138   :  { %v3223_v36 = vpop.eup %3222 }
 0x139   :  { %v236_v37 = vmul.f32 %v3221_v30, %v235_v35  ;;  %v242_v38 = vmul.f32 %v3223_v36, %v230_v31  ;;  %vm248_vm5 = vweird.f32 %v3223_v36 }
 0x13a   :  { %vm249_vm7 = vmor %vm247_vm6, %vm248_vm5 }
 0x13b   :  { %v240_v40 = vsel %vm239_vm4, %v3221_v30, %v236_v37  ;;  %v243_v41 = vmul.f32 %v3223_v36, %v242_v38 }
 0x13c   :  { %v251_v43 = vmul.f32 %v240_v40, %v217_v13  ;;  %v264_v13 = vld [vmem:[#allocation5 + $0x1] sm:$0x1] }
 0x13d   :  { %v244_v44 = vmul.f32 0.5, %v243_v41  ;;  %vm420_vm11 = vcmp.gt.f32.partialorder %v264_v13, 0.5 }
 0x13e   :  { %v256_v45 = vmul.f32 %v3177_v39, %v251_v43  ;;  %v422_v16 = vsel %vm420_vm11, 1, %v3555_v6 }
 0x13f   :  { %v245_v46 = vsub.f32 1.5, %v244_v44  ;;  %v424_v17 = vperm.slane %v422_v16, 0  ;;  %v3011_v16 = vld [vmem:[%s4336_s3 + $0x10] sm:$0xff] }
 0x140   :  { %v3754_v47 = vadd.f32 %v3178_v42, %v256_v45 }
 0x141   :  { %v246_v48 = vmul.f32 %v3223_v36, %v245_v46  ;;  %vm3793_vm12 = vcmp.eq.s32.totalorder %v424_v17, 1  ;;  %v3182_v46 = vld [vmem:[#allocation7 + $0x1] ss:$0 sm:$0xff] }
 0x142   :  { %2975 = vmatmul.msk.f32.vlgmr.msra.gmra.mxu0 %vm201_vm0, %v3754_v47  ;;  %2978 = vmatmul.msk.f32.vlgmr.msra.gmra.mxu1 %vm201_vm0, %v3754_v47  ;;  %v3015_v17 = vld [vmem:[%s4337_s28 + $0x10] sm:$0xff] }
 0x143   :  { %v250_v49 = vsel %vm249_vm7, %v3223_v36, %v246_v48  ;;  %2981 = vmatmul.msk.f32.vlgmr.msra.gmra.mxu2 %vm201_vm0, %v3754_v47  ;;  %v2997_v36 = vld [vmem:[%s4338_s2 + $0x8] sm:$0xff] }
 0x144   :  { %v252_v50 = vmul.f32 %v250_v49, %v218_v18 }
 0x146   :  { %v257_v51 = vmul.f32 %v3177_v39, %v252_v50 }
 0x148   :  { %v3762_v52 = vadd.f32 %v3178_v42, %v257_v51  ;;  %v497_v51 = vld [vmem:[#allocation11] sm:$0xff] }
 0x14a   :  { %2976 = vmatmul.msk.f32.gmra.mxu0 %vm201_vm0, %v3762_v52  ;;  %2979 = vmatmul.msk.f32.vlgmr.msra.gmra.mxu3 %vm201_vm0, %v3762_v52 }
 0x14b   :  { %2982 = vmatmul.msk.f32.gmra.mxu2 %vm201_vm0, %v3762_v52 }
 0x153   :  { %2991 = vmatmul.msk.f32.vlgmr.msrb.gmra.mxu2 %vm201_vm0, %v3754_v47 }
 0x15b   :  { %2992 = vmatmul.msk.f32.gmra.mxu2 %vm201_vm0, %v3762_v52 }
 0x1bf   :  { %v327_v55 = vpop.f32.mrf.mxu1  ;;  %v296_v56 = vpop.f32.mrf.mxu0 }
 0x1c0   :  { %v328_v57 = vadd.f32 %v3180_v53, %v327_v55  ;;  %v297_v58 = vadd.f32 %v3179_v54, %v296_v56 }
 0x1c2   :  { %2983 = vmatpush.xpose.msk.msrb.mxu3 %vm364_vm8, %v328_v57 }
 0x1c5   :  { %2984 = vmatmul.msk.f32.vlgmr.msrb.gmra.mxu3 %vm364_vm8, %v297_v58 }
 0x1c6   :  { %v358_v60 = vpop.f32.mrf.mxu2 }
 0x1c7   :  { %v359_v61 = vadd.f32 %v3181_v59, %v358_v60  ;;  %v299_v63 = vpop.f32.mrf.mxu0 }
 0x1c8   :  { %v300_v4 = vadd.f32 %v3179_v54, %v299_v63  ;;  %v3184_v54 = vld [vmem:[#allocation10 + $0x1] ss:$0 sm:$0xff] }
 0x1c9   :  { %469 = vmatpush.msrb.mxu0 %v359_v61 }
 0x1cb   :  { %2998 = vmatpush.xpose.msk.msra.mxu0 %vm201_vm0, %v2997_v36 }
 0x1cd   :  { %v330_v62 = vpop.f32.mrf.mxu3 }
 0x1ce   :  { %v331_v0 = vadd.f32 %v3180_v53, %v330_v62  ;;  %v361_v1 = vpop.f32.mrf.mxu2 }
 0x1cf   :  { %v362_v3 = vadd.f32 %v3181_v59, %v361_v1 }
 0x1d0   :  { %2985 = vmatpush.xpose.msk.msra.mxu3 %vm364_vm8, %v331_v0 }
 0x1d1   :  { %492 = vmatpush.msrb.mxu1 %v362_v3 }
 0x1d3   :  { %2986 = vmatmul.msk.f32.vlgmr.msra.gmra.mxu3 %vm364_vm8, %v300_v4 }
 0x1d4   :  { %2994 = vmatpush.xpose.msk.msrb.mxu3 %vm201_vm0, %v2993_v2 }
 0x1d6   :  { %v525_v45 = vpop.f32.mrf.mxu2 }
 0x1d7   :  { %v526_v48 = vadd.f32 %v3182_v46, %v525_v45 }
 0x1db   :  { %2995 = vmatmul.msk.f32.vlgmr.msrb.gmra.mxu3 %vm201_vm0, %v3754_v47 }
 0x1de   :  { %v528_v49 = vpop.f32.mrf.mxu2 }
 0x1df   :  { %v529_v50 = vadd.f32 %v3182_v46, %v528_v49  ;;  %v3187_v46 = vld [vmem:[#allocation10 + $0x2] ss:$0 sm:$0xff] }
 0x1e3   :  { %2996 = vmatmul.msk.f32.gmra.mxu3 %vm201_vm0, %v3762_v52 }
 0x248   :  { %v388_v9 = vpop.f32.mrf.mxu3 }
 0x249   :  { %v417_v12 = vmul.f32 0.35355338, %v388_v9 }
 0x24b   :  { %v427_v14 = vsel %vm3786_vm10, %v417_v12, -1e+30 }
 0x24c   :  { %v429_v15 = vsel %vm364_vm8, %v427_v14, -inf }
 0x24d   :  { %430 = vmax.xlane.f32.xlu0 %v429_v15 }
 0x256   :  { %v414_v18 = vpop.f32.mrf.mxu3 }
 0x257   :  { %v418_v20 = vmul.f32 0.35355338, %v414_v18 }
 0x259   :  { %v428_v21 = vsel %vm3793_vm12, %v418_v20, -1e+30 }
 0x25a   :  { %v432_v22 = vsel %vm364_vm8, %v428_v21, -inf }
 0x25b   :  { %433 = vmax.xlane.f32.xlu2 %v432_v22 }
 0x25e   :  { %v558_v24 = vpop.f32.mrf.mxu3 }
 0x25f   :  { %v559_v25 = vadd.f32 %v3183_v23, %v558_v24 }
 0x261   :  { %3001 = vmatpush.xpose.msk.msra.mxu1 %vm364_vm8, %v559_v25  ;;  %v722_v25 = vld [vmem:[#allocation11 + $0x8] sm:$0xff] }
 0x266   :  { %v561_v41 = vpop.f32.mrf.mxu3 }
 0x267   :  { %v562_v44 = vadd.f32 %v3183_v23, %v561_v41 }
 0x2c0   :  { %v431_v26 = vpop.xlane.xlu0 %430 }
 0x2c1   :  { %v435_v27 = vsub.f32 %v427_v14, %v431_v26  ;;  %v3019_v26 = vld [vmem:[%s4338_s2 + $0x10] sm:$0xff] }
 0x2c3   :  { %v437_v28 = vmul.f32 1.442695, %v435_v27  ;;  %v3035_v27 = vld [vmem:[%s4337_s28 + $0x18] sm:$0xff] }
 0x2c5   :  { %3224 = vpow2.f32 %v437_v28 }
 0x2cb   :  { %v3225_v29 = vpop.eup %3224 }
 0x2cc   :  { %v441_v30 = vsel %vm364_vm8, %v3225_v29, 0.0 }
 0x2cd   :  { %442 = vadd.xlane.f32.xlu1 %v441_v30  ;;  %v3186_v30 = vld [vmem:[#allocation8 + $0x2] ss:$0 sm:$0xff] }
 0x2ce   :  { %v434_v31 = vpop.xlane.xlu2 %433 }
 0x2cf   :  { %v436_v32 = vsub.f32 %v428_v21, %v434_v31 }
 0x2d1   :  { %v439_v33 = vmul.f32 1.442695, %v436_v32  ;;  %v3185_v32 = vld [vmem:[#allocation7 + $0x2] ss:$0 sm:$0xff] }
 0x2d3   :  { %3226 = vpow2.f32 %v439_v33 }
 0x2d9   :  { %v3227_v34 = vpop.eup %3226 }
 0x2da   :  { %v444_v35 = vsel %vm364_vm8, %v3227_v34, 0.0 }
 0x2db   :  { %445 = vadd.xlane.f32.xlu2 %v444_v35 }
 0x340   :  { %v443_v37 = vpop.xlane.xlu1 %442 }
 0x341   :  { %3228 = vrcp.f32 %v443_v37 }
 0x347   :  { %v3229_v38 = vpop.eup %3228 }
 0x348   :  { %v449_v39 = vmul.f32 %v3229_v38, %v3225_v29 }
 0x34a   :  { %2987 = vmatmul.msk.f32.vlgmr.msrb.gmra.mxu0 %vm364_vm8, %v449_v39 }
 0x34b   :  { %744 = vmatpush.msrb.mxu0 %v722_v25 }
 0x34e   :  { %v446_v40 = vpop.xlane.xlu2 %445 }
 0x34f   :  { %3230 = vrcp.f32 %v446_v40 }
 0x352   :  { %2999 = vmatmul.msk.f32.vlgmr.msra.gmra.mxu0 %vm201_vm0, %v3754_v47 }
 0x353   :  { %3020 = vmatpush.xpose.msk.msra.mxu0 %vm201_vm0, %v3019_v26  ;;  %v3189_v26 = vld [vmem:[#allocation7 + $0x3] ss:$0 sm:$0xff] }
 0x355   :  { %v3231_v42 = vpop.eup %3230 }
 0x356   :  { %v450_v43 = vmul.f32 %v3231_v42, %v3227_v34  ;;  %v1005_v42 = vld [vmem:[#allocation11 + $0x10] sm:$0xff] }
 0x358   :  { %2988 = vmatmul.msk.f32.vlgmr.msrb.gmra.mxu1 %vm364_vm8, %v450_v43 }
 0x359   :  { %3003 = vmatpush.xpose.msk.msrb.mxu1 %vm364_vm8, %v562_v44 }
 0x35a   :  { %3000 = vmatmul.msk.f32.gmra.mxu0 %vm201_vm0, %v3762_v52 }
 0x360   :  { %3002 = vmatmul.msk.f32.vlgmr.msra.gmra.mxu1 %vm364_vm8, %v526_v48 }
 0x361   :  { %773 = vmatpush.msra.mxu1 %v497_v51 }
 0x368   :  { %3004 = vmatmul.msk.f32.vlgmr.msrb.gmra.mxu1 %vm364_vm8, %v529_v50 }
 0x3c7   :  { %v471_v53 = vpop.f32.mrf.mxu0 }
 0x3c8   :  { %3009 = vmatmul.msk.f32.vlgmr.msra.gmra.mxu1 %vm364_vm8, %v471_v53 }
 0x3cf   :  { %v591_v55 = vpop.f32.mrf.mxu0 }
 0x3d0   :  { %v592_v56 = vadd.f32 %v3184_v54, %v591_v55 }
 0x3d2   :  { %693 = vmatpush.msra.mxu2 %v592_v56 }
 0x3d4   :  { %3012 = vmatpush.xpose.msk.msrb.mxu2 %vm201_vm0, %v3011_v16 }
 0x3d5   :  { %v494_v57 = vpop.f32.mrf.mxu1 }
 0x3d6   :  { %3010 = vmatmul.msk.f32.gmra.mxu1 %vm364_vm8, %v494_v57  ;;  %v3188_v57 = vld [vmem:[#allocation8 + $0x3] ss:$0 sm:$0xff] }
 0x3d7   :  { %v594_v58 = vpop.f32.mrf.mxu0 }
 0x3d8   :  { %v595_v59 = vadd.f32 %v3184_v54, %v594_v58 }
 0x3da   :  { %716 = vmatpush.msra.mxu3 %v595_v59 }
 0x3dc   :  { %3016 = vmatpush.xpose.msk.msrb.mxu3 %vm201_vm0, %v3015_v17 }
 0x3dd   :  { %v620_v60 = vpop.f32.mrf.mxu1 }
 0x3de   :  { %v649_v61 = vmul.f32 0.35355338, %v620_v60 }
 0x3e0   :  { %v651_v62 = vsel %vm3786_vm10, %v649_v61, -1e+30 }
 0x3e1   :  { %v653_v63 = vsel %vm364_vm8, %v651_v62, -inf }
 0x3e2   :  { %654 = vmax.xlane.f32.xlu0 %v653_v63 }
 0x3e5   :  { %v646_v0 = vpop.f32.mrf.mxu1 }
 0x3e6   :  { %v650_v1 = vmul.f32 0.35355338, %v646_v0 }
 0x3e8   :  { %v652_v2 = vsel %vm3793_vm12, %v650_v1, -1e+30 }
 0x3e9   :  { %v656_v3 = vsel %vm364_vm8, %v652_v2, -inf }
 0x3ea   :  { %657 = vmax.xlane.f32.xlu2 %v656_v3 }
 0x445   :  { %v3866_v40 = vpop.f32.mrf.mxu1 }
 0x453   :  { %v778_v43 = vpop.f32.mrf.mxu1 }
 0x455   :  { %v655_v4 = vpop.xlane.xlu0 %654 }
 0x456   :  { %v659_v5 = vsub.f32 %v651_v62, %v655_v4 }
 0x458   :  { %v661_v6 = vmul.f32 1.442695, %v659_v5 }
 0x45a   :  { %3232 = vpow2.f32 %v661_v6 }
 0x45d   :  { %v658_v7 = vpop.xlane.xlu2 %657 }
 0x45e   :  { %v660_v8 = vsub.f32 %v652_v2, %v658_v7 }
 0x460   :  { %v3233_v9 = vpop.eup %3232  ;;  %v663_v12 = vmul.f32 1.442695, %v660_v8 }
 0x461   :  { %v665_v13 = vsel %vm364_vm8, %v3233_v9, 0.0 }
 0x462   :  { %3234 = vpow2.f32 %v663_v12  ;;  %666 = vadd.xlane.f32.xlu2 %v665_v13  ;;  %v3031_v12 = vld [vmem:[%s4336_s3 + $0x18] sm:$0xff] }
 0x463   :  { %v3039_v13 = vld [vmem:[%s4338_s2 + $0x18] sm:$0xff] }
 0x468   :  { %v3235_v14 = vpop.eup %3234 }
 0x469   :  { %v668_v15 = vsel %vm364_vm8, %v3235_v14, 0.0 }
 0x46a   :  { %669 = vadd.xlane.f32.xlu1 %v668_v15 }
 0x4d5   :  { %v667_v18 = vpop.xlane.xlu2 %666 }
 0x4d6   :  { %3236 = vrcp.f32 %v667_v18 }
 0x4dc   :  { %v3237_v20 = vpop.eup %3236 }
 0x4dd   :  { %v673_v21 = vmul.f32 %v3237_v20, %v3233_v9  ;;  %v670_v22 = vpop.xlane.xlu1 %669 }
 0x4de   :  { %3238 = vrcp.f32 %v670_v22 }
 0x4df   :  { %3005 = vmatmul.msk.f32.vlgmr.msra.gmra.mxu2 %vm364_vm8, %v673_v21 }
 0x4e4   :  { %v3239_v23 = vpop.eup %3238 }
 0x4e5   :  { %v674_v24 = vmul.f32 %v3239_v23, %v3235_v14 }
 0x4e7   :  { %3006 = vmatmul.msk.f32.vlgmr.msra.gmra.mxu3 %vm364_vm8, %v674_v24  ;;  %3013 = vmatmul.msk.f32.vlgmr.msrb.gmra.mxu2 %vm201_vm0, %v3754_v47 }
 0x4ef   :  { %3014 = vmatmul.msk.f32.gmra.mxu2 %vm201_vm0, %v3762_v52  ;;  %3017 = vmatmul.msk.f32.vlgmr.msrb.gmra.mxu3 %vm201_vm0, %v3754_v47 }
 0x4f7   :  { %3018 = vmatmul.msk.f32.gmra.mxu3 %vm201_vm0, %v3762_v52 }
 0x562   :  { %v695_v28 = vpop.f32.mrf.mxu2 }
 0x563   :  { %3007 = vmatmul.msk.f32.vlgmr.msrb.gmra.mxu0 %vm364_vm8, %v695_v28 }
 0x564   :  { %3036 = vmatpush.xpose.msk.msrb.mxu0 %vm201_vm0, %v3035_v27  ;;  %v3190_v27 = vld [vmem:[#allocation10 + $0x3] ss:$0 sm:$0xff] }
 0x56a   :  { %v718_v29 = vpop.f32.mrf.mxu3  ;;  %v808_v31 = vpop.f32.mrf.mxu2 }
 0x56b   :  { %3008 = vmatmul.msk.f32.gmra.mxu0 %vm364_vm8, %v718_v29  ;;  %v809_v35 = vadd.f32 %v3185_v32, %v808_v31 }
 0x572   :  { %v841_v33 = vpop.f32.mrf.mxu3  ;;  %v811_v37 = vpop.f32.mrf.mxu2 }
 0x573   :  { %v842_v34 = vadd.f32 %v3186_v30, %v841_v33  ;;  %3021 = vmatmul.msk.f32.vlgmr.msra.gmra.mxu0 %vm201_vm0, %v3754_v47  ;;  %v812_v39 = vadd.f32 %v3185_v32, %v811_v37 }
 0x575   :  { %3023 = vmatpush.xpose.msk.msrb.mxu1 %vm364_vm8, %v842_v34 }
 0x578   :  { %3024 = vmatmul.msk.f32.vlgmr.msrb.gmra.mxu1 %vm364_vm8, %v809_v35 }
 0x57a   :  { %v844_v36 = vpop.f32.mrf.mxu3 }
 0x57b   :  { %v845_v38 = vadd.f32 %v3186_v30, %v844_v36  ;;  %3022 = vmatmul.msk.f32.gmra.mxu0 %vm201_vm0, %v3762_v52 }
 0x57d   :  { %3025 = vmatpush.xpose.msk.msra.mxu2 %vm364_vm8, %v845_v38 }
 0x580   :  { %3026 = vmatmul.msk.f32.vlgmr.msra.gmra.mxu2 %vm364_vm8, %v812_v39 }
 0x581   :  { %1027 = vmatpush.msrb.mxu2 %v1005_v42 }
 0x583   :  { %3037 = vmatmul.msk.f32.vlgmr.msrb.gmra.mxu0 %vm201_vm0, %v3754_v47 }
 0x58b   :  { %3038 = vmatmul.msk.f32.gmra.mxu0 %vm201_vm0, %v3762_v52 }
 0x5e0   :  { %v3868_v41 = vpop.f32.mrf.mxu0 }
 0x5e1   :  { %v776_v35 = vadd.f32 %v3866_v40, %v3868_v41 }
 0x5e8   :  { %v749_v44 = vpop.f32.mrf.mxu0 }
 0x5e9   :  { %v3870_v45 = vadd.f32 %v778_v43, %v749_v44 }
 0x5f0   :  { %v874_v48 = vpop.f32.mrf.mxu0 }
 0x5f1   :  { %v875_v49 = vadd.f32 %v3187_v46, %v874_v48 }
 0x5f3   :  { %976 = vmatpush.msra.mxu3 %v875_v49 }
 0x5f5   :  { %v903_v50 = vpop.f32.mrf.mxu1  ;;  %3032 = vmatpush.xpose.msk.msrb.mxu3 %vm201_vm0, %v3031_v12 }
 0x5f6   :  { %v932_v51 = vmul.f32 0.35355338, %v903_v50 }
 0x5f8   :  { %v877_v53 = vpop.f32.mrf.mxu0  ;;  %v934_v54 = vsel %vm3786_vm10, %v932_v51, -1e+30 }
 0x5f9   :  { %v878_v55 = vadd.f32 %v3187_v46, %v877_v53  ;;  %v936_v56 = vsel %vm364_vm8, %v934_v54, -inf }
 0x5fa   :  { %937 = vmax.xlane.f32.xlu0 %v936_v56 }
 0x5fb   :  { %999 = vmatpush.msra.mxu1 %v878_v55 }
 0x5fd   :  { %3040 = vmatpush.xpose.msk.msrb.mxu1 %vm201_vm0, %v3039_v13 }
 0x600   :  { %v1097_v58 = vpop.f32.mrf.mxu0 }
 0x601   :  { %v1098_v59 = vadd.f32 %v3188_v57, %v1097_v58 }
 0x603   :  { %v929_v60 = vpop.f32.mrf.mxu2  ;;  %3043 = vmatpush.xpose.msk.msra.mxu2 %vm364_vm8, %v1098_v59 }
 0x604   :  { %v933_v61 = vmul.f32 0.35355338, %v929_v60 }
 0x606   :  { %v935_v62 = vsel %vm3793_vm12, %v933_v61, -1e+30 }
 0x607   :  { %v939_v63 = vsel %vm364_vm8, %v935_v62, -inf }
 0x608   :  { %940 = vmax.xlane.f32.xlu1 %v939_v63  ;;  %v1100_v15 = vpop.f32.mrf.mxu0 }
 0x609   :  { %v1101_v18 = vadd.f32 %v3188_v57, %v1100_v15 }
 0x66d   :  { %v938_v0 = vpop.xlane.xlu0 %937 }
 0x66e   :  { %v942_v1 = vsub.f32 %v934_v54, %v938_v0 }
 0x670   :  { %v944_v2 = vmul.f32 1.442695, %v942_v1 }
 0x672   :  { %3240 = vpow2.f32 %v944_v2  ;;  %v1261_v2 = vld [vmem:[#allocation11 + $0x18] sm:$0xff] }
 0x678   :  { %v3241_v3 = vpop.eup %3240 }
 0x679   :  { %v948_v4 = vsel %vm364_vm8, %v3241_v3, 0.0 }
 0x67a   :  { %949 = vadd.xlane.f32.xlu2 %v948_v4 }
 0x67b   :  { %v941_v5 = vpop.xlane.xlu1 %940 }
 0x67c   :  { %v943_v6 = vsub.f32 %v935_v62, %v941_v5 }
 0x67e   :  { %v946_v7 = vmul.f32 1.442695, %v943_v6 }
 0x680   :  { %3242 = vpow2.f32 %v946_v7  ;;  %v3191_v7 = vld [vmem:[%s4304_s9] ss:$0 sm:$0xff] }
 0x686   :  { %v3243_v8 = vpop.eup %3242 }
 0x687   :  { %v951_v9 = vsel %vm364_vm8, %v3243_v8, 0.0 }
 0x688   :  { %952 = vadd.xlane.f32.xlu0 %v951_v9 }
 0x6ed   :  { %v950_v14 = vpop.xlane.xlu2 %949 }
 0x6ee   :  { %3244 = vrcp.f32 %v950_v14 }
 0x6f4   :  { %v3245_v16 = vpop.eup %3244 }
 0x6f5   :  { %v956_v17 = vmul.f32 %v3245_v16, %v3241_v3 }
 0x6f7   :  { %3027 = vmatmul.msk.f32.vlgmr.msra.gmra.mxu3 %vm364_vm8, %v956_v17 }
 0x6f8   :  { %3045 = vmatpush.xpose.msk.msra.mxu3 %vm364_vm8, %v1101_v18 }
 0x6fb   :  { %v953_v20 = vpop.xlane.xlu0 %952 }
 0x6fc   :  { %3246 = vrcp.f32 %v953_v20 }
 0x6ff   :  { %3033 = vmatmul.msk.f32.vlgmr.msrb.gmra.mxu3 %vm201_vm0, %v3754_v47 }
 0x702   :  { %v3247_v21 = vpop.eup %3246 }
 0x703   :  { %v957_v22 = vmul.f32 %v3247_v21, %v3243_v8 }
 0x705   :  { %3028 = vmatmul.msk.f32.vlgmr.msra.gmra.mxu1 %vm364_vm8, %v957_v22 }
 0x707   :  { %3034 = vmatmul.msk.f32.gmra.mxu3 %vm201_vm0, %v3762_v52 }
 0x70d   :  { %3041 = vmatmul.msk.f32.vlgmr.msrb.gmra.mxu1 %vm201_vm0, %v3754_v47 }
 0x715   :  { %3042 = vmatmul.msk.f32.gmra.mxu1 %vm201_vm0, %v3762_v52 }
 0x77a   :  { %v978_v23 = vpop.f32.mrf.mxu3 }
 0x77b   :  { %3029 = vmatmul.msk.f32.vlgmr.msrb.gmra.mxu2 %vm364_vm8, %v978_v23 }
 0x77c   :  { %1283 = vmatpush.msrb.mxu2 %v1261_v2 }
 0x782   :  { %v1001_v24 = vpop.f32.mrf.mxu1  ;;  %v1064_v25 = vpop.f32.mrf.mxu3 }
 0x783   :  { %3030 = vmatmul.msk.f32.gmra.mxu2 %vm364_vm8, %v1001_v24  ;;  %v1065_v28 = vadd.f32 %v3189_v26, %v1064_v25 }
 0x78a   :  { %v1067_v29 = vpop.f32.mrf.mxu3  ;;  %v1130_v30 = vpop.f32.mrf.mxu1 }
 0x78b   :  { %v1068_v31 = vadd.f32 %v3189_v26, %v1067_v29  ;;  %v1131_v32 = vadd.f32 %v3190_v27, %v1130_v30  ;;  %3044 = vmatmul.msk.f32.vlgmr.msra.gmra.mxu2 %vm364_vm8, %v1065_v28  ;;  %v1359_v28 = vld [vmem:[#allocation13 + $0x10] sm:$0xff]  ;;  %v1358_v29 = vld [vmem:[#allocation13 + $0x8] sm:$0xff]  ;;  %v1357_v30 = vld [vmem:[#allocation13] sm:$0xff] }
 0x78d   :  { %3046 = vmatmul.msk.f32.vlgmr.msra.gmra.mxu3 %vm364_vm8, %v1068_v31  ;;  %1232 = vmatpush.msra.mxu0 %v1131_v32 }
 0x792   :  { %v1133_v33 = vpop.f32.mrf.mxu1 }
 0x793   :  { %v1134_v34 = vadd.f32 %v3190_v27, %v1133_v33 }
 0x795   :  { %1255 = vmatpush.msra.mxu1 %v1134_v34 }
 0x7fe   :  { %v1029_v36 = vpop.f32.mrf.mxu2 }
 0x7ff   :  { %v1035_v37 = vadd.f32 %v1029_v36, %v776_v35 }
 0x806   :  { %v1032_v38 = vpop.f32.mrf.mxu2 }
 0x807   :  { %v1036_v39 = vadd.f32 %v1032_v38, %v3870_v45 }
 0x80e   :  { %v1159_v42 = vpop.f32.mrf.mxu2 }
 0x80f   :  { %v1188_v43 = vmul.f32 0.35355338, %v1159_v42 }
 0x810   :  { %v1185_v44 = vpop.f32.mrf.mxu3 }
 0x811   :  { %v1189_v46 = vmul.f32 0.35355338, %v1185_v44  ;;  %v1190_v48 = vsel %vm3786_vm10, %v1188_v43, -1e+30 }
 0x812   :  { %v1192_v49 = vsel %vm364_vm8, %v1190_v48, -inf }
 0x813   :  { %1193 = vmax.xlane.f32.xlu1 %v1192_v49  ;;  %v1191_v50 = vsel %vm3793_vm12, %v1189_v46, -1e+30  ;;  %v3192_v49 = vld [vmem:[%s4305_s10] ss:$0 sm:$0xff] }
 0x814   :  { %v1195_v40 = vsel %vm364_vm8, %v1191_v50, -inf }
 0x815   :  { %1196 = vmax.xlane.f32.xlu2 %v1195_v40 }
 0x886   :  { %v1194_v41 = vpop.xlane.xlu1 %1193 }
 0x887   :  { %v1198_v51 = vsub.f32 %v1190_v48, %v1194_v41 }
 0x888   :  { %v1197_v53 = vpop.xlane.xlu2 %1196 }
 0x889   :  { %v1200_v45 = vmul.f32 1.442695, %v1198_v51  ;;  %v1199_v54 = vsub.f32 %v1191_v50, %v1197_v53  ;;  %v3193_v51 = vld [vmem:[%s4306_s11] ss:$0 sm:$0xff] }
 0x88b   :  { %3248 = vpow2.f32 %v1200_v45  ;;  %v1202_v55 = vmul.f32 1.442695, %v1199_v54 }
 0x88d   :  { %3250 = vpow2.f32 %v1202_v55 }
 0x891   :  { %v3249_v56 = vpop.eup %3248 }
 0x892   :  { %v1204_v57 = vsel %vm364_vm8, %v3249_v56, 0.0 }
 0x893   :  { %v3251_v58 = vpop.eup %3250  ;;  %1205 = vadd.xlane.f32.xlu0 %v1204_v57 }
 0x894   :  { %v1207_v59 = vsel %vm364_vm8, %v3251_v58, 0.0 }
 0x895   :  { %1208 = vadd.xlane.f32.xlu1 %v1207_v59 }
 0x906   :  { %v1206_v60 = vpop.xlane.xlu0 %1205 }
 0x907   :  { %3252 = vrcp.f32 %v1206_v60 }
 0x908   :  { %v1209_v61 = vpop.xlane.xlu1 %1208 }
 0x909   :  { %3254 = vrcp.f32 %v1209_v61  ;;  %v3556_v61 = vmov 1.4142135  }
 0x90d   :  { %v3253_v62 = vpop.eup %3252 }
 0x90e   :  { %v1212_v63 = vmul.f32 %v3253_v62, %v3249_v56 }
 0x90f   :  { %v3255_v0 = vpop.eup %3254 }
 0x910   :  { %v1213_v1 = vmul.f32 %v3255_v0, %v3251_v58  ;;  %3047 = vmatmul.msk.f32.vlgmr.msra.gmra.mxu0 %vm364_vm8, %v1212_v63 }
 0x912   :  { %3048 = vmatmul.msk.f32.vlgmr.msra.gmra.mxu1 %vm364_vm8, %v1213_v1 }
 0x98d   :  { %v1234_v3 = vpop.f32.mrf.mxu0 }
 0x98e   :  { %3049 = vmatmul.msk.f32.vlgmr.msrb.gmra.mxu2 %vm364_vm8, %v1234_v3  ;;  %v3194_v3 = vld [vmem:[%s4308_s13] ss:$0 sm:$0xff] }
 0x98f   :  { %v1257_v4 = vpop.f32.mrf.mxu1 }
 0x996   :  { %3050 = vmatmul.msk.f32.gmra.mxu2 %vm364_vm8, %v1257_v4 }
 0xa11   :  { %v1285_v5 = vpop.f32.mrf.mxu2 }
 0xa12   :  { %v1291_v6 = vadd.f32 %v1285_v5, %v1035_v37 }
 0xa14   :  { %v1293_v8 = vadd.f32 %v1291_v6, %v3754_v47 }
 0xa16   :  { %v1299_v9 = vadd.f32 %v3191_v7, %v1293_v8 }
 0xa18   :  { %v1303_v12 = vsel %vm201_vm0, %v1299_v9, 0.0 }
 0xa19   :  { %1304 = vadd.xlane.f32.xlu2 %v1303_v12  ;;  %v1288_v13 = vpop.f32.mrf.mxu2 }
 0xa1a   :  { %v1292_v14 = vadd.f32 %v1288_v13, %v1036_v39  ;;  %v1496_v13 = vld [vmem:[%s4309_s14 + $0x38] sm:$0xff] }
 0xa1b   :  { %1516 = vmatpush.msrb.mxu0 %v1496_v13 }
 0xa1c   :  { %v1294_v15 = vadd.f32 %v1292_v14, %v3762_v52  ;;  %v1360_v52 = vld [vmem:[#allocation13 + $0x18] sm:$0xff] }
 0xa1d   :  { %1383 = vmatpush.msrb.mxu3 %v1360_v52 }
 0xa1e   :  { %v1300_v16 = vadd.f32 %v3191_v7, %v1294_v15 }
 0xa1f   :  { %1384 = vmatpush.msrb.mxu3 %v1359_v28  ;;  %v1492_v28 = vld [vmem:[%s4309_s14 + $0x18] sm:$0xff] }
 0xa20   :  { %v1306_v17 = vsel %vm201_vm0, %v1300_v16, 0.0 }
 0xa21   :  { %1307 = vadd.xlane.f32.xlu0 %v1306_v17  ;;  %1385 = vmatpush.msrb.mxu3 %v1358_v29  ;;  %v1495_v17 = vld [vmem:[%s4309_s14 + $0x30] sm:$0xff] }
 0xa22   :  { %1517 = vmatpush.msrb.mxu0 %v1495_v17 }
 0xa23   :  { %1386 = vmatpush.msrb.mxu3 %v1357_v30 }
 0xa8c   :  { %v1305_v18 = vpop.xlane.xlu2 %1304 }
 0xa8d   :  { %v1309_v20 = vmul.f32 %v1305_v18, %v3723_v10 }
 0xa8f   :  { %v1311_v21 = vsub.f32 %v1299_v9, %v1309_v20 }
 0xa91   :  { %v1313_v22 = vmul.f32 %v1311_v21, %v1311_v21 }
 0xa93   :  { %v1315_v23 = vsel %vm201_vm0, %v1313_v22, 0.0  ;;  %v1494_v22 = vld [vmem:[%s4309_s14 + $0x28] sm:$0xff] }
 0xa94   :  { %1316 = vadd.xlane.f32.xlu1 %v1315_v23  ;;  %v1308_v47 = vpop.xlane.xlu0 %1307  ;;  %1518 = vmatpush.msrb.mxu0 %v1494_v22 }
 0xa95   :  { %v1310_v24 = vmul.f32 %v1308_v47, %v3723_v10 }
 0xa97   :  { %v1312_v25 = vsub.f32 %v1300_v16, %v1310_v24 }
 0xa99   :  { %v1314_v26 = vmul.f32 %v1312_v25, %v1312_v25 }
 0xa9b   :  { %v1318_v27 = vsel %vm201_vm0, %v1314_v26, 0.0 }
 0xa9c   :  { %1319 = vadd.xlane.f32.xlu2 %v1318_v27 }
 0xb07   :  { %v1317_v31 = vpop.xlane.xlu1 %1316 }
 0xb08   :  { %v1321_v32 = vmul.f32 %v1317_v31, %v3723_v10 }
 0xb0a   :  { %v1323_v33 = vadd.f32 1e-12, %v1321_v32  ;;  %v1491_v32 = vld [vmem:[%s4309_s14 + $0x10] sm:$0xff] }
 0xb0c   :  { %3256 = vrsqrt.f32 %v1323_v33  ;;  %vm1331_vm14 = vweird.f32 %v1323_v33 }
 0xb0f   :  { %v1320_v34 = vpop.xlane.xlu2 %1319 }
 0xb10   :  { %v1322_v35 = vmul.f32 %v1320_v34, %v3723_v10 }
 0xb12   :  { %v3257_v36 = vpop.eup %3256  ;;  %v1324_v37 = vadd.f32 1e-12, %v1322_v35 }
 0xb13   :  { %v1326_v38 = vmul.f32 %v3257_v36, %v1323_v33  ;;  %vm1332_vm13 = vweird.f32 %v3257_v36 }
 0xb14   :  { %3258 = vrsqrt.f32 %v1324_v37  ;;  %vm1333_vm15 = vmor %vm1331_vm14, %vm1332_vm13  ;;  %vm1341_vm2 = vweird.f32 %v1324_v37  ;;  %vm1501_vm14 = vcmask 523264  }
 0xb15   :  { %v1327_v39 = vmul.f32 %v3257_v36, %v1326_v38  ;;  %3260 = vrcp.f32 %v3556_v61 }
 0xb17   :  { %v1328_v42 = vmul.f32 0.5, %v1327_v39 }
 0xb19   :  { %v1329_v43 = vsub.f32 1.5, %v1328_v42 }
 0xb1a   :  { %v3259_v44 = vpop.eup %3258 }
 0xb1b   :  { %v1330_v46 = vmul.f32 %v3257_v36, %v1329_v43  ;;  %v1336_v48 = vmul.f32 %v3259_v44, %v1324_v37  ;;  %vm1342_vm1 = vweird.f32 %v3259_v44  ;;  %v3261_v62 = vpop.eup %3260  ;;  %v1490_v37 = vld [vmem:[%s4309_s14 + $0x8] sm:$0xff]  ;;  %v1489_v43 = vld [vmem:[%s4309_s14] sm:$0xff] }
 0xb1c   :  { %vm1343_vm3 = vmor %vm1341_vm2, %vm1342_vm1  ;;  %v1397_v63 = vmul.f32 1.4142135, %v3261_v62  ;;  %vm1401_vm4 = vweird.f32 %v3261_v62 }
 0xb1d   :  { %v1334_v50 = vsel %vm1333_vm15, %v3257_v36, %v1330_v46  ;;  %v1337_v40 = vmul.f32 %v3259_v44, %v1336_v48 }
 0xb1e   :  { %v1345_v41 = vmul.f32 %v1334_v50, %v1311_v21  ;;  %v1398_v0 = vsub.f32 1.0, %v1397_v63 }
 0xb1f   :  { %v1338_v53 = vmul.f32 0.5, %v1337_v40 }
 0xb20   :  { %v1350_v45 = vmul.f32 %v3192_v49, %v1345_v41  ;;  %v1399_v1 = vmul.f32 %v3261_v62, %v1398_v0 }
 0xb21   :  { %v1339_v54 = vsub.f32 1.5, %v1338_v53 }
 0xb22   :  { %v3938_v55 = vadd.f32 %v3193_v51, %v1350_v45  ;;  %v1400_v2 = vadd.f32 %v3261_v62, %v1399_v1 }
 0xb23   :  { %v1340_v56 = vmul.f32 %v3259_v44, %v1339_v54 }
 0xb24   :  { %3051 = vmatmul.msk.f32.vlgmr.msrb.gmra.mxu3 %vm201_vm0, %v3938_v55  ;;  %v3949_v5 = vsel %vm1401_vm4, %v3261_v62, %v1400_v2 }
 0xb25   :  { %v1344_v57 = vsel %vm1343_vm3, %v3259_v44, %v1340_v56 }
 0xb26   :  { %v1346_v58 = vmul.f32 %v1344_v57, %v1312_v25  ;;  %v1493_v25 = vld [vmem:[%s4309_s14 + $0x20] sm:$0xff] }
 0xb27   :  { %1519 = vmatpush.msrb.mxu0 %v1493_v25 }
 0xb28   :  { %v1351_v59 = vmul.f32 %v3192_v49, %v1346_v58 }
 0xb29   :  { %1520 = vmatpush.msrb.mxu0 %v1492_v28 }
 0xb2a   :  { %v3942_v60 = vadd.f32 %v3193_v51, %v1351_v59 }
 0xb2b   :  { %1521 = vmatpush.msrb.mxu0 %v1491_v32 }
 0xb2c   :  { %3052 = vmatmul.msk.f32.gmra.mxu3 %vm201_vm0, %v3942_v60 }
 0xb2d   :  { %1522 = vmatpush.msrb.mxu0 %v1490_v37 }
 0xb2f   :  { %1523 = vmatpush.msrb.mxu0 %v1489_v43 }
 0xba7   :  { %v1388_v4 = vpop.f32.mrf.mxu3 }
 0xba8   :  { %v3951_v6 = vadd.f32 %v3194_v3, %v1388_v4 }
 0xbaa   :  { %v3955_v7 = vmul.f32 %v3949_v5, %v3951_v6 }
 0xbac   :  { %v1405_v8 = vmul.f32 %v3955_v7, %v3955_v7 }
 0xbae   :  { %v1406_v9 = vmin.f32 %v1405_v8, 16.0 }
 0xbaf   :  { %v1391_v12 = vpop.f32.mrf.mxu3 }
 0xbb0   :  { %v1407_v14 = vmul.f32 2.1237322e-06, %v1406_v9  ;;  %v1418_v15 = vmul.f32 3.8918573e-05, %v1406_v9  ;;  %v3962_v16 = vadd.f32 %v3194_v3, %v1391_v12 }
 0xbb2   :  { %v1408_v18 = vadd.f32 0.00028619796, %v1407_v14  ;;  %v1419_v20 = vadd.f32 0.001143296, %v1418_v15  ;;  %v3969_v21 = vmul.f32 %v3949_v5, %v3962_v16 }
 0xbb4   :  { %v1409_v23 = vmul.f32 %v1408_v18, %v1406_v9  ;;  %v1420_v47 = vmul.f32 %v1419_v20, %v1406_v9  ;;  %v1445_v24 = vmul.f32 %v3969_v21, %v3969_v21 }
 0xbb6   :  { %v1421_v26 = vadd.f32 0.014752088, %v1420_v47  ;;  %v1446_v27 = vmin.f32 %v1445_v24, 16.0  ;;  %v1410_v52 = vadd.f32 0.0036580483, %v1409_v23 }
 0xbb8   :  { %v1422_v29 = vmul.f32 %v1421_v26, %v1406_v9  ;;  %v1447_v30 = vmul.f32 2.1237322e-06, %v1446_v27  ;;  %v1458_v31 = vmul.f32 3.8918573e-05, %v1446_v27  ;;  %v1411_v35 = vmul.f32 %v1410_v52, %v1406_v9 }
 0xbba   :  { %v1423_v33 = vadd.f32 0.112945676, %v1422_v29  ;;  %v1448_v34 = vadd.f32 0.00028619796, %v1447_v30  ;;  %v1459_v36 = vadd.f32 0.001143296, %v1458_v31 }
 0xbbb   :  { %v1412_v46 = vadd.f32 0.05243302, %v1411_v35  ;;  %v1394_v30 = vmul.f32 0.5, %v3951_v6 }
 0xbbc   :  { %v1424_v38 = vmul.f32 %v1423_v33, %v1406_v9  ;;  %v1449_v39 = vmul.f32 %v1448_v34, %v1446_v27  ;;  %v1460_v42 = vmul.f32 %v1459_v36, %v1446_v27 }
 0xbbd   :  { %v1413_v51 = vmul.f32 %v1412_v46, %v1406_v9 }
 0xbbe   :  { %v1425_v44 = vadd.f32 0.4994258, %v1424_v38  ;;  %v1461_v48 = vadd.f32 0.014752088, %v1460_v42  ;;  %v1450_v50 = vadd.f32 0.0036580483, %v1449_v39 }
 0xbbf   :  { %v1414_v56 = vadd.f32 0.18741608, %v1413_v51  ;;  %v1395_v38 = vmul.f32 0.5, %v3962_v16  ;;  %v3195_v42 = vld [vmem:[%s4310_s15] ss:$0 sm:$0xff] }
 0xbc0   :  { %v1426_v49 = vmul.f32 %v1425_v44, %v1406_v9  ;;  %v1462_v40 = vmul.f32 %v1461_v48, %v1446_v27  ;;  %v1451_v45 = vmul.f32 %v1450_v50, %v1446_v27 }
 0xbc1   :  { %v1415_v62 = vmul.f32 %v1414_v56, %v1406_v9 }
 0xbc2   :  { %v1427_v41 = vadd.f32 1.0, %v1426_v49  ;;  %v1463_v53 = vadd.f32 0.112945676, %v1462_v40  ;;  %v1452_v58 = vadd.f32 0.05243302, %v1451_v45 }
 0xbc3   :  { %v1416_v4 = vadd.f32 1.1283791, %v1415_v62 }
 0xbc4   :  { %3262 = vrcp.f32 %v1427_v41  ;;  %v1464_v54 = vmul.f32 %v1463_v53, %v1446_v27  ;;  %v1453_v1 = vmul.f32 %v1452_v58, %v1446_v27  ;;  %v1439_v3 = vand.u32 2147483648, %v1427_v41 }
 0xbc5   :  { %v1437_v12 = vand.u32 2147483647, %v1427_v41  ;;  %vm1433_vm6 = vweird.f32 %v1427_v41  ;;  %v1417_v18 = vmul.f32 %v1416_v4, %v3955_v7 }
 0xbc6   :  { %v1465_v57 = vadd.f32 0.4994258, %v1464_v54  ;;  %v1454_v13 = vadd.f32 0.18741608, %v1453_v1  ;;  %v1440_v15 = vor.u32 1.1754944e-38, %v1439_v3  ;;  %v3075_v1 = vld [vmem:[%s4336_s3 + $0x28] sm:$0xff] }
 0xbc7   :  { %vm1438_vm9 = vcmp.eq.f32.partialorder %v1437_v12, 8.507059e+37 }
 0xbc8   :  { %v1466_v59 = vmul.f32 %v1465_v57, %v1446_v27  ;;  %v1455_v22 = vmul.f32 %v1454_v13, %v1446_v27 }
 0xbca   :  { %v3263_v61 = vpop.eup %3262  ;;  %v1467_v0 = vadd.f32 1.0, %v1466_v59  ;;  %v1456_v52 = vadd.f32 1.1283791, %v1455_v22  ;;  %v3061_v59 = vld [vmem:[%s4337_s28 + $0x20] sm:$0xff] }
 0xbcb   :  { %v1429_v63 = vmul.f32 %v3263_v61, %v1427_v41  ;;  %vm1434_vm5 = vweird.f32 %v3263_v61  ;;  %3062 = vmatpush.xpose.msk.msra.mxu2 %vm201_vm0, %v3061_v59 }
 0xbcc   :  { %3264 = vrcp.f32 %v1467_v0  ;;  %vm1435_vm7 = vmor %vm1433_vm6, %vm1434_vm5  ;;  %v1479_v26 = vand.u32 2147483648, %v1467_v0  ;;  %v1477_v29 = vand.u32 2147483647, %v1467_v0  ;;  %vm1473_vm13 = vweird.f32 %v1467_v0 }
 0xbcd   :  { %v1430_v2 = vsub.f32 1.0, %v1429_v63  ;;  %v1457_v27 = vmul.f32 %v1456_v52, %v3969_v21 }
 0xbce   :  { %v1480_v33 = vor.u32 1.1754944e-38, %v1479_v26  ;;  %vm1478_vm1 = vcmp.eq.f32.partialorder %v1477_v29, 8.507059e+37 }
 0xbcf   :  { %v1431_v8 = vmul.f32 %v3263_v61, %v1430_v2 }
 0xbd1   :  { %v1432_v14 = vadd.f32 %v3263_v61, %v1431_v8 }
 0xbd2   :  { %v3265_v17 = vpop.eup %3264 }
 0xbd3   :  { %v1436_v20 = vsel %vm1435_vm7, %v3263_v61, %v1432_v14  ;;  %v1469_v23 = vmul.f32 %v3265_v17, %v1467_v0  ;;  %vm1474_vm11 = vweird.f32 %v3265_v17  ;;  %v3065_v61 = vld [vmem:[%s4338_s2 + $0x20] sm:$0xff] }
 0xbd4   :  { %v1441_v9 = vsel %vm1438_vm9, %v1440_v15, %v1436_v20  ;;  %vm1475_vm15 = vmor %vm1473_vm13, %vm1474_vm11  ;;  %3066 = vmatpush.xpose.msk.msra.mxu3 %vm201_vm0, %v3065_v61  ;;  %v3196_v20 = vld [vmem:[%s4311_s16] ss:$0 sm:$0xff] }
 0xbd5   :  { %v1442_v47 = vmul.f32 %v1441_v9, %v1417_v18  ;;  %v1470_v24 = vsub.f32 1.0, %v1469_v23  ;;  %v3197_v23 = vld [vmem:[%s4312_s17] ss:$0 sm:$0xff] }
 0xbd7   :  { %v3053_v25 = vclamps-f32 %v1442_v47, 1.0  ;;  %v1471_v28 = vmul.f32 %v3265_v17, %v1470_v24 }
 0xbd8   :  { %3076 = vmatpush.xpose.msk.msrb.mxu3 %vm201_vm0, %v3075_v1 }
 0xbd9   :  { %v1485_v31 = vadd.f32 1.0, %v3053_v25  ;;  %v1472_v32 = vadd.f32 %v3265_v17, %v1471_v28 }
 0xbdb   :  { %v1487_v7 = vmul.f32 %v1485_v31, %v1394_v30  ;;  %v1476_v34 = vsel %vm1475_vm15, %v3265_v17, %v1472_v32 }
 0xbdc   :  { %v1481_v35 = vsel %vm1478_vm1, %v1480_v33, %v1476_v34  ;;  %v3199_v33 = vld [vmem:[#allocation8 + $0x4] ss:$0 sm:$0xff]  ;;  %v3198_v34 = vld [vmem:[#allocation7 + $0x4] ss:$0 sm:$0xff] }
 0xbdd   :  { %3055 = vmatmul.msk.f32.vlgmr.msrb.gmra.mxu0 %vm1501_vm14, %v1487_v7  ;;  %v1482_v36 = vmul.f32 %v1481_v35, %v1457_v27  ;;  %v3200_v27 = vld [vmem:[#allocation10 + $0x4] ss:$0 sm:$0xff] }
 0xbdf   :  { %v3054_v37 = vclamps-f32 %v1482_v36, 1.0 }
 0xbe1   :  { %v1486_v39 = vadd.f32 1.0, %v3054_v37 }
 0xbe3   :  { %v1488_v6 = vmul.f32 %v1486_v39, %v1395_v38 }
 0xbe5   :  { %3056 = vmatmul.msk.f32.gmra.mxu0 %vm1501_vm14, %v1488_v6 }
 0xc5a   :  { %v1525_v43 = vpop.f32.mrf.mxu0 }
 0xc5b   :  { %v1526_v44 = vadd.f32 %v3195_v42, %v1525_v43 }
 0xc5d   :  { %v1531_v21 = vadd.f32 %v1526_v44, %v3938_v55 }
 0xc5f   :  { %v1535_v46 = vsel %vm201_vm0, %v1531_v21, 0.0 }
 0xc60   :  { %1536 = vadd.xlane.f32.xlu0 %v1535_v46  ;;  %v3079_v46 = vld [vmem:[%s4337_s28 + $0x28] sm:$0xff] }
 0xc62   :  { %v1528_v48 = vpop.f32.mrf.mxu0 }
 0xc63   :  { %v1529_v49 = vadd.f32 %v3195_v42, %v1528_v48 }
 0xc65   :  { %v1532_v50 = vadd.f32 %v1529_v49, %v3942_v60  ;;  %v3057_v60 = vld [vmem:[%s4336_s3 + $0x20] sm:$0xff] }
 0xc66   :  { %3058 = vmatpush.xpose.msk.msrb.mxu1 %vm201_vm0, %v3057_v60 }
 0xc67   :  { %v1538_v16 = vsel %vm201_vm0, %v1532_v50, 0.0 }
 0xc68   :  { %1539 = vadd.xlane.f32.xlu1 %v1538_v16 }
 0xcd3   :  { %v1537_v40 = vpop.xlane.xlu0 %1536 }
 0xcd4   :  { %v1541_v41 = vmul.f32 %v1537_v40, %v3723_v10 }
 0xcd6   :  { %v1543_v51 = vsub.f32 %v1531_v21, %v1541_v41 }
 0xcd8   :  { %v1545_v53 = vmul.f32 %v1543_v51, %v1543_v51 }
 0xcda   :  { %v1547_v45 = vsel %vm201_vm0, %v1545_v53, 0.0 }
 0xcdb   :  { %1548 = vadd.xlane.f32.xlu2 %v1547_v45  ;;  %v1540_v54 = vpop.xlane.xlu1 %1539 }
 0xcdc   :  { %v1542_v55 = vmul.f32 %v1540_v54, %v3723_v10 }
 0xcde   :  { %v1544_v56 = vsub.f32 %v1532_v50, %v1542_v55  ;;  %v3202_v55 = vld [vmem:[#allocation8 + $0x5] ss:$0 sm:$0xff] }
 0xce0   :  { %v1546_v57 = vmul.f32 %v1544_v56, %v1544_v56 }
 0xce2   :  { %v1550_v58 = vsel %vm201_vm0, %v1546_v57, 0.0 }
 0xce3   :  { %1551 = vadd.xlane.f32.xlu0 %v1550_v58 }
 0xd4e   :  { %v1549_v62 = vpop.xlane.xlu2 %1548 }
 0xd4f   :  { %v1553_v63 = vmul.f32 %v1549_v62, %v3723_v10 }
 0xd51   :  { %v1555_v0 = vadd.f32 1e-12, %v1553_v63 }
 0xd53   :  { %3266 = vrsqrt.f32 %v1555_v0  ;;  %vm1563_vm3 = vweird.f32 %v1555_v0 }
 0xd56   :  { %v1552_v2 = vpop.xlane.xlu0 %1551 }
 0xd57   :  { %v1554_v3 = vmul.f32 %v1552_v2, %v3723_v10 }
 0xd59   :  { %v3267_v4 = vpop.eup %3266  ;;  %v1556_v12 = vadd.f32 1e-12, %v1554_v3 }
 0xd5a   :  { %v1558_v8 = vmul.f32 %v3267_v4, %v1555_v0  ;;  %vm1564_vm2 = vweird.f32 %v3267_v4 }
 0xd5b   :  { %3268 = vrsqrt.f32 %v1556_v12  ;;  %vm1565_vm4 = vmor %vm1563_vm3, %vm1564_vm2  ;;  %vm1573_vm6 = vweird.f32 %v1556_v12 }
 0xd5c   :  { %v1559_v13 = vmul.f32 %v3267_v4, %v1558_v8 }
 0xd5e   :  { %v1560_v14 = vmul.f32 0.5, %v1559_v13 }
 0xd60   :  { %v1561_v15 = vsub.f32 1.5, %v1560_v14 }
 0xd61   :  { %v3269_v17 = vpop.eup %3268 }
 0xd62   :  { %v1562_v18 = vmul.f32 %v3267_v4, %v1561_v15  ;;  %v1568_v9 = vmul.f32 %v3269_v17, %v1556_v12  ;;  %vm1574_vm5 = vweird.f32 %v3269_v17 }
 0xd63   :  { %vm1575_vm7 = vmor %vm1573_vm6, %vm1574_vm5 }
 0xd64   :  { %v1566_v22 = vsel %vm1565_vm4, %v3267_v4, %v1562_v18  ;;  %v1569_v24 = vmul.f32 %v3269_v17, %v1568_v9  ;;  %v3083_v4 = vld [vmem:[%s4338_s2 + $0x28] sm:$0xff] }
 0xd65   :  { %v1577_v47 = vmul.f32 %v1566_v22, %v1543_v51  ;;  %v3201_v22 = vld [vmem:[#allocation7 + $0x5] ss:$0 sm:$0xff] }
 0xd66   :  { %v1570_v26 = vmul.f32 0.5, %v1569_v24 }
 0xd67   :  { %v1582_v25 = vmul.f32 %v3196_v20, %v1577_v47 }
 0xd68   :  { %v1571_v28 = vsub.f32 1.5, %v1570_v26 }
 0xd69   :  { %v4032_v52 = vadd.f32 %v3197_v23, %v1582_v25  ;;  %v1819_v25 = vld [vmem:[#allocation11 + $0x20] sm:$0xff] }
 0xd6a   :  { %v1572_v29 = vmul.f32 %v3269_v17, %v1571_v28  ;;  %v3203_v28 = vld [vmem:[#allocation10 + $0x5] ss:$0 sm:$0xff] }
 0xd6b   :  { %3059 = vmatmul.msk.f32.vlgmr.msrb.gmra.mxu1 %vm201_vm0, %v4032_v52  ;;  %3063 = vmatmul.msk.f32.vlgmr.msra.gmra.mxu2 %vm201_vm0, %v4032_v52 }
 0xd6c   :  { %3067 = vmatmul.msk.f32.vlgmr.msra.gmra.mxu3 %vm201_vm0, %v4032_v52  ;;  %v1576_v30 = vsel %vm1575_vm7, %v3269_v17, %v1572_v29 }
 0xd6d   :  { %v1578_v31 = vmul.f32 %v1576_v30, %v1544_v56 }
 0xd6f   :  { %v1583_v32 = vmul.f32 %v3196_v20, %v1578_v31 }
 0xd71   :  { %v4040_v7 = vadd.f32 %v3197_v23, %v1583_v32 }
 0xd73   :  { %3060 = vmatmul.msk.f32.gmra.mxu1 %vm201_vm0, %v4040_v7  ;;  %3064 = vmatmul.msk.f32.gmra.mxu2 %vm201_vm0, %v4040_v7 }
 0xd74   :  { %3068 = vmatmul.msk.f32.gmra.mxu3 %vm201_vm0, %v4040_v7 }
 0xd7c   :  { %3077 = vmatmul.msk.f32.vlgmr.msrb.gmra.mxu3 %vm201_vm0, %v4032_v52 }
 0xd84   :  { %3078 = vmatmul.msk.f32.gmra.mxu3 %vm201_vm0, %v4040_v7 }
 0xde8   :  { %v1622_v35 = vpop.f32.mrf.mxu1 }
 0xde9   :  { %v1623_v6 = vadd.f32 %v3198_v34, %v1622_v35 }
 0xdee   :  { %v1655_v36 = vpop.f32.mrf.mxu2 }
 0xdef   :  { %v1656_v37 = vadd.f32 %v3199_v33, %v1655_v36  ;;  %v1688_v38 = vpop.f32.mrf.mxu3 }
 0xdf0   :  { %v1689_v39 = vadd.f32 %v3200_v27, %v1688_v38  ;;  %v1625_v43 = vpop.f32.mrf.mxu1 }
 0xdf1   :  { %3069 = vmatpush.xpose.msk.msra.mxu1 %vm364_vm8, %v1656_v37  ;;  %v1626_v49 = vadd.f32 %v3198_v34, %v1625_v43 }
 0xdf4   :  { %3070 = vmatmul.msk.f32.vlgmr.msra.gmra.mxu1 %vm364_vm8, %v1623_v6 }
 0xdf5   :  { %1790 = vmatpush.msrb.mxu1 %v1689_v39 }
 0xdf6   :  { %v1658_v42 = vpop.f32.mrf.mxu2 }
 0xdf7   :  { %v1659_v44 = vadd.f32 %v3199_v33, %v1658_v42  ;;  %v1691_v21 = vpop.f32.mrf.mxu3  ;;  %3084 = vmatpush.xpose.msk.msra.mxu1 %vm201_vm0, %v3083_v4 }
 0xdf8   :  { %v1692_v48 = vadd.f32 %v3200_v27, %v1691_v21 }
 0xdf9   :  { %3071 = vmatpush.xpose.msk.msra.mxu0 %vm364_vm8, %v1659_v44 }
 0xdfa   :  { %1813 = vmatpush.msrb.mxu2 %v1692_v48 }
 0xdfc   :  { %3072 = vmatmul.msk.f32.vlgmr.msra.gmra.mxu0 %vm364_vm8, %v1626_v49 }
 0xdfd   :  { %3080 = vmatpush.xpose.msk.msrb.mxu0 %vm201_vm0, %v3079_v46 }
 0xdff   :  { %v1847_v9 = vpop.f32.mrf.mxu3 }
 0xe00   :  { %v1848_v23 = vadd.f32 %v3201_v22, %v1847_v9 }
 0xe04   :  { %3081 = vmatmul.msk.f32.vlgmr.msrb.gmra.mxu0 %vm201_vm0, %v4032_v52 }
 0xe07   :  { %v1850_v47 = vpop.f32.mrf.mxu3 }
 0xe08   :  { %v1851_v24 = vadd.f32 %v3201_v22, %v1850_v47 }
 0xe0c   :  { %3082 = vmatmul.msk.f32.gmra.mxu0 %vm201_vm0, %v4040_v7 }
 0xe71   :  { %v1717_v50 = vpop.f32.mrf.mxu1 }
 0xe72   :  { %v1746_v16 = vmul.f32 0.35355338, %v1717_v50 }
 0xe74   :  { %v1748_v40 = vsel %vm3786_vm10, %v1746_v16, -1e+30 }
 0xe75   :  { %v1750_v41 = vsel %vm364_vm8, %v1748_v40, -inf }
 0xe76   :  { %1751 = vmax.xlane.f32.xlu0 %v1750_v41  ;;  %v3097_v41 = vld [vmem:[%s4336_s3 + $0x30] sm:$0xff] }
 0xe79   :  { %v1743_v51 = vpop.f32.mrf.mxu0 }
 0xe7a   :  { %v1747_v53 = vmul.f32 0.35355338, %v1743_v51  ;;  %v3101_v51 = vld [vmem:[%s4337_s28 + $0x30] sm:$0xff] }
 0xe7c   :  { %v1749_v45 = vsel %vm3793_vm12, %v1747_v53, -1e+30 }
 0xe7d   :  { %v1753_v54 = vsel %vm364_vm8, %v1749_v45, -inf }
 0xe7e   :  { %1754 = vmax.xlane.f32.xlu1 %v1753_v54 }
 0xe81   :  { %v1880_v56 = vpop.f32.mrf.mxu0 }
 0xe82   :  { %v1881_v57 = vadd.f32 %v3202_v55, %v1880_v56 }
 0xe84   :  { %3087 = vmatpush.xpose.msk.msra.mxu2 %vm364_vm8, %v1881_v57 }
 0xe89   :  { %v1883_v15 = vpop.f32.mrf.mxu0 }
 0xe8a   :  { %v1884_v20 = vadd.f32 %v3202_v55, %v1883_v15 }
 0xee9   :  { %v1752_v58 = vpop.xlane.xlu0 %1751 }
 0xeea   :  { %v1756_v60 = vsub.f32 %v1748_v40, %v1752_v58  ;;  %v2044_v58 = vld [vmem:[#allocation11 + $0x28] sm:$0xff] }
 0xeec   :  { %v1758_v59 = vmul.f32 1.442695, %v1756_v60  ;;  %v3105_v60 = vld [vmem:[%s4338_s2 + $0x30] sm:$0xff] }
 0xeee   :  { %3270 = vpow2.f32 %v1758_v59  ;;  %v3121_v59 = vld [vmem:[%s4337_s28 + $0x38] sm:$0xff] }
 0xef1   :  { %v1755_v61 = vpop.xlane.xlu1 %1754 }
 0xef2   :  { %v1757_v62 = vsub.f32 %v1749_v45, %v1755_v61 }
 0xef4   :  { %v3271_v63 = vpop.eup %3270  ;;  %v1760_v0 = vmul.f32 1.442695, %v1757_v62 }
 0xef5   :  { %v1762_v1 = vsel %vm364_vm8, %v3271_v63, 0.0 }
 0xef6   :  { %1763 = vadd.xlane.f32.xlu1 %v1762_v1  ;;  %3272 = vpow2.f32 %v1760_v0  ;;  %v3204_v1 = vld [vmem:[#allocation7 + $0x6] ss:$0 sm:$0xff] }
 0xefc   :  { %v3273_v2 = vpop.eup %3272 }
 0xefd   :  { %v1765_v3 = vsel %vm364_vm8, %v3273_v2, 0.0 }
 0xefe   :  { %1766 = vadd.xlane.f32.xlu2 %v1765_v3 }
 0xf69   :  { %v1764_v8 = vpop.xlane.xlu1 %1763 }
 0xf6a   :  { %3274 = vrcp.f32 %v1764_v8 }
 0xf70   :  { %v3275_v12 = vpop.eup %3274 }
 0xf71   :  { %v1770_v13 = vmul.f32 %v3275_v12, %v3271_v63  ;;  %v1767_v14 = vpop.xlane.xlu2 %1766  ;;  %v3205_v63 = vld [vmem:[#allocation8 + $0x6] ss:$0 sm:$0xff] }
 0xf72   :  { %3276 = vrcp.f32 %v1767_v14 }
 0xf73   :  { %3073 = vmatmul.msk.f32.vlgmr.msrb.gmra.mxu1 %vm364_vm8, %v1770_v13 }
 0xf74   :  { %2066 = vmatpush.msrb.mxu1 %v2044_v58 }
 0xf78   :  { %v3277_v17 = vpop.eup %3276 }
 0xf79   :  { %v1771_v18 = vmul.f32 %v3277_v17, %v3273_v2 }
 0xf7b   :  { %3085 = vmatmul.msk.f32.vlgmr.msra.gmra.mxu1 %vm201_vm0, %v4032_v52  ;;  %3074 = vmatmul.msk.f32.vlgmr.msrb.gmra.mxu2 %vm364_vm8, %v1771_v18  ;;  %v2327_v18 = vld [vmem:[#allocation11 + $0x30] sm:$0xff] }
 0xf7c   :  { %3089 = vmatpush.xpose.msk.msrb.mxu2 %vm364_vm8, %v1884_v20  ;;  %3106 = vmatpush.xpose.msk.msra.mxu1 %vm201_vm0, %v3105_v60 }
 0xf83   :  { %3086 = vmatmul.msk.f32.gmra.mxu1 %vm201_vm0, %v4040_v7  ;;  %3088 = vmatmul.msk.f32.vlgmr.msra.gmra.mxu2 %vm364_vm8, %v1848_v23  ;;  %v3206_v23 = vld [vmem:[#allocation10 + $0x6] ss:$0 sm:$0xff] }
 0xf84   :  { %2095 = vmatpush.msra.mxu2 %v1819_v25 }
 0xf8b   :  { %3090 = vmatmul.msk.f32.vlgmr.msrb.gmra.mxu2 %vm364_vm8, %v1851_v24 }
 0xff0   :  { %v1792_v26 = vpop.f32.mrf.mxu1 }
 0xff1   :  { %3095 = vmatmul.msk.f32.vlgmr.msra.gmra.mxu2 %vm364_vm8, %v1792_v26 }
 0xff8   :  { %v1913_v29 = vpop.f32.mrf.mxu1 }
 0xff9   :  { %v1914_v30 = vadd.f32 %v3203_v28, %v1913_v29 }
 0xffb   :  { %2015 = vmatpush.msra.mxu3 %v1914_v30 }
 0xffd   :  { %3098 = vmatpush.xpose.msk.msrb.mxu3 %vm201_vm0, %v3097_v41 }
 0xffe   :  { %v1815_v31 = vpop.f32.mrf.mxu2 }
 0xfff   :  { %3096 = vmatmul.msk.f32.gmra.mxu2 %vm364_vm8, %v1815_v31 }
0x1000   :  { %v1916_v32 = vpop.f32.mrf.mxu1 }
0x1001   :  { %v1917_v33 = vadd.f32 %v3203_v28, %v1916_v32 }
0x1003   :  { %2038 = vmatpush.msra.mxu0 %v1917_v33  ;;  %v3207_v33 = vld [vmem:[#allocation8 + $0x7] ss:$0 sm:$0xff] }
0x1005   :  { %3102 = vmatpush.xpose.msk.msrb.mxu0 %vm201_vm0, %v3101_v51 }
0x1006   :  { %v1942_v27 = vpop.f32.mrf.mxu2 }
0x1007   :  { %v1971_v34 = vmul.f32 0.35355338, %v1942_v27 }
0x1009   :  { %v1973_v35 = vsel %vm3786_vm10, %v1971_v34, -1e+30 }
0x100a   :  { %v1975_v36 = vsel %vm364_vm8, %v1973_v35, -inf }
0x100b   :  { %1976 = vmax.xlane.f32.xlu2 %v1975_v36 }
0x100e   :  { %v1968_v37 = vpop.f32.mrf.mxu2 }
0x100f   :  { %v1972_v38 = vmul.f32 0.35355338, %v1968_v37 }
0x1011   :  { %v1974_v39 = vsel %vm3793_vm12, %v1972_v38, -1e+30 }
0x1012   :  { %v1978_v6 = vsel %vm364_vm8, %v1974_v39, -inf }
0x1013   :  { %1979 = vmax.xlane.f32.xlu0 %v1978_v6 }
0x1074   :  { %v4136_v15 = vpop.f32.mrf.mxu2 }
0x107e   :  { %v1977_v42 = vpop.xlane.xlu2 %1976 }
0x107f   :  { %v1981_v43 = vsub.f32 %v1973_v35, %v1977_v42 }
0x1081   :  { %v1983_v44 = vmul.f32 1.442695, %v1981_v43 }
0x1082   :  { %v2100_v20 = vpop.f32.mrf.mxu2 }
0x1083   :  { %3278 = vpow2.f32 %v1983_v44 }
0x1086   :  { %v1980_v21 = vpop.xlane.xlu0 %1979 }
0x1087   :  { %v1982_v46 = vsub.f32 %v1974_v39, %v1980_v21 }
0x1089   :  { %v3279_v48 = vpop.eup %3278  ;;  %v1985_v49 = vmul.f32 1.442695, %v1982_v46 }
0x108a   :  { %v1987_v50 = vsel %vm364_vm8, %v3279_v48, 0.0 }
0x108b   :  { %3280 = vpow2.f32 %v1985_v49  ;;  %1988 = vadd.xlane.f32.xlu1 %v1987_v50  ;;  %v3117_v50 = vld [vmem:[%s4336_s3 + $0x38] sm:$0xff] }
0x1091   :  { %v3281_v16 = vpop.eup %3280 }
0x1092   :  { %v1990_v40 = vsel %vm364_vm8, %v3281_v16, 0.0 }
0x1093   :  { %1991 = vadd.xlane.f32.xlu2 %v1990_v40 }
0x10fe   :  { %v1989_v53 = vpop.xlane.xlu1 %1988 }
0x10ff   :  { %3282 = vrcp.f32 %v1989_v53 }
0x1105   :  { %v3283_v45 = vpop.eup %3282 }
0x1106   :  { %v1995_v54 = vmul.f32 %v3283_v45, %v3279_v48  ;;  %v1992_v55 = vpop.xlane.xlu2 %1991 }
0x1107   :  { %3284 = vrcp.f32 %v1992_v55 }
0x1108   :  { %3091 = vmatmul.msk.f32.vlgmr.msra.gmra.mxu3 %vm364_vm8, %v1995_v54 }
0x110d   :  { %v3285_v56 = vpop.eup %3284 }
0x110e   :  { %v1996_v57 = vmul.f32 %v3285_v56, %v3281_v16  ;;  %v3125_v16 = vld [vmem:[%s4338_s2 + $0x38] sm:$0xff] }
0x1110   :  { %3092 = vmatmul.msk.f32.vlgmr.msra.gmra.mxu0 %vm364_vm8, %v1996_v57  ;;  %3099 = vmatmul.msk.f32.vlgmr.msrb.gmra.mxu3 %vm201_vm0, %v4032_v52 }
0x1118   :  { %3100 = vmatmul.msk.f32.gmra.mxu3 %vm201_vm0, %v4040_v7  ;;  %3103 = vmatmul.msk.f32.vlgmr.msrb.gmra.mxu0 %vm201_vm0, %v4032_v52 }
0x1120   :  { %3104 = vmatmul.msk.f32.gmra.mxu0 %vm201_vm0, %v4040_v7 }
0x118b   :  { %v2017_v61 = vpop.f32.mrf.mxu3 }
0x118c   :  { %3093 = vmatmul.msk.f32.vlgmr.msrb.gmra.mxu1 %vm364_vm8, %v2017_v61 }
0x118d   :  { %v2040_v62 = vpop.f32.mrf.mxu0  ;;  %3122 = vmatpush.xpose.msk.msrb.mxu1 %vm201_vm0, %v3121_v59  ;;  %v3208_v59 = vld [vmem:[#allocation7 + $0x7] ss:$0 sm:$0xff] }
0x1193   :  { %v2130_v0 = vpop.f32.mrf.mxu3 }
0x1194   :  { %3094 = vmatmul.msk.f32.gmra.mxu1 %vm364_vm8, %v2040_v62  ;;  %v2131_v4 = vadd.f32 %v3204_v1, %v2130_v0 }
0x1195   :  { %v2163_v2 = vpop.f32.mrf.mxu0 }
0x1196   :  { %v2164_v3 = vadd.f32 %v3205_v63, %v2163_v2 }
0x1198   :  { %3109 = vmatpush.xpose.msk.msrb.mxu2 %vm364_vm8, %v2164_v3 }
0x119b   :  { %3110 = vmatmul.msk.f32.vlgmr.msrb.gmra.mxu2 %vm364_vm8, %v2131_v4  ;;  %v2133_v12 = vpop.f32.mrf.mxu3 }
0x119c   :  { %3107 = vmatmul.msk.f32.vlgmr.msra.gmra.mxu1 %vm201_vm0, %v4032_v52  ;;  %v2134_v14 = vadd.f32 %v3204_v1, %v2133_v12 }
0x119d   :  { %v2166_v8 = vpop.f32.mrf.mxu0 }
0x119e   :  { %v2167_v13 = vadd.f32 %v3205_v63, %v2166_v8  ;;  %v3209_v63 = vld [vmem:[#allocation10 + $0x7] ss:$0 sm:$0xff] }
0x11a0   :  { %3111 = vmatpush.xpose.msk.msra.mxu3 %vm364_vm8, %v2167_v13 }
0x11a3   :  { %3112 = vmatmul.msk.f32.vlgmr.msra.gmra.mxu3 %vm364_vm8, %v2134_v14 }
0x11a4   :  { %3108 = vmatmul.msk.f32.gmra.mxu1 %vm201_vm0, %v4040_v7  ;;  %2349 = vmatpush.msrb.mxu3 %v2327_v18 }
0x11ac   :  { %3123 = vmatmul.msk.f32.vlgmr.msrb.gmra.mxu1 %vm201_vm0, %v4032_v52 }
0x11b4   :  { %3124 = vmatmul.msk.f32.gmra.mxu1 %vm201_vm0, %v4040_v7 }
0x1209   :  { %v4138_v17 = vpop.f32.mrf.mxu1 }
0x120a   :  { %v2098_v8 = vadd.f32 %v4136_v15, %v4138_v17 }
0x1211   :  { %v2071_v9 = vpop.f32.mrf.mxu1 }
0x1212   :  { %v4140_v22 = vadd.f32 %v2100_v20, %v2071_v9 }
0x1219   :  { %v2196_v47 = vpop.f32.mrf.mxu1 }
0x121a   :  { %v2197_v24 = vadd.f32 %v3206_v23, %v2196_v47 }
0x121c   :  { %2298 = vmatpush.msra.mxu0 %v2197_v24 }
0x121e   :  { %v2225_v25 = vpop.f32.mrf.mxu2  ;;  %3118 = vmatpush.xpose.msk.msrb.mxu0 %vm201_vm0, %v3117_v50 }
0x121f   :  { %v2254_v26 = vmul.f32 0.35355338, %v2225_v25 }
0x1221   :  { %v2199_v28 = vpop.f32.mrf.mxu1  ;;  %v2256_v29 = vsel %vm3786_vm10, %v2254_v26, -1e+30 }
0x1222   :  { %v2200_v30 = vadd.f32 %v3206_v23, %v2199_v28  ;;  %v2258_v31 = vsel %vm364_vm8, %v2256_v29, -inf }
0x1223   :  { %2259 = vmax.xlane.f32.xlu0 %v2258_v31 }
0x1224   :  { %2321 = vmatpush.msra.mxu2 %v2200_v30 }
0x1226   :  { %v2251_v32 = vpop.f32.mrf.mxu3  ;;  %3126 = vmatpush.xpose.msk.msrb.mxu2 %vm201_vm0, %v3125_v16 }
0x1227   :  { %v2255_v27 = vmul.f32 0.35355338, %v2251_v32 }
0x1229   :  { %v2419_v34 = vpop.f32.mrf.mxu1  ;;  %v2257_v35 = vsel %vm3793_vm12, %v2255_v27, -1e+30 }
0x122a   :  { %v2420_v36 = vadd.f32 %v3207_v33, %v2419_v34  ;;  %v2261_v37 = vsel %vm364_vm8, %v2257_v35, -inf }
0x122b   :  { %2262 = vmax.xlane.f32.xlu1 %v2261_v37 }
0x122c   :  { %3129 = vmatpush.xpose.msk.msra.mxu3 %vm364_vm8, %v2420_v36 }
0x1231   :  { %v2422_v41 = vpop.f32.mrf.mxu1 }
0x1232   :  { %v2423_v54 = vadd.f32 %v3207_v33, %v2422_v41 }
0x1296   :  { %v2260_v38 = vpop.xlane.xlu0 %2259 }
0x1297   :  { %v2264_v39 = vsub.f32 %v2256_v29, %v2260_v38 }
0x1299   :  { %v2266_v6 = vmul.f32 1.442695, %v2264_v39  ;;  %v2583_v39 = vld [vmem:[#allocation11 + $0x38] sm:$0xff] }
0x129b   :  { %3286 = vpow2.f32 %v2266_v6 }
0x129e   :  { %v2263_v42 = vpop.xlane.xlu1 %2262 }
0x129f   :  { %v2265_v43 = vsub.f32 %v2257_v35, %v2263_v42 }
0x12a1   :  { %v3287_v44 = vpop.eup %3286  ;;  %v2268_v21 = vmul.f32 1.442695, %v2265_v43 }
0x12a2   :  { %v2270_v46 = vsel %vm364_vm8, %v3287_v44, 0.0 }
0x12a3   :  { %3288 = vpow2.f32 %v2268_v21  ;;  %2271 = vadd.xlane.f32.xlu2 %v2270_v46  ;;  %v3210_v21 = vld [vmem:[%s4304_s9 + $0x1] ss:$0 sm:$0xff] }
0x12a9   :  { %v3289_v48 = vpop.eup %3288 }
0x12aa   :  { %v2273_v49 = vsel %vm364_vm8, %v3289_v48, 0.0 }
0x12ab   :  { %2274 = vadd.xlane.f32.xlu0 %v2273_v49 }
0x1316   :  { %v2272_v40 = vpop.xlane.xlu2 %2271 }
0x1317   :  { %3290 = vrcp.f32 %v2272_v40 }
0x131d   :  { %v3291_v51 = vpop.eup %3290 }
0x131e   :  { %v2278_v53 = vmul.f32 %v3291_v51, %v3287_v44  ;;  %v2275_v45 = vpop.xlane.xlu0 %2274 }
0x131f   :  { %3292 = vrcp.f32 %v2275_v45 }
0x1320   :  { %3113 = vmatmul.msk.f32.vlgmr.msra.gmra.mxu0 %vm364_vm8, %v2278_v53 }
0x1321   :  { %3131 = vmatpush.xpose.msk.msra.mxu0 %vm364_vm8, %v2423_v54 }
0x1325   :  { %v3293_v55 = vpop.eup %3292 }
0x1326   :  { %v2279_v56 = vmul.f32 %v3293_v55, %v3289_v48 }
0x1328   :  { %3114 = vmatmul.msk.f32.vlgmr.msra.gmra.mxu2 %vm364_vm8, %v2279_v56  ;;  %3119 = vmatmul.msk.f32.vlgmr.msrb.gmra.mxu0 %vm201_vm0, %v4032_v52 }
0x1330   :  { %3120 = vmatmul.msk.f32.gmra.mxu0 %vm201_vm0, %v4040_v7  ;;  %3127 = vmatmul.msk.f32.vlgmr.msrb.gmra.mxu2 %vm201_vm0, %v4032_v52 }
0x1338   :  { %3128 = vmatmul.msk.f32.gmra.mxu2 %vm201_vm0, %v4040_v7 }
0x139d   :  { %v2300_v57 = vpop.f32.mrf.mxu0 }
0x139e   :  { %3115 = vmatmul.msk.f32.vlgmr.msrb.gmra.mxu3 %vm364_vm8, %v2300_v57 }
0x139f   :  { %2605 = vmatpush.msrb.mxu3 %v2583_v39 }
0x13a5   :  { %v2386_v58 = vpop.f32.mrf.mxu0 }
0x13a6   :  { %v2387_v0 = vadd.f32 %v3208_v59, %v2386_v58 }
0x13ab   :  { %v2323_v60 = vpop.f32.mrf.mxu2 }
0x13ac   :  { %3116 = vmatmul.msk.f32.gmra.mxu3 %vm364_vm8, %v2323_v60 }
0x13ad   :  { %v2389_v61 = vpop.f32.mrf.mxu0 }
0x13ae   :  { %v2390_v62 = vadd.f32 %v3208_v59, %v2389_v61  ;;  %v2685_v61 = vld [vmem:[#allocation13 + $0x30] sm:$0xff] }
0x13b0   :  { %3132 = vmatmul.msk.f32.vlgmr.msra.gmra.mxu0 %vm364_vm8, %v2390_v62  ;;  %v2684_v62 = vld [vmem:[#allocation13 + $0x28] sm:$0xff] }
0x13b3   :  { %v2452_v1 = vpop.f32.mrf.mxu2 }
0x13b4   :  { %v2453_v2 = vadd.f32 %v3209_v63, %v2452_v1  ;;  %3130 = vmatmul.msk.f32.vlgmr.msra.gmra.mxu3 %vm364_vm8, %v2387_v0 }
0x13b6   :  { %2554 = vmatpush.msra.mxu1 %v2453_v2 }
0x13bb   :  { %v2455_v3 = vpop.f32.mrf.mxu2 }
0x13bc   :  { %v2456_v4 = vadd.f32 %v3209_v63, %v2455_v3  ;;  %v2683_v63 = vld [vmem:[#allocation13 + $0x20] sm:$0xff] }
0x13be   :  { %2577 = vmatpush.msra.mxu2 %v2456_v4 }
0x1421   :  { %v2351_v12 = vpop.f32.mrf.mxu3 }
0x1422   :  { %v2357_v13 = vadd.f32 %v2351_v12, %v2098_v8 }
0x142d   :  { %v2507_v14 = vpop.f32.mrf.mxu0 }
0x142e   :  { %v2511_v18 = vmul.f32 0.35355338, %v2507_v14 }
0x142f   :  { %v2354_v20 = vpop.f32.mrf.mxu3 }
0x1430   :  { %v2358_v9 = vadd.f32 %v2354_v20, %v4140_v22  ;;  %v2513_v23 = vsel %vm3793_vm12, %v2511_v18, -1e+30 }
0x1431   :  { %v2517_v47 = vsel %vm364_vm8, %v2513_v23, -inf }
0x1432   :  { %2518 = vmax.xlane.f32.xlu2 %v2517_v47 }
0x1437   :  { %v2481_v24 = vpop.f32.mrf.mxu3 }
0x1438   :  { %v2510_v25 = vmul.f32 0.35355338, %v2481_v24  ;;  %v3211_v24 = vld [vmem:[%s4305_s10 + $0x1] ss:$0 sm:$0xff] }
0x143a   :  { %v2512_v26 = vsel %vm3786_vm10, %v2510_v25, -1e+30 }
0x143b   :  { %v2514_v15 = vsel %vm364_vm8, %v2512_v26, -inf }
0x143c   :  { %2515 = vmax.xlane.f32.xlu1 %v2514_v15  ;;  %v3212_v15 = vld [vmem:[%s4306_s11 + $0x1] ss:$0 sm:$0xff] }
0x14a5   :  { %v2519_v17 = vpop.xlane.xlu2 %2518 }
0x14a6   :  { %v2521_v28 = vsub.f32 %v2513_v23, %v2519_v17 }
0x14a8   :  { %v2524_v29 = vmul.f32 1.442695, %v2521_v28 }
0x14aa   :  { %3294 = vpow2.f32 %v2524_v29 }
0x14af   :  { %v2516_v30 = vpop.xlane.xlu1 %2515 }
0x14b0   :  { %v3295_v22 = vpop.eup %3294  ;;  %v2520_v31 = vsub.f32 %v2512_v26, %v2516_v30 }
0x14b1   :  { %v2529_v19 = vsel %vm364_vm8, %v3295_v22, 0.0 }
0x14b2   :  { %v2522_v32 = vmul.f32 1.442695, %v2520_v31  ;;  %2530 = vadd.xlane.f32.xlu1 %v2529_v19 }
0x14b4   :  { %3296 = vpow2.f32 %v2522_v32 }
0x14ba   :  { %v3297_v33 = vpop.eup %3296 }
0x14bb   :  { %v2526_v27 = vsel %vm364_vm8, %v3297_v33, 0.0 }
0x14bc   :  { %2527 = vadd.xlane.f32.xlu0 %v2526_v27 }
0x1525   :  { %v2531_v11 = vpop.xlane.xlu1 %2530 }
0x1526   :  { %3298 = vrcp.f32 %v2531_v11  ;;  %v3213_v11 = vld [vmem:[%s4308_s13 + $0x1] ss:$0 sm:$0xff] }
0x152c   :  { %v3299_v34 = vpop.eup %3298 }
0x152d   :  { %v2535_v35 = vmul.f32 %v3299_v34, %v3295_v22 }
0x152f   :  { %v2528_v36 = vpop.xlane.xlu0 %2527  ;;  %3134 = vmatmul.msk.f32.vlgmr.msra.gmra.mxu2 %vm364_vm8, %v2535_v35 }
0x1530   :  { %3300 = vrcp.f32 %v2528_v36 }
0x1536   :  { %v3301_v37 = vpop.eup %3300 }
0x1537   :  { %v2534_v38 = vmul.f32 %v3301_v37, %v3297_v33 }
0x1539   :  { %3133 = vmatmul.msk.f32.vlgmr.msra.gmra.mxu1 %vm364_vm8, %v2534_v38 }
0x15b2   :  { %v2579_v42 = vpop.f32.mrf.mxu2 }
0x15b6   :  { %v2556_v6 = vpop.f32.mrf.mxu1 }
0x15b7   :  { %3135 = vmatmul.msk.f32.vlgmr.msrb.gmra.mxu3 %vm364_vm8, %v2556_v6  ;;  %v3152_v6 = vld [vmem:[%s4309_s14 + $0x78] sm:$0xff] }
0x15b8   :  { %2837 = vmatpush.msrb.mxu1 %v3152_v6 }
0x15bf   :  { %3136 = vmatmul.msk.f32.gmra.mxu3 %vm364_vm8, %v2579_v42 }
0x163a   :  { %v2607_v43 = vpop.f32.mrf.mxu3 }
0x163b   :  { %v2613_v44 = vadd.f32 %v2607_v43, %v2357_v13 }
0x163d   :  { %v2615_v46 = vadd.f32 %v2613_v44, %v4032_v52 }
0x163f   :  { %v2622_v48 = vadd.f32 %v3210_v21, %v2615_v46 }
0x1641   :  { %v2628_v49 = vsel %vm201_vm0, %v2622_v48, 0.0 }
0x1642   :  { %2629 = vadd.xlane.f32.xlu2 %v2628_v49  ;;  %v2610_v50 = vpop.f32.mrf.mxu3 }
0x1643   :  { %v2614_v16 = vadd.f32 %v2610_v50, %v2358_v9  ;;  %v3150_v50 = vld [vmem:[%s4309_s14 + $0x68] sm:$0xff] }
0x1645   :  { %v2616_v40 = vadd.f32 %v2614_v16, %v4040_v7  ;;  %v2686_v7 = vld [vmem:[#allocation13 + $0x38] sm:$0xff] }
0x1646   :  { %2710 = vmatpush.msrb.mxu0 %v2686_v7 }
0x1647   :  { %v2623_v41 = vadd.f32 %v3210_v21, %v2616_v40  ;;  %v3151_v21 = vld [vmem:[%s4309_s14 + $0x70] sm:$0xff] }
0x1648   :  { %2711 = vmatpush.msrb.mxu0 %v2685_v61  ;;  %2838 = vmatpush.msrb.mxu1 %v3151_v21  ;;  %v3146_v61 = vld [vmem:[%s4309_s14 + $0x48] sm:$0xff] }
0x1649   :  { %v2631_v51 = vsel %vm201_vm0, %v2623_v41, 0.0 }
0x164a   :  { %2632 = vadd.xlane.f32.xlu0 %v2631_v51  ;;  %2712 = vmatpush.msrb.mxu0 %v2684_v62  ;;  %v3149_v51 = vld [vmem:[%s4309_s14 + $0x60] sm:$0xff] }
0x164b   :  { %2839 = vmatpush.msrb.mxu1 %v3150_v50 }
0x164c   :  { %2713 = vmatpush.msrb.mxu0 %v2683_v63 }
0x164d   :  { %2840 = vmatpush.msrb.mxu1 %v3149_v51 }
0x16b5   :  { %v2630_v53 = vpop.xlane.xlu2 %2629 }
0x16b6   :  { %v2634_v45 = vmul.f32 %v2630_v53, %v3723_v10 }
0x16b8   :  { %v2636_v54 = vsub.f32 %v2622_v48, %v2634_v45 }
0x16ba   :  { %v2638_v55 = vmul.f32 %v2636_v54, %v2636_v54 }
0x16bc   :  { %v2640_v56 = vsel %vm201_vm0, %v2638_v55, 0.0 }
0x16bd   :  { %2641 = vadd.xlane.f32.xlu1 %v2640_v56  ;;  %v2633_v52 = vpop.xlane.xlu0 %2632 }
0x16be   :  { %v2635_v57 = vmul.f32 %v2633_v52, %v3723_v10 }
0x16c0   :  { %v2637_v58 = vsub.f32 %v2623_v41, %v2635_v57  ;;  %v3147_v57 = vld [vmem:[%s4309_s14 + $0x50] sm:$0xff] }
0x16c2   :  { %v2639_v60 = vmul.f32 %v2637_v58, %v2637_v58 }
0x16c4   :  { %v2643_v59 = vsel %vm201_vm0, %v2639_v60, 0.0 }
0x16c5   :  { %2644 = vadd.xlane.f32.xlu2 %v2643_v59 }
0x1730   :  { %v2642_v0 = vpop.xlane.xlu1 %2641 }
0x1731   :  { %v2646_v1 = vmul.f32 %v2642_v0, %v3723_v10 }
0x1733   :  { %v2648_v2 = vadd.f32 1e-12, %v2646_v1  ;;  %v3145_v1 = vld [vmem:[%s4309_s14 + $0x40] sm:$0xff] }
0x1735   :  { %3302 = vrsqrt.f32 %v2648_v2  ;;  %vm2656_vm10 = vweird.f32 %v2648_v2 }
0x1738   :  { %v2645_v3 = vpop.xlane.xlu2 %2644 }
0x1739   :  { %v2647_v4 = vmul.f32 %v2645_v3, %v3723_v10 }
0x173b   :  { %v3303_v8 = vpop.eup %3302  ;;  %v2649_v12 = vadd.f32 1e-12, %v2647_v4 }
0x173c   :  { %v2651_v13 = vmul.f32 %v3303_v8, %v2648_v2  ;;  %vm2657_vm8 = vweird.f32 %v3303_v8 }
0x173d   :  { %3304 = vrsqrt.f32 %v2649_v12  ;;  %vm2658_vm12 = vmor %vm2656_vm10, %vm2657_vm8  ;;  %vm2666_vm11 = vweird.f32 %v2649_v12 }
0x173e   :  { %v2652_v14 = vmul.f32 %v3303_v8, %v2651_v13 }
0x1740   :  { %v2653_v18 = vmul.f32 0.5, %v2652_v14 }
0x1742   :  { %v2654_v20 = vsub.f32 1.5, %v2653_v18 }
0x1743   :  { %v3305_v9 = vpop.eup %3304 }
0x1744   :  { %v2655_v23 = vmul.f32 %v3303_v8, %v2654_v20  ;;  %v2661_v47 = vmul.f32 %v3305_v9, %v2649_v12  ;;  %vm2667_vm9 = vweird.f32 %v3305_v9 }
0x1745   :  { %vm2668_vm13 = vmor %vm2666_vm11, %vm2667_vm9 }
0x1746   :  { %v2659_v25 = vsel %vm2658_vm12, %v3303_v8, %v2655_v23  ;;  %v2662_v26 = vmul.f32 %v3305_v9, %v2661_v47 }
0x1747   :  { %v2670_v17 = vmul.f32 %v2659_v25, %v2636_v54  ;;  %v3148_v54 = vld [vmem:[%s4309_s14 + $0x58] sm:$0xff] }
0x1748   :  { %v2663_v28 = vmul.f32 0.5, %v2662_v26  ;;  %2841 = vmatpush.msrb.mxu1 %v3148_v54 }
0x1749   :  { %v2675_v29 = vmul.f32 %v3211_v24, %v2670_v17 }
0x174a   :  { %v2664_v30 = vsub.f32 1.5, %v2663_v28  ;;  %2842 = vmatpush.msrb.mxu1 %v3147_v57 }
0x174b   :  { %v4208_v22 = vadd.f32 %v3212_v15, %v2675_v29 }
0x174c   :  { %v2665_v31 = vmul.f32 %v3305_v9, %v2664_v30  ;;  %2843 = vmatpush.msrb.mxu1 %v3146_v61 }
0x174d   :  { %3141 = vmatmul.msk.f32.vlgmr.msrb.gmra.mxu0 %vm201_vm0, %v4208_v22 }
0x174e   :  { %v2669_v19 = vsel %vm2668_vm13, %v3305_v9, %v2665_v31  ;;  %2844 = vmatpush.msrb.mxu1 %v3145_v1 }
0x174f   :  { %v2671_v32 = vmul.f32 %v2669_v19, %v2637_v58 }
0x1751   :  { %v2676_v33 = vmul.f32 %v3211_v24, %v2671_v32 }
0x1753   :  { %v4212_v27 = vadd.f32 %v3212_v15, %v2676_v33 }
0x1755   :  { %3142 = vmatmul.msk.f32.gmra.mxu0 %vm201_vm0, %v4212_v27 }
0x17ca   :  { %v2715_v34 = vpop.f32.mrf.mxu0 }
0x17cb   :  { %v4219_v35 = vadd.f32 %v3213_v11, %v2715_v34 }
0x17cd   :  { %v4223_v36 = vmul.f32 %v4219_v35, %v3949_v5 }
0x17cf   :  { %v2725_v37 = vmul.f32 %v4223_v36, %v4223_v36 }
0x17d1   :  { %v2726_v38 = vmin.f32 %v2725_v37, 16.0 }
0x17d2   :  { %v2718_v39 = vpop.f32.mrf.mxu0 }
0x17d3   :  { %v2727_v42 = vmul.f32 2.1237322e-06, %v2726_v38  ;;  %v2738_v43 = vmul.f32 3.8918573e-05, %v2726_v38  ;;  %v4230_v44 = vadd.f32 %v3213_v11, %v2718_v39 }
0x17d5   :  { %v2728_v46 = vadd.f32 0.00028619796, %v2727_v42  ;;  %v2739_v48 = vadd.f32 0.001143296, %v2738_v43  ;;  %v4237_v49 = vmul.f32 %v4230_v44, %v3949_v5 }
0x17d7   :  { %v2729_v16 = vmul.f32 %v2728_v46, %v2726_v38  ;;  %v2740_v40 = vmul.f32 %v2739_v48, %v2726_v38  ;;  %v2765_v41 = vmul.f32 %v4237_v49, %v4237_v49 }
0x17d9   :  { %v2741_v53 = vadd.f32 0.014752088, %v2740_v40  ;;  %v2766_v45 = vmin.f32 %v2765_v41, 16.0  ;;  %v2730_v5 = vadd.f32 0.0036580483, %v2729_v16 }
0x17db   :  { %v2742_v55 = vmul.f32 %v2741_v53, %v2726_v38  ;;  %v2767_v56 = vmul.f32 2.1237322e-06, %v2766_v45  ;;  %v2778_v52 = vmul.f32 3.8918573e-05, %v2766_v45  ;;  %v2731_v59 = vmul.f32 %v2730_v5, %v2726_v38 }
0x17dc   :  { %v2721_v5 = vmul.f32 0.5, %v4219_v35  ;;  %v3214_v35 = vld [vmem:[%s4310_s15 + $0x1] ss:$0 sm:$0xff] }
0x17dd   :  { %v2743_v58 = vadd.f32 0.112945676, %v2742_v55  ;;  %v2768_v60 = vadd.f32 0.00028619796, %v2767_v56  ;;  %v2779_v7 = vadd.f32 0.001143296, %v2778_v52 }
0x17de   :  { %v2732_v3 = vadd.f32 0.05243302, %v2731_v59  ;;  %v2722_v59 = vmul.f32 0.5, %v4230_v44 }
0x17df   :  { %v2744_v62 = vmul.f32 %v2743_v58, %v2726_v38  ;;  %v2769_v63 = vmul.f32 %v2768_v60, %v2766_v45  ;;  %v2780_v0 = vmul.f32 %v2779_v7, %v2766_v45 }
0x17e0   :  { %v2733_v18 = vmul.f32 %v2732_v3, %v2726_v38 }
0x17e1   :  { %v2745_v2 = vadd.f32 0.4994258, %v2744_v62  ;;  %v2781_v4 = vadd.f32 0.014752088, %v2780_v0  ;;  %v2770_v12 = vadd.f32 0.0036580483, %v2769_v63 }
0x17e2   :  { %v2734_v47 = vadd.f32 0.18741608, %v2733_v18 }
0x17e3   :  { %v2746_v8 = vmul.f32 %v2745_v2, %v2726_v38  ;;  %v2782_v13 = vmul.f32 %v2781_v4, %v2766_v45  ;;  %v2771_v9 = vmul.f32 %v2770_v12, %v2766_v45 }
0x17e4   :  { %v2735_v17 = vmul.f32 %v2734_v47, %v2726_v38  ;;  %v2914_v47 = vld [vmem:[#allocation14 + $0x10] sm:$0xff] }
0x17e5   :  { %v2747_v14 = vadd.f32 1.0, %v2746_v8  ;;  %v2783_v20 = vadd.f32 0.112945676, %v2782_v13  ;;  %v2772_v25 = vadd.f32 0.05243302, %v2771_v9 }
0x17e6   :  { %v2736_v32 = vadd.f32 1.1283791, %v2735_v17 }
0x17e7   :  { %3306 = vrcp.f32 %v2747_v14  ;;  %v2784_v23 = vmul.f32 %v2783_v20, %v2766_v45  ;;  %v2773_v30 = vmul.f32 %v2772_v25, %v2766_v45  ;;  %v2759_v19 = vand.u32 2147483648, %v2747_v14  ;;  %v2912_v25 = vld [vmem:[#allocation14] sm:$0xff] }
0x17e8   :  { %v2757_v11 = vand.u32 2147483647, %v2747_v14  ;;  %vm2753_vm1 = vweird.f32 %v2747_v14  ;;  %v2737_v42 = vmul.f32 %v2736_v32, %v4223_v36 }
0x17e9   :  { %v2785_v24 = vadd.f32 0.4994258, %v2784_v23  ;;  %v2774_v34 = vadd.f32 0.18741608, %v2773_v30  ;;  %v2760_v39 = vor.u32 1.1754944e-38, %v2759_v19 }
0x17ea   :  { %vm2758_vm3 = vcmp.eq.f32.partialorder %v2757_v11, 8.507059e+37 }
0x17eb   :  { %v2786_v26 = vmul.f32 %v2785_v24, %v2766_v45  ;;  %v2775_v21 = vmul.f32 %v2774_v34, %v2766_v45  ;;  %v2913_v24 = vld [vmem:[#allocation14 + $0x8] sm:$0xff] }
0x17ed   :  { %v3307_v15 = vpop.eup %3306  ;;  %v2787_v29 = vadd.f32 1.0, %v2786_v26  ;;  %v2776_v41 = vadd.f32 1.1283791, %v2775_v21 }
0x17ee   :  { %v2749_v28 = vmul.f32 %v3307_v15, %v2747_v14  ;;  %vm2754_vm15 = vweird.f32 %v3307_v15 }
0x17ef   :  { %3308 = vrcp.f32 %v2787_v29  ;;  %vm2755_vm2 = vmor %vm2753_vm1, %vm2754_vm15  ;;  %v2799_v40 = vand.u32 2147483648, %v2787_v29  ;;  %v2797_v53 = vand.u32 2147483647, %v2787_v29  ;;  %vm2793_vm5 = vweird.f32 %v2787_v29 }
0x17f0   :  { %v2750_v31 = vsub.f32 1.0, %v2749_v28  ;;  %v2777_v52 = vmul.f32 %v2776_v41, %v4237_v49 }
0x17f1   :  { %v2800_v36 = vor.u32 1.1754944e-38, %v2799_v40  ;;  %vm2798_vm7 = vcmp.eq.f32.partialorder %v2797_v53, 8.507059e+37 }
0x17f2   :  { %v2751_v33 = vmul.f32 %v3307_v15, %v2750_v31 }
0x17f4   :  { %v2752_v37 = vadd.f32 %v3307_v15, %v2751_v33 }
0x17f5   :  { %v3309_v6 = vpop.eup %3308 }
0x17f6   :  { %v2756_v43 = vsel %vm2755_vm2, %v3307_v15, %v2752_v37  ;;  %v2789_v46 = vmul.f32 %v3309_v6, %v2787_v29  ;;  %vm2794_vm4 = vweird.f32 %v3309_v6 }
0x17f7   :  { %v2761_v38 = vsel %vm2758_vm3, %v2760_v39, %v2756_v43  ;;  %vm2795_vm6 = vmor %vm2793_vm5, %vm2794_vm4  ;;  %v3215_v39 = vld [vmem:[%s4311_s16 + $0x1] ss:$0 sm:$0xff] }
0x17f8   :  { %v2762_v48 = vmul.f32 %v2761_v38, %v2737_v42  ;;  %v2790_v50 = vsub.f32 1.0, %v2789_v46 }
0x17fa   :  { %v3143_v16 = vclamps-f32 %v2762_v48, 1.0  ;;  %v2791_v51 = vmul.f32 %v3309_v6, %v2790_v50 }
0x17fc   :  { %v2805_v54 = vadd.f32 1.0, %v3143_v16  ;;  %v2792_v55 = vadd.f32 %v3309_v6, %v2791_v51 }
0x17fe   :  { %v2807_v56 = vmul.f32 %v2805_v54, %v2721_v5  ;;  %v2796_v45 = vsel %vm2795_vm6, %v3309_v6, %v2792_v55  ;;  %v3217_v5 = vld [vmem:[%s4316_s21] ss:$0 sm:$0xff] }
0x17ff   :  { %v2801_v57 = vsel %vm2798_vm7, %v2800_v36, %v2796_v45 }
0x1800   :  { %3154 = vmatmul.msk.f32.vlgmr.msrb.gmra.mxu1 %vm1501_vm14, %v2807_v56  ;;  %v2802_v58 = vmul.f32 %v2801_v57, %v2777_v52 }
0x1802   :  { %v3144_v60 = vclamps-f32 %v2802_v58, 1.0 }
0x1804   :  { %v2806_v7 = vadd.f32 1.0, %v3144_v60 }
0x1806   :  { %v2808_v61 = vmul.f32 %v2806_v7, %v2722_v59 }
0x1808   :  { %3155 = vmatmul.msk.f32.gmra.mxu1 %vm1501_vm14, %v2808_v61 }
0x187d   :  { %v2846_v62 = vpop.f32.mrf.mxu1 }
0x187e   :  { %v2847_v63 = vadd.f32 %v3214_v35, %v2846_v62 }
0x1880   :  { %v2852_v49 = vadd.f32 %v2847_v63, %v4208_v22 }
0x1882   :  { %v2858_v0 = vsel %vm201_vm0, %v2852_v49, 0.0 }
0x1883   :  { %2859 = vadd.xlane.f32.xlu0 %v2858_v0 }
0x1885   :  { %v2849_v1 = vpop.f32.mrf.mxu1 }
0x1886   :  { %v2850_v2 = vadd.f32 %v3214_v35, %v2849_v1 }
0x1888   :  { %v2853_v3 = vadd.f32 %v2850_v2, %v4212_v27  ;;  %v2915_v27 = vld [vmem:[#allocation14 + $0x18] sm:$0xff] }
0x1889   :  { %2938 = vmatpush.msrb.mxu2 %v2915_v27 }
0x188a   :  { %v2861_v44 = vsel %vm201_vm0, %v2853_v3, 0.0 }
0x188b   :  { %2862 = vadd.xlane.f32.xlu1 %v2861_v44  ;;  %2939 = vmatpush.msrb.mxu2 %v2914_v47 }
0x188d   :  { %2940 = vmatpush.msrb.mxu2 %v2913_v24 }
0x188f   :  { %2941 = vmatpush.msrb.mxu2 %v2912_v25 }
0x18f6   :  { %v2860_v4 = vpop.xlane.xlu0 %2859 }
0x18f7   :  { %v2864_v8 = vmul.f32 %v2860_v4, %v3723_v10 }
0x18f9   :  { %v2866_v12 = vsub.f32 %v2852_v49, %v2864_v8 }
0x18fb   :  { %v2868_v13 = vmul.f32 %v2866_v12, %v2866_v12 }
0x18fd   :  { %v2870_v14 = vsel %vm201_vm0, %v2868_v13, 0.0 }
0x18fe   :  { %2871 = vadd.xlane.f32.xlu2 %v2870_v14  ;;  %v2863_v18 = vpop.xlane.xlu1 %2862 }
0x18ff   :  { %v2865_v22 = vmul.f32 %v2863_v18, %v3723_v10 }
0x1901   :  { %v2867_v20 = vsub.f32 %v2853_v3, %v2865_v22 }
0x1903   :  { %v2869_v9 = vmul.f32 %v2867_v20, %v2867_v20 }
0x1905   :  { %v2873_v23 = vsel %vm201_vm0, %v2869_v9, 0.0 }
0x1906   :  { %2874 = vadd.xlane.f32.xlu0 %v2873_v23 }
0x1971   :  { %v2872_v26 = vpop.xlane.xlu2 %2871 }
0x1972   :  { %v2876_v15 = vmul.f32 %v2872_v26, %v3723_v10 }
0x1974   :  { %v2878_v17 = vadd.f32 1e-12, %v2876_v15 }
0x1976   :  { %3310 = vrsqrt.f32 %v2878_v17  ;;  %vm2886_vm8 = vweird.f32 %v2878_v17 }
0x1979   :  { %v2875_v28 = vpop.xlane.xlu0 %2874 }
0x197a   :  { %v2877_v29 = vmul.f32 %v2875_v28, %v3723_v10  ;;  %v3216_v10 = vld [vmem:[%s4312_s17 + $0x1] ss:$0 sm:$0xff] }
0x197c   :  { %v3311_v30 = vpop.eup %3310  ;;  %v2879_v19 = vadd.f32 1e-12, %v2877_v29 }
0x197d   :  { %v2881_v31 = vmul.f32 %v3311_v30, %v2878_v17  ;;  %vm2887_vm14 = vweird.f32 %v3311_v30 }
0x197e   :  { %3312 = vrsqrt.f32 %v2879_v19  ;;  %vm2888_vm10 = vmor %vm2886_vm8, %vm2887_vm14  ;;  %vm2896_vm9 = vweird.f32 %v2879_v19 }
0x197f   :  { %v2882_v32 = vmul.f32 %v3311_v30, %v2881_v31 }
0x1981   :  { %v2883_v33 = vmul.f32 0.5, %v2882_v32 }
0x1983   :  { %v2884_v11 = vsub.f32 1.5, %v2883_v33 }
0x1984   :  { %v3313_v34 = vpop.eup %3312 }
0x1985   :  { %v2885_v37 = vmul.f32 %v3311_v30, %v2884_v11  ;;  %v2891_v6 = vmul.f32 %v3313_v34, %v2879_v19  ;;  %vm2897_vm12 = vweird.f32 %v3313_v34 }
0x1986   :  { %vm2898_vm11 = vmor %vm2896_vm9, %vm2897_vm12 }
0x1987   :  { %v2889_v42 = vsel %vm2888_vm10, %v3311_v30, %v2885_v37  ;;  %v2892_v38 = vmul.f32 %v3313_v34, %v2891_v6 }
0x1988   :  { %v2900_v43 = vmul.f32 %v2889_v42, %v2866_v12 }
0x1989   :  { %v2893_v46 = vmul.f32 0.5, %v2892_v38 }
0x198a   :  { %v2905_v21 = vmul.f32 %v3215_v39, %v2900_v43 }
0x198b   :  { %v2894_v50 = vsub.f32 1.5, %v2893_v46 }
0x198c   :  { %v2910_v48 = vadd.f32 %v3216_v10, %v2905_v21 }
0x198d   :  { %v2895_v16 = vmul.f32 %v3313_v34, %v2894_v50 }
0x198e   :  { %3158 = vmatmul.msk.f32.vlgmr.msrb.gmra.mxu2 %vm201_vm0, %v2910_v48 }
0x198f   :  { %v2899_v40 = vsel %vm2898_vm11, %v3313_v34, %v2895_v16 }
0x1990   :  { %v2901_v41 = vmul.f32 %v2899_v40, %v2867_v20 }
0x1992   :  { %v2906_v51 = vmul.f32 %v3215_v39, %v2901_v41 }
0x1994   :  { %v2911_v53 = vadd.f32 %v3216_v10, %v2906_v51 }
0x1996   :  { %3159 = vmatmul.msk.f32.gmra.mxu2 %vm201_vm0, %v2911_v53 }
0x1a11   :  { %v2943_v54 = vpop.f32.mrf.mxu2 }
0x1a12   :  { %v2944_v55 = vadd.f32 %v3217_v5, %v2943_v54 }
0x1a14   :  { %2949 = vst [vmem:[#allocation16] sm:$0xff] %v2944_v55 }
0x1a19   :  { %v2946_v56 = vpop.f32.mrf.mxu2 }
0x1a1a   :  { %v2947_v36 = vadd.f32 %v3217_v5, %v2946_v56 }
0x1a1c   :  { %2950 = vst [vmem:[#allocation16 + $0x8] sm:$0xff] %v2947_v36 }
0x1a1d   :  { %2963 = dma.vmem_to_hbm [thread:$0]  %s2956_s6, 256, %s2958_s20, [#allocation4], %s3547_s0, %s3547_s0, %s3548_s22  }
0x1a1e   :  { %3540 = dma.done.wait [#allocation4], 256  }
0x1a1f   :  { %3541 = vsyncadd [#allocation4], 4294967040 }
0x1a20   :  { %2968 = vsyncpa [#allocation3], 1 }
0x1a21   :  { %2969 = vsyncpa [#allocation6], 1 }
0x1a22   :  { %2970 = vsyncpa [#allocation9], 1 }
0x1a23   :  { %2971 = vsyncpa [#allocation12], 1 }
0x1a24   :  { %2972 = vsyncpa [#allocation15], 1 }
0x1a25   :  { %2973 = vsyncpa [#allocation4], 1 }

</bundles_post_ra>
